<compile_context>
chip_gen: v7x
topology: tpu7x:2x2x1
jax: 0.10.0
libtpu: 0.0.40
codegen_flags: <defaults>
</compile_context>

<pallas_src>
import jax
import jax.numpy as jnp
from jax.experimental import pallas as pl
from jax.experimental.pallas import tpu as pltpu


# ----------------------------------------------------------------------------
# Fused kernel: conv1(3x3,s1,p1)+ReLU -> conv2(3x3,s2,p1)+ReLU -> mean pool -> linear
# ----------------------------------------------------------------------------
def _style_encoder_kernel(xpp_ref, w1_ref, b1_ref, w2_ref, b2_ref, w3_ref,
                          b3_ref, o_ref, s_ref):
    # xpp_ref : [4*N, HP, WP, Cin]  phase-split, zero-padded input
    #           xpp[(u*2+v)*N + b, a, c, :] == x_padded[b, 2a+u, 2c+v, :]
    # s_ref   : [4*N, HP, WP, C1]   phase-split, zero-padded conv1 output (scratch)
    n = o_ref.shape[0]
    hp = xpp_ref.shape[1]          # (H+2)//2
    e = hp - 1                     # = H//2 : conv2 output rows/cols, per-phase interior
    cin = xpp_ref.shape[3]
    c1 = w1_ref.shape[2]
    c2 = w2_ref.shape[2]
    m = n * e * e

    # Zero the scratch once: its border rows/cols are the conv "same" padding.
    s_ref[...] = jnp.zeros_like(s_ref)

    # ---- Conv1: 3x3, stride 1, pad 1, ReLU — computed per output phase (p, q) ----
    for p in range(2):
        a0 = 1 - p                         # interior start along the phase-row axis
        for q in range(2):
            b0 = 1 - q
            acc = jnp.zeros((m, c1), jnp.float32)
            for di in range(3):
                tr = p - 1 + di
                u, fa = tr % 2, tr // 2    # input row phase / row offset
                ra = a0 + fa
                for dj in range(3):
                    tc = q - 1 + dj
                    v, fb = tc % 2, tc // 2
                    rb = b0 + fb
                    ub = (u * 2 + v) * n
                    xs = xpp_ref[ub:ub + n, ra:ra + e, rb:rb + e, :]
                    acc += jnp.dot(xs.reshape(m, cin), w1_ref[di * 3 + dj],
                                   preferred_element_type=jnp.float32)
            y1 = jnp.maximum(acc + b1_ref[...], 0.0)
            pq = (p * 2 + q) * n
            s_ref[pq:pq + n, a0:a0 + e, b0:b0 + e, :] = y1.reshape(n, e, e, c1)

    # ---- Conv2: 3x3, stride 2, pad 1, ReLU — 9 accumulated dots on phase slabs ----
    acc2 = jnp.zeros((m, c2), jnp.float32)
    for di in range(3):
        for dj in range(3):
            pq = ((di % 2) * 2 + (dj % 2)) * n
            a0, b0 = di // 2, dj // 2
            ys = s_ref[pq:pq + n, a0:a0 + e, b0:b0 + e, :]
            acc2 += jnp.dot(ys.reshape(m, c1), w2_ref[di * 3 + dj],
                            preferred_element_type=jnp.float32)
    y2 = jnp.maximum(acc2 + b2_ref[...], 0.0)

    # ---- AdaptiveAvgPool2d(1) + Flatten + Linear ----
    pooled = jnp.mean(y2.reshape(n, e * e, c2), axis=1)          # [N, C2]
    o_ref[...] = (jnp.dot(pooled, w3_ref[...],
                          preferred_element_type=jnp.float32)
                  + b3_ref[...]).astype(o_ref.dtype)


def _full_spec(shape):
    """Whole-array VMEM block (no grid)."""
    rank = len(shape)

    def index_map():
        return (0,) * rank

    return pl.BlockSpec(shape, index_map)


# ----------------------------------------------------------------------------
# Forward
# ----------------------------------------------------------------------------
def style_encoder_forward(x_nchw, params):
    """x_nchw: [N, 4, H, W] (H, W even, e.g. 16x16).  Returns style features [N, 32]."""
    x = jnp.transpose(x_nchw, (0, 2, 3, 1)).astype(jnp.float32)   # NHWC
    n, h, w, cin = x.shape
    hp, wp = (h + 2) // 2, (w + 2) // 2

    # Zero-pad spatially (pad=1) and split into even/odd row/col phases so the
    # stride-2 conv inside the kernel only needs unit-stride static slices.
    # This is one tiny fused XLA op on an ~8 KB tensor before the single kernel launch.
    xp = jnp.pad(x, ((0, 0), (1, 1), (1, 1), (0, 0)))
    xpp = (xp.reshape(n, hp, 2, wp, 2, cin)
             .transpose(2, 4, 0, 1, 3, 5)
             .reshape(4 * n, hp, wp, cin))

    w1, b1 = params["w1"], params["b1"].reshape(1, -1)
    w2, b2 = params["w2"], params["b2"].reshape(1, -1)
    w3, b3 = params["w3"], params["b3"].reshape(1, -1)
    c1 = w1.shape[2]
    d_out = w3.shape[1]

    args = (xpp, w1, b1, w2, b2, w3, b3)
    return pl.pallas_call(
        _style_encoder_kernel,
        out_shape=jax.ShapeDtypeStruct((n, d_out), jnp.float32),
        in_specs=[_full_spec(a.shape) for a in args],
        out_specs=_full_spec((n, d_out)),
        scratch_shapes=[pltpu.VMEM((4 * n, hp, wp, c1), jnp.float32)],
    )(*args)


def init_params(key):
    k1, k2, k3, k4, k5, k6 = jax.random.split(key, 6)
    cin, c1, c2, out_dim = 4, 8, 16, 32
    # conv weights laid out as [KH*KW, Cin, Cout], tap index = di*3 + dj
    w1 = jax.random.normal(k1, (9, cin, c1), jnp.float32) * 0.1
    b1 = jax.random.normal(k2, (c1,), jnp.float32) * 0.01
    w2 = jax.random.normal(k3, (9, c1, c2), jnp.float32) * 0.1
    b2 = jax.random.normal(k4, (c2,), jnp.float32) * 0.01
    w3 = jax.random.normal(k5, (c2, out_dim), jnp.float32) * 0.1
    b3 = jax.random.normal(k6, (out_dim,), jnp.float32) * 0.01
    return dict(w1=w1, b1=b1, w2=w2, b2=b2, w3=w3, b3=b3)


if __name__ == "__main__":
    key = jax.random.PRNGKey(0)
    kx, kp = jax.random.split(key)
    x = jax.random.normal(kx, (2, 4, 16, 16), jnp.float32)   # NCHW like PyTorch
    params = init_params(kp)

    out = jax.jit(style_encoder_forward)(x, params)
    out = jax.block_until_ready(out)
    assert out.shape == (2, 32), out.shape

    # Pure-JAX reference (conv via lax.conv_general_dilated)
    def ref(x_nchw, p):
        xh = jnp.transpose(x_nchw, (0, 2, 3, 1))

        def conv(xh, wm, b, stride):
            cin, cout = wm.shape[1], wm.shape[2]
            wk = wm.reshape(3, 3, cin, cout)
            y = jax.lax.conv_general_dilated(
                xh, wk, (stride, stride), ((1, 1), (1, 1)),
                dimension_numbers=("NHWC", "HWIO", "NHWC"))
            return jnp.maximum(y + b, 0.0)

        xh = conv(xh, p["w1"], p["b1"], 1)
        xh = conv(xh, p["w2"], p["b2"], 2)
        pooled = jnp.mean(xh, axis=(1, 2))
        return pooled @ p["w3"] + p["b3"]

    ref_out = ref(x, params)
    assert jnp.allclose(out, ref_out, atol=1e-4, rtol=1e-4), (
        float(jnp.max(jnp.abs(out - ref_out))))

    print("KERNEL_OK")
</pallas_src>

<mosaic_0001>
module attributes {stable_mosaic.version = 11 : i64} {
  func.func @_style_encoder_kernel(%arg0: memref<8x9x9x4xf32, #tpu.memory_space<vmem>>, %arg1: memref<9x4x8xf32, #tpu.memory_space<vmem>>, %arg2: memref<1x8xf32, #tpu.memory_space<vmem>>, %arg3: memref<9x8x16xf32, #tpu.memory_space<vmem>>, %arg4: memref<1x16xf32, #tpu.memory_space<vmem>>, %arg5: memref<16x32xf32, #tpu.memory_space<vmem>>, %arg6: memref<1x32xf32, #tpu.memory_space<vmem>>, %arg7: memref<2x32xf32, #tpu.memory_space<vmem>>, %arg8: memref<8x9x9x8xf32, #tpu.memory_space<vmem>>) attributes {dimension_semantics = [], scalar_prefetch = 0 : i64, scratch_operands = 1 : i64, tpu.core_type = #tpu.core_type<tc>} {
    %cst = arith.constant 0.000000e+00 : f32
    %0 = vector.broadcast %cst : f32 to vector<8x9x9x8xf32>
    %c0 = arith.constant 0 : index
    %c0_0 = arith.constant 0 : index
    %c0_1 = arith.constant 0 : index
    %c0_2 = arith.constant 0 : index
    %1 = vector.load %arg8[%c0, %c0_0, %c0_1, %c0_2] : memref<8x9x9x8xf32, #tpu.memory_space<vmem>>, vector<8x9x9x8xf32>
    tpu.vector_store %arg8[%c0, %c0_0, %c0_1, %c0_2], %0 {strides = array<i32>} : memref<8x9x9x8xf32, #tpu.memory_space<vmem>>, vector<8x9x9x8xf32>,
    %cst_3 = arith.constant 0.000000e+00 : f32
    %2 = vector.broadcast %cst_3 : f32 to vector<128x8xf32>
    %c6 = arith.constant 6 : index
    %c0_4 = arith.constant 0 : index
    %c0_5 = arith.constant 0 : index
    %c0_6 = arith.constant 0 : index
    %3 = vector.load %arg0[%c6, %c0_4, %c0_5, %c0_6] : memref<8x9x9x4xf32, #tpu.memory_space<vmem>>, vector<2x8x8x4xf32>
    %4 = vector.shape_cast %3 : vector<2x8x8x4xf32> to vector<128x4xf32>
    %c0_7 = arith.constant 0 : index
    %c0_8 = arith.constant 0 : index
    %c0_9 = arith.constant 0 : index
    %5 = vector.load %arg1[%c0_7, %c0_8, %c0_9] : memref<9x4x8xf32, #tpu.memory_space<vmem>>, vector<1x4x8xf32>
    %6 = vector.shape_cast %5 : vector<1x4x8xf32> to vector<4x8xf32>
    %cst_10 = arith.constant dense<0.000000e+00> : vector<128x8xf32>
    %7 = tpu.matmul %4, %6, %cst_10 {dimension_numbers = #tpu.dot_dimension_numbers<[1], [0], [0], [1], [0, 0, 1, 1], [], []>} : vector<128x4xf32>, vector<4x8xf32>, vector<128x8xf32> -> vector<128x8xf32>
    %8 = arith.addf %2, %7 : vector<128x8xf32>
    %c4 = arith.constant 4 : index
    %c0_11 = arith.constant 0 : index
    %c1 = arith.constant 1 : index
    %c0_12 = arith.constant 0 : index
    %9 = vector.load %arg0[%c4, %c0_11, %c1, %c0_12] : memref<8x9x9x4xf32, #tpu.memory_space<vmem>>, vector<2x8x8x4xf32>
    %10 = vector.shape_cast %9 : vector<2x8x8x4xf32> to vector<128x4xf32>
    %c1_13 = arith.constant 1 : index
    %c0_14 = arith.constant 0 : index
    %c0_15 = arith.constant 0 : index
    %11 = vector.load %arg1[%c1_13, %c0_14, %c0_15] : memref<9x4x8xf32, #tpu.memory_space<vmem>>, vector<1x4x8xf32>
    %12 = vector.shape_cast %11 : vector<1x4x8xf32> to vector<4x8xf32>
    %cst_16 = arith.constant dense<0.000000e+00> : vector<128x8xf32>
    %13 = tpu.matmul %10, %12, %cst_16 {dimension_numbers = #tpu.dot_dimension_numbers<[1], [0], [0], [1], [0, 0, 1, 1], [], []>} : vector<128x4xf32>, vector<4x8xf32>, vector<128x8xf32> -> vector<128x8xf32>
    %14 = arith.addf %8, %13 : vector<128x8xf32>
    %c6_17 = arith.constant 6 : index
    %c0_18 = arith.constant 0 : index
    %c1_19 = arith.constant 1 : index
    %c0_20 = arith.constant 0 : index
    %15 = vector.load %arg0[%c6_17, %c0_18, %c1_19, %c0_20] : memref<8x9x9x4xf32, #tpu.memory_space<vmem>>, vector<2x8x8x4xf32>
    %16 = vector.shape_cast %15 : vector<2x8x8x4xf32> to vector<128x4xf32>
    %c2 = arith.constant 2 : index
    %c0_21 = arith.constant 0 : index
    %c0_22 = arith.constant 0 : index
    %17 = vector.load %arg1[%c2, %c0_21, %c0_22] : memref<9x4x8xf32, #tpu.memory_space<vmem>>, vector<1x4x8xf32>
    %18 = vector.shape_cast %17 : vector<1x4x8xf32> to vector<4x8xf32>
    %cst_23 = arith.constant dense<0.000000e+00> : vector<128x8xf32>
    %19 = tpu.matmul %16, %18, %cst_23 {dimension_numbers = #tpu.dot_dimension_numbers<[1], [0], [0], [1], [0, 0, 1, 1], [], []>} : vector<128x4xf32>, vector<4x8xf32>, vector<128x8xf32> -> vector<128x8xf32>
    %20 = arith.addf %14, %19 : vector<128x8xf32>
    %c2_24 = arith.constant 2 : index
    %c1_25 = arith.constant 1 : index
    %c0_26 = arith.constant 0 : index
    %c0_27 = arith.constant 0 : index
    %21 = vector.load %arg0[%c2_24, %c1_25, %c0_26, %c0_27] : memref<8x9x9x4xf32, #tpu.memory_space<vmem>>, vector<2x8x8x4xf32>
    %22 = vector.shape_cast %21 : vector<2x8x8x4xf32> to vector<128x4xf32>
    %c3 = arith.constant 3 : index
    %c0_28 = arith.constant 0 : index
    %c0_29 = arith.constant 0 : index
    %23 = vector.load %arg1[%c3, %c0_28, %c0_29] : memref<9x4x8xf32, #tpu.memory_space<vmem>>, vector<1x4x8xf32>
    %24 = vector.shape_cast %23 : vector<1x4x8xf32> to vector<4x8xf32>
    %cst_30 = arith.constant dense<0.000000e+00> : vector<128x8xf32>
    %25 = tpu.matmul %22, %24, %cst_30 {dimension_numbers = #tpu.dot_dimension_numbers<[1], [0], [0], [1], [0, 0, 1, 1], [], []>} : vector<128x4xf32>, vector<4x8xf32>, vector<128x8xf32> -> vector<128x8xf32>
    %26 = arith.addf %20, %25 : vector<128x8xf32>
    %c0_31 = arith.constant 0 : index
    %c1_32 = arith.constant 1 : index
    %c1_33 = arith.constant 1 : index
    %c0_34 = arith.constant 0 : index
    %27 = vector.load %arg0[%c0_31, %c1_32, %c1_33, %c0_34] : memref<8x9x9x4xf32, #tpu.memory_space<vmem>>, vector<2x8x8x4xf32>
    %28 = vector.shape_cast %27 : vector<2x8x8x4xf32> to vector<128x4xf32>
    %c4_35 = arith.constant 4 : index
    %c0_36 = arith.constant 0 : index
    %c0_37 = arith.constant 0 : index
    %29 = vector.load %arg1[%c4_35, %c0_36, %c0_37] : memref<9x4x8xf32, #tpu.memory_space<vmem>>, vector<1x4x8xf32>
    %30 = vector.shape_cast %29 : vector<1x4x8xf32> to vector<4x8xf32>
    %cst_38 = arith.constant dense<0.000000e+00> : vector<128x8xf32>
    %31 = tpu.matmul %28, %30, %cst_38 {dimension_numbers = #tpu.dot_dimension_numbers<[1], [0], [0], [1], [0, 0, 1, 1], [], []>} : vector<128x4xf32>, vector<4x8xf32>, vector<128x8xf32> -> vector<128x8xf32>
    %32 = arith.addf %26, %31 : vector<128x8xf32>
    %c2_39 = arith.constant 2 : index
    %c1_40 = arith.constant 1 : index
    %c1_41 = arith.constant 1 : index
    %c0_42 = arith.constant 0 : index
    %33 = vector.load %arg0[%c2_39, %c1_40, %c1_41, %c0_42] : memref<8x9x9x4xf32, #tpu.memory_space<vmem>>, vector<2x8x8x4xf32>
    %34 = vector.shape_cast %33 : vector<2x8x8x4xf32> to vector<128x4xf32>
    %c5 = arith.constant 5 : index
    %c0_43 = arith.constant 0 : index
    %c0_44 = arith.constant 0 : index
    %35 = vector.load %arg1[%c5, %c0_43, %c0_44] : memref<9x4x8xf32, #tpu.memory_space<vmem>>, vector<1x4x8xf32>
    %36 = vector.shape_cast %35 : vector<1x4x8xf32> to vector<4x8xf32>
    %cst_45 = arith.constant dense<0.000000e+00> : vector<128x8xf32>
    %37 = tpu.matmul %34, %36, %cst_45 {dimension_numbers = #tpu.dot_dimension_numbers<[1], [0], [0], [1], [0, 0, 1, 1], [], []>} : vector<128x4xf32>, vector<4x8xf32>, vector<128x8xf32> -> vector<128x8xf32>
    %38 = arith.addf %32, %37 : vector<128x8xf32>
    %c6_46 = arith.constant 6 : index
    %c1_47 = arith.constant 1 : index
    %c0_48 = arith.constant 0 : index
    %c0_49 = arith.constant 0 : index
    %39 = vector.load %arg0[%c6_46, %c1_47, %c0_48, %c0_49] : memref<8x9x9x4xf32, #tpu.memory_space<vmem>>, vector<2x8x8x4xf32>
    %40 = vector.shape_cast %39 : vector<2x8x8x4xf32> to vector<128x4xf32>
    %c6_50 = arith.constant 6 : index
    %c0_51 = arith.constant 0 : index
    %c0_52 = arith.constant 0 : index
    %41 = vector.load %arg1[%c6_50, %c0_51, %c0_52] : memref<9x4x8xf32, #tpu.memory_space<vmem>>, vector<1x4x8xf32>
    %42 = vector.shape_cast %41 : vector<1x4x8xf32> to vector<4x8xf32>
    %cst_53 = arith.constant dense<0.000000e+00> : vector<128x8xf32>
    %43 = tpu.matmul %40, %42, %cst_53 {dimension_numbers = #tpu.dot_dimension_numbers<[1], [0], [0], [1], [0, 0, 1, 1], [], []>} : vector<128x4xf32>, vector<4x8xf32>, vector<128x8xf32> -> vector<128x8xf32>
    %44 = arith.addf %38, %43 : vector<128x8xf32>
    %c4_54 = arith.constant 4 : index
    %c1_55 = arith.constant 1 : index
    %c1_56 = arith.constant 1 : index
    %c0_57 = arith.constant 0 : index
    %45 = vector.load %arg0[%c4_54, %c1_55, %c1_56, %c0_57] : memref<8x9x9x4xf32, #tpu.memory_space<vmem>>, vector<2x8x8x4xf32>
    %46 = vector.shape_cast %45 : vector<2x8x8x4xf32> to vector<128x4xf32>
    %c7 = arith.constant 7 : index
    %c0_58 = arith.constant 0 : index
    %c0_59 = arith.constant 0 : index
    %47 = vector.load %arg1[%c7, %c0_58, %c0_59] : memref<9x4x8xf32, #tpu.memory_space<vmem>>, vector<1x4x8xf32>
    %48 = vector.shape_cast %47 : vector<1x4x8xf32> to vector<4x8xf32>
    %cst_60 = arith.constant dense<0.000000e+00> : vector<128x8xf32>
    %49 = tpu.matmul %46, %48, %cst_60 {dimension_numbers = #tpu.dot_dimension_numbers<[1], [0], [0], [1], [0, 0, 1, 1], [], []>} : vector<128x4xf32>, vector<4x8xf32>, vector<128x8xf32> -> vector<128x8xf32>
    %50 = arith.addf %44, %49 : vector<128x8xf32>
    %c6_61 = arith.constant 6 : index
    %c1_62 = arith.constant 1 : index
    %c1_63 = arith.constant 1 : index
    %c0_64 = arith.constant 0 : index
    %51 = vector.load %arg0[%c6_61, %c1_62, %c1_63, %c0_64] : memref<8x9x9x4xf32, #tpu.memory_space<vmem>>, vector<2x8x8x4xf32>
    %52 = vector.shape_cast %51 : vector<2x8x8x4xf32> to vector<128x4xf32>
    %c8 = arith.constant 8 : index
    %c0_65 = arith.constant 0 : index
    %c0_66 = arith.constant 0 : index
    %53 = vector.load %arg1[%c8, %c0_65, %c0_66] : memref<9x4x8xf32, #tpu.memory_space<vmem>>, vector<1x4x8xf32>
    %54 = vector.shape_cast %53 : vector<1x4x8xf32> to vector<4x8xf32>
    %cst_67 = arith.constant dense<0.000000e+00> : vector<128x8xf32>
    %55 = tpu.matmul %52, %54, %cst_67 {dimension_numbers = #tpu.dot_dimension_numbers<[1], [0], [0], [1], [0, 0, 1, 1], [], []>} : vector<128x4xf32>, vector<4x8xf32>, vector<128x8xf32> -> vector<128x8xf32>
    %56 = arith.addf %50, %55 : vector<128x8xf32>
    %c0_68 = arith.constant 0 : index
    %c0_69 = arith.constant 0 : index
    %57 = vector.load %arg2[%c0_68, %c0_69] : memref<1x8xf32, #tpu.memory_space<vmem>>, vector<1x8xf32>
    %58 = vector.broadcast %57 : vector<1x8xf32> to vector<128x8xf32>
    %59 = arith.addf %56, %58 : vector<128x8xf32>
    %cst_70 = arith.constant 0.000000e+00 : f32
    %60 = vector.broadcast %cst_70 : f32 to vector<128x8xf32>
    %61 = arith.maximumf %59, %60 : vector<128x8xf32>
    %62 = vector.shape_cast %61 : vector<128x8xf32> to vector<2x8x8x8xf32>
    %c0_71 = arith.constant 0 : index
    %c1_72 = arith.constant 1 : index
    %c1_73 = arith.constant 1 : index
    %c0_74 = arith.constant 0 : index
    %63 = vector.load %arg8[%c0_71, %c1_72, %c1_73, %c0_74] : memref<8x9x9x8xf32, #tpu.memory_space<vmem>>, vector<2x8x8x8xf32>
    tpu.vector_store %arg8[%c0_71, %c1_72, %c1_73, %c0_74], %62 {strides = array<i32>} : memref<8x9x9x8xf32, #tpu.memory_space<vmem>>, vector<2x8x8x8xf32>,
    %cst_75 = arith.constant 0.000000e+00 : f32
    %64 = vector.broadcast %cst_75 : f32 to vector<128x8xf32>
    %c4_76 = arith.constant 4 : index
    %c0_77 = arith.constant 0 : index
    %c0_78 = arith.constant 0 : index
    %c0_79 = arith.constant 0 : index
    %65 = vector.load %arg0[%c4_76, %c0_77, %c0_78, %c0_79] : memref<8x9x9x4xf32, #tpu.memory_space<vmem>>, vector<2x8x8x4xf32>
    %66 = vector.shape_cast %65 : vector<2x8x8x4xf32> to vector<128x4xf32>
    %c0_80 = arith.constant 0 : index
    %c0_81 = arith.constant 0 : index
    %c0_82 = arith.constant 0 : index
    %67 = vector.load %arg1[%c0_80, %c0_81, %c0_82] : memref<9x4x8xf32, #tpu.memory_space<vmem>>, vector<1x4x8xf32>
    %68 = vector.shape_cast %67 : vector<1x4x8xf32> to vector<4x8xf32>
    %cst_83 = arith.constant dense<0.000000e+00> : vector<128x8xf32>
    %69 = tpu.matmul %66, %68, %cst_83 {dimension_numbers = #tpu.dot_dimension_numbers<[1], [0], [0], [1], [0, 0, 1, 1], [], []>} : vector<128x4xf32>, vector<4x8xf32>, vector<128x8xf32> -> vector<128x8xf32>
    %70 = arith.addf %64, %69 : vector<128x8xf32>
    %c6_84 = arith.constant 6 : index
    %c0_85 = arith.constant 0 : index
    %c0_86 = arith.constant 0 : index
    %c0_87 = arith.constant 0 : index
    %71 = vector.load %arg0[%c6_84, %c0_85, %c0_86, %c0_87] : memref<8x9x9x4xf32, #tpu.memory_space<vmem>>, vector<2x8x8x4xf32>
    %72 = vector.shape_cast %71 : vector<2x8x8x4xf32> to vector<128x4xf32>
    %c1_88 = arith.constant 1 : index
    %c0_89 = arith.constant 0 : index
    %c0_90 = arith.constant 0 : index
    %73 = vector.load %arg1[%c1_88, %c0_89, %c0_90] : memref<9x4x8xf32, #tpu.memory_space<vmem>>, vector<1x4x8xf32>
    %74 = vector.shape_cast %73 : vector<1x4x8xf32> to vector<4x8xf32>
    %cst_91 = arith.constant dense<0.000000e+00> : vector<128x8xf32>
    %75 = tpu.matmul %72, %74, %cst_91 {dimension_numbers = #tpu.dot_dimension_numbers<[1], [0], [0], [1], [0, 0, 1, 1], [], []>} : vector<128x4xf32>, vector<4x8xf32>, vector<128x8xf32> -> vector<128x8xf32>
    %76 = arith.addf %70, %75 : vector<128x8xf32>
    %c4_92 = arith.constant 4 : index
    %c0_93 = arith.constant 0 : index
    %c1_94 = arith.constant 1 : index
    %c0_95 = arith.constant 0 : index
    %77 = vector.load %arg0[%c4_92, %c0_93, %c1_94, %c0_95] : memref<8x9x9x4xf32, #tpu.memory_space<vmem>>, vector<2x8x8x4xf32>
    %78 = vector.shape_cast %77 : vector<2x8x8x4xf32> to vector<128x4xf32>
    %c2_96 = arith.constant 2 : index
    %c0_97 = arith.constant 0 : index
    %c0_98 = arith.constant 0 : index
    %79 = vector.load %arg1[%c2_96, %c0_97, %c0_98] : memref<9x4x8xf32, #tpu.memory_space<vmem>>, vector<1x4x8xf32>
    %80 = vector.shape_cast %79 : vector<1x4x8xf32> to vector<4x8xf32>
    %cst_99 = arith.constant dense<0.000000e+00> : vector<128x8xf32>
    %81 = tpu.matmul %78, %80, %cst_99 {dimension_numbers = #tpu.dot_dimension_numbers<[1], [0], [0], [1], [0, 0, 1, 1], [], []>} : vector<128x4xf32>, vector<4x8xf32>, vector<128x8xf32> -> vector<128x8xf32>
    %82 = arith.addf %76, %81 : vector<128x8xf32>
    %c0_100 = arith.constant 0 : index
    %c1_101 = arith.constant 1 : index
    %c0_102 = arith.constant 0 : index
    %c0_103 = arith.constant 0 : index
    %83 = vector.load %arg0[%c0_100, %c1_101, %c0_102, %c0_103] : memref<8x9x9x4xf32, #tpu.memory_space<vmem>>, vector<2x8x8x4xf32>
    %84 = vector.shape_cast %83 : vector<2x8x8x4xf32> to vector<128x4xf32>
    %c3_104 = arith.constant 3 : index
    %c0_105 = arith.constant 0 : index
    %c0_106 = arith.constant 0 : index
    %85 = vector.load %arg1[%c3_104, %c0_105, %c0_106] : memref<9x4x8xf32, #tpu.memory_space<vmem>>, vector<1x4x8xf32>
    %86 = vector.shape_cast %85 : vector<1x4x8xf32> to vector<4x8xf32>
    %cst_107 = arith.constant dense<0.000000e+00> : vector<128x8xf32>
    %87 = tpu.matmul %84, %86, %cst_107 {dimension_numbers = #tpu.dot_dimension_numbers<[1], [0], [0], [1], [0, 0, 1, 1], [], []>} : vector<128x4xf32>, vector<4x8xf32>, vector<128x8xf32> -> vector<128x8xf32>
    %88 = arith.addf %82, %87 : vector<128x8xf32>
    %c2_108 = arith.constant 2 : index
    %c1_109 = arith.constant 1 : index
    %c0_110 = arith.constant 0 : index
    %c0_111 = arith.constant 0 : index
    %89 = vector.load %arg0[%c2_108, %c1_109, %c0_110, %c0_111] : memref<8x9x9x4xf32, #tpu.memory_space<vmem>>, vector<2x8x8x4xf32>
    %90 = vector.shape_cast %89 : vector<2x8x8x4xf32> to vector<128x4xf32>
    %c4_112 = arith.constant 4 : index
    %c0_113 = arith.constant 0 : index
    %c0_114 = arith.constant 0 : index
    %91 = vector.load %arg1[%c4_112, %c0_113, %c0_114] : memref<9x4x8xf32, #tpu.memory_space<vmem>>, vector<1x4x8xf32>
    %92 = vector.shape_cast %91 : vector<1x4x8xf32> to vector<4x8xf32>
    %cst_115 = arith.constant dense<0.000000e+00> : vector<128x8xf32>
    %93 = tpu.matmul %90, %92, %cst_115 {dimension_numbers = #tpu.dot_dimension_numbers<[1], [0], [0], [1], [0, 0, 1, 1], [], []>} : vector<128x4xf32>, vector<4x8xf32>, vector<128x8xf32> -> vector<128x8xf32>
    %94 = arith.addf %88, %93 : vector<128x8xf32>
    %c0_116 = arith.constant 0 : index
    %c1_117 = arith.constant 1 : index
    %c1_118 = arith.constant 1 : index
    %c0_119 = arith.constant 0 : index
    %95 = vector.load %arg0[%c0_116, %c1_117, %c1_118, %c0_119] : memref<8x9x9x4xf32, #tpu.memory_space<vmem>>, vector<2x8x8x4xf32>
    %96 = vector.shape_cast %95 : vector<2x8x8x4xf32> to vector<128x4xf32>
    %c5_120 = arith.constant 5 : index
    %c0_121 = arith.constant 0 : index
    %c0_122 = arith.constant 0 : index
    %97 = vector.load %arg1[%c5_120, %c0_121, %c0_122] : memref<9x4x8xf32, #tpu.memory_space<vmem>>, vector<1x4x8xf32>
    %98 = vector.shape_cast %97 : vector<1x4x8xf32> to vector<4x8xf32>
    %cst_123 = arith.constant dense<0.000000e+00> : vector<128x8xf32>
    %99 = tpu.matmul %96, %98, %cst_123 {dimension_numbers = #tpu.dot_dimension_numbers<[1], [0], [0], [1], [0, 0, 1, 1], [], []>} : vector<128x4xf32>, vector<4x8xf32>, vector<128x8xf32> -> vector<128x8xf32>
    %100 = arith.addf %94, %99 : vector<128x8xf32>
    %c4_124 = arith.constant 4 : index
    %c1_125 = arith.constant 1 : index
    %c0_126 = arith.constant 0 : index
    %c0_127 = arith.constant 0 : index
    %101 = vector.load %arg0[%c4_124, %c1_125, %c0_126, %c0_127] : memref<8x9x9x4xf32, #tpu.memory_space<vmem>>, vector<2x8x8x4xf32>
    %102 = vector.shape_cast %101 : vector<2x8x8x4xf32> to vector<128x4xf32>
    %c6_128 = arith.constant 6 : index
    %c0_129 = arith.constant 0 : index
    %c0_130 = arith.constant 0 : index
    %103 = vector.load %arg1[%c6_128, %c0_129, %c0_130] : memref<9x4x8xf32, #tpu.memory_space<vmem>>, vector<1x4x8xf32>
    %104 = vector.shape_cast %103 : vector<1x4x8xf32> to vector<4x8xf32>
    %cst_131 = arith.constant dense<0.000000e+00> : vector<128x8xf32>
    %105 = tpu.matmul %102, %104, %cst_131 {dimension_numbers = #tpu.dot_dimension_numbers<[1], [0], [0], [1], [0, 0, 1, 1], [], []>} : vector<128x4xf32>, vector<4x8xf32>, vector<128x8xf32> -> vector<128x8xf32>
    %106 = arith.addf %100, %105 : vector<128x8xf32>
    %c6_132 = arith.constant 6 : index
    %c1_133 = arith.constant 1 : index
    %c0_134 = arith.constant 0 : index
    %c0_135 = arith.constant 0 : index
    %107 = vector.load %arg0[%c6_132, %c1_133, %c0_134, %c0_135] : memref<8x9x9x4xf32, #tpu.memory_space<vmem>>, vector<2x8x8x4xf32>
    %108 = vector.shape_cast %107 : vector<2x8x8x4xf32> to vector<128x4xf32>
    %c7_136 = arith.constant 7 : index
    %c0_137 = arith.constant 0 : index
    %c0_138 = arith.constant 0 : index
    %109 = vector.load %arg1[%c7_136, %c0_137, %c0_138] : memref<9x4x8xf32, #tpu.memory_space<vmem>>, vector<1x4x8xf32>
    %110 = vector.shape_cast %109 : vector<1x4x8xf32> to vector<4x8xf32>
    %cst_139 = arith.constant dense<0.000000e+00> : vector<128x8xf32>
    %111 = tpu.matmul %108, %110, %cst_139 {dimension_numbers = #tpu.dot_dimension_numbers<[1], [0], [0], [1], [0, 0, 1, 1], [], []>} : vector<128x4xf32>, vector<4x8xf32>, vector<128x8xf32> -> vector<128x8xf32>
    %112 = arith.addf %106, %111 : vector<128x8xf32>
    %c4_140 = arith.constant 4 : index
    %c1_141 = arith.constant 1 : index
    %c1_142 = arith.constant 1 : index
    %c0_143 = arith.constant 0 : index
    %113 = vector.load %arg0[%c4_140, %c1_141, %c1_142, %c0_143] : memref<8x9x9x4xf32, #tpu.memory_space<vmem>>, vector<2x8x8x4xf32>
    %114 = vector.shape_cast %113 : vector<2x8x8x4xf32> to vector<128x4xf32>
    %c8_144 = arith.constant 8 : index
    %c0_145 = arith.constant 0 : index
    %c0_146 = arith.constant 0 : index
    %115 = vector.load %arg1[%c8_144, %c0_145, %c0_146] : memref<9x4x8xf32, #tpu.memory_space<vmem>>, vector<1x4x8xf32>
    %116 = vector.shape_cast %115 : vector<1x4x8xf32> to vector<4x8xf32>
    %cst_147 = arith.constant dense<0.000000e+00> : vector<128x8xf32>
    %117 = tpu.matmul %114, %116, %cst_147 {dimension_numbers = #tpu.dot_dimension_numbers<[1], [0], [0], [1], [0, 0, 1, 1], [], []>} : vector<128x4xf32>, vector<4x8xf32>, vector<128x8xf32> -> vector<128x8xf32>
    %118 = arith.addf %112, %117 : vector<128x8xf32>
    %c0_148 = arith.constant 0 : index
    %c0_149 = arith.constant 0 : index
    %119 = vector.load %arg2[%c0_148, %c0_149] : memref<1x8xf32, #tpu.memory_space<vmem>>, vector<1x8xf32>
    %120 = vector.broadcast %119 : vector<1x8xf32> to vector<128x8xf32>
    %121 = arith.addf %118, %120 : vector<128x8xf32>
    %cst_150 = arith.constant 0.000000e+00 : f32
    %122 = vector.broadcast %cst_150 : f32 to vector<128x8xf32>
    %123 = arith.maximumf %121, %122 : vector<128x8xf32>
    %124 = vector.shape_cast %123 : vector<128x8xf32> to vector<2x8x8x8xf32>
    %c2_151 = arith.constant 2 : index
    %c1_152 = arith.constant 1 : index
    %c0_153 = arith.constant 0 : index
    %c0_154 = arith.constant 0 : index
    %125 = vector.load %arg8[%c2_151, %c1_152, %c0_153, %c0_154] : memref<8x9x9x8xf32, #tpu.memory_space<vmem>>, vector<2x8x8x8xf32>
    tpu.vector_store %arg8[%c2_151, %c1_152, %c0_153, %c0_154], %124 {strides = array<i32>} : memref<8x9x9x8xf32, #tpu.memory_space<vmem>>, vector<2x8x8x8xf32>,
    %cst_155 = arith.constant 0.000000e+00 : f32
    %126 = vector.broadcast %cst_155 : f32 to vector<128x8xf32>
    %c2_156 = arith.constant 2 : index
    %c0_157 = arith.constant 0 : index
    %c0_158 = arith.constant 0 : index
    %c0_159 = arith.constant 0 : index
    %127 = vector.load %arg0[%c2_156, %c0_157, %c0_158, %c0_159] : memref<8x9x9x4xf32, #tpu.memory_space<vmem>>, vector<2x8x8x4xf32>
    %128 = vector.shape_cast %127 : vector<2x8x8x4xf32> to vector<128x4xf32>
    %c0_160 = arith.constant 0 : index
    %c0_161 = arith.constant 0 : index
    %c0_162 = arith.constant 0 : index
    %129 = vector.load %arg1[%c0_160, %c0_161, %c0_162] : memref<9x4x8xf32, #tpu.memory_space<vmem>>, vector<1x4x8xf32>
    %130 = vector.shape_cast %129 : vector<1x4x8xf32> to vector<4x8xf32>
    %cst_163 = arith.constant dense<0.000000e+00> : vector<128x8xf32>
    %131 = tpu.matmul %128, %130, %cst_163 {dimension_numbers = #tpu.dot_dimension_numbers<[1], [0], [0], [1], [0, 0, 1, 1], [], []>} : vector<128x4xf32>, vector<4x8xf32>, vector<128x8xf32> -> vector<128x8xf32>
    %132 = arith.addf %126, %131 : vector<128x8xf32>
    %c0_164 = arith.constant 0 : index
    %c0_165 = arith.constant 0 : index
    %c1_166 = arith.constant 1 : index
    %c0_167 = arith.constant 0 : index
    %133 = vector.load %arg0[%c0_164, %c0_165, %c1_166, %c0_167] : memref<8x9x9x4xf32, #tpu.memory_space<vmem>>, vector<2x8x8x4xf32>
    %134 = vector.shape_cast %133 : vector<2x8x8x4xf32> to vector<128x4xf32>
    %c1_168 = arith.constant 1 : index
    %c0_169 = arith.constant 0 : index
    %c0_170 = arith.constant 0 : index
    %135 = vector.load %arg1[%c1_168, %c0_169, %c0_170] : memref<9x4x8xf32, #tpu.memory_space<vmem>>, vector<1x4x8xf32>
    %136 = vector.shape_cast %135 : vector<1x4x8xf32> to vector<4x8xf32>
    %cst_171 = arith.constant dense<0.000000e+00> : vector<128x8xf32>
    %137 = tpu.matmul %134, %136, %cst_171 {dimension_numbers = #tpu.dot_dimension_numbers<[1], [0], [0], [1], [0, 0, 1, 1], [], []>} : vector<128x4xf32>, vector<4x8xf32>, vector<128x8xf32> -> vector<128x8xf32>
    %138 = arith.addf %132, %137 : vector<128x8xf32>
    %c2_172 = arith.constant 2 : index
    %c0_173 = arith.constant 0 : index
    %c1_174 = arith.constant 1 : index
    %c0_175 = arith.constant 0 : index
    %139 = vector.load %arg0[%c2_172, %c0_173, %c1_174, %c0_175] : memref<8x9x9x4xf32, #tpu.memory_space<vmem>>, vector<2x8x8x4xf32>
    %140 = vector.shape_cast %139 : vector<2x8x8x4xf32> to vector<128x4xf32>
    %c2_176 = arith.constant 2 : index
    %c0_177 = arith.constant 0 : index
    %c0_178 = arith.constant 0 : index
    %141 = vector.load %arg1[%c2_176, %c0_177, %c0_178] : memref<9x4x8xf32, #tpu.memory_space<vmem>>, vector<1x4x8xf32>
    %142 = vector.shape_cast %141 : vector<1x4x8xf32> to vector<4x8xf32>
    %cst_179 = arith.constant dense<0.000000e+00> : vector<128x8xf32>
    %143 = tpu.matmul %140, %142, %cst_179 {dimension_numbers = #tpu.dot_dimension_numbers<[1], [0], [0], [1], [0, 0, 1, 1], [], []>} : vector<128x4xf32>, vector<4x8xf32>, vector<128x8xf32> -> vector<128x8xf32>
    %144 = arith.addf %138, %143 : vector<128x8xf32>
    %c6_180 = arith.constant 6 : index
    %c0_181 = arith.constant 0 : index
    %c0_182 = arith.constant 0 : index
    %c0_183 = arith.constant 0 : index
    %145 = vector.load %arg0[%c6_180, %c0_181, %c0_182, %c0_183] : memref<8x9x9x4xf32, #tpu.memory_space<vmem>>, vector<2x8x8x4xf32>
    %146 = vector.shape_cast %145 : vector<2x8x8x4xf32> to vector<128x4xf32>
    %c3_184 = arith.constant 3 : index
    %c0_185 = arith.constant 0 : index
    %c0_186 = arith.constant 0 : index
    %147 = vector.load %arg1[%c3_184, %c0_185, %c0_186] : memref<9x4x8xf32, #tpu.memory_space<vmem>>, vector<1x4x8xf32>
    %148 = vector.shape_cast %147 : vector<1x4x8xf32> to vector<4x8xf32>
    %cst_187 = arith.constant dense<0.000000e+00> : vector<128x8xf32>
    %149 = tpu.matmul %146, %148, %cst_187 {dimension_numbers = #tpu.dot_dimension_numbers<[1], [0], [0], [1], [0, 0, 1, 1], [], []>} : vector<128x4xf32>, vector<4x8xf32>, vector<128x8xf32> -> vector<128x8xf32>
    %150 = arith.addf %144, %149 : vector<128x8xf32>
    %c4_188 = arith.constant 4 : index
    %c0_189 = arith.constant 0 : index
    %c1_190 = arith.constant 1 : index
    %c0_191 = arith.constant 0 : index
    %151 = vector.load %arg0[%c4_188, %c0_189, %c1_190, %c0_191] : memref<8x9x9x4xf32, #tpu.memory_space<vmem>>, vector<2x8x8x4xf32>
    %152 = vector.shape_cast %151 : vector<2x8x8x4xf32> to vector<128x4xf32>
    %c4_192 = arith.constant 4 : index
    %c0_193 = arith.constant 0 : index
    %c0_194 = arith.constant 0 : index
    %153 = vector.load %arg1[%c4_192, %c0_193, %c0_194] : memref<9x4x8xf32, #tpu.memory_space<vmem>>, vector<1x4x8xf32>
    %154 = vector.shape_cast %153 : vector<1x4x8xf32> to vector<4x8xf32>
    %cst_195 = arith.constant dense<0.000000e+00> : vector<128x8xf32>
    %155 = tpu.matmul %152, %154, %cst_195 {dimension_numbers = #tpu.dot_dimension_numbers<[1], [0], [0], [1], [0, 0, 1, 1], [], []>} : vector<128x4xf32>, vector<4x8xf32>, vector<128x8xf32> -> vector<128x8xf32>
    %156 = arith.addf %150, %155 : vector<128x8xf32>
    %c6_196 = arith.constant 6 : index
    %c0_197 = arith.constant 0 : index
    %c1_198 = arith.constant 1 : index
    %c0_199 = arith.constant 0 : index
    %157 = vector.load %arg0[%c6_196, %c0_197, %c1_198, %c0_199] : memref<8x9x9x4xf32, #tpu.memory_space<vmem>>, vector<2x8x8x4xf32>
    %158 = vector.shape_cast %157 : vector<2x8x8x4xf32> to vector<128x4xf32>
    %c5_200 = arith.constant 5 : index
    %c0_201 = arith.constant 0 : index
    %c0_202 = arith.constant 0 : index
    %159 = vector.load %arg1[%c5_200, %c0_201, %c0_202] : memref<9x4x8xf32, #tpu.memory_space<vmem>>, vector<1x4x8xf32>
    %160 = vector.shape_cast %159 : vector<1x4x8xf32> to vector<4x8xf32>
    %cst_203 = arith.constant dense<0.000000e+00> : vector<128x8xf32>
    %161 = tpu.matmul %158, %160, %cst_203 {dimension_numbers = #tpu.dot_dimension_numbers<[1], [0], [0], [1], [0, 0, 1, 1], [], []>} : vector<128x4xf32>, vector<4x8xf32>, vector<128x8xf32> -> vector<128x8xf32>
    %162 = arith.addf %156, %161 : vector<128x8xf32>
    %c2_204 = arith.constant 2 : index
    %c1_205 = arith.constant 1 : index
    %c0_206 = arith.constant 0 : index
    %c0_207 = arith.constant 0 : index
    %163 = vector.load %arg0[%c2_204, %c1_205, %c0_206, %c0_207] : memref<8x9x9x4xf32, #tpu.memory_space<vmem>>, vector<2x8x8x4xf32>
    %164 = vector.shape_cast %163 : vector<2x8x8x4xf32> to vector<128x4xf32>
    %c6_208 = arith.constant 6 : index
    %c0_209 = arith.constant 0 : index
    %c0_210 = arith.constant 0 : index
    %165 = vector.load %arg1[%c6_208, %c0_209, %c0_210] : memref<9x4x8xf32, #tpu.memory_space<vmem>>, vector<1x4x8xf32>
    %166 = vector.shape_cast %165 : vector<1x4x8xf32> to vector<4x8xf32>
    %cst_211 = arith.constant dense<0.000000e+00> : vector<128x8xf32>
    %167 = tpu.matmul %164, %166, %cst_211 {dimension_numbers = #tpu.dot_dimension_numbers<[1], [0], [0], [1], [0, 0, 1, 1], [], []>} : vector<128x4xf32>, vector<4x8xf32>, vector<128x8xf32> -> vector<128x8xf32>
    %168 = arith.addf %162, %167 : vector<128x8xf32>
    %c0_212 = arith.constant 0 : index
    %c1_213 = arith.constant 1 : index
    %c1_214 = arith.constant 1 : index
    %c0_215 = arith.constant 0 : index
    %169 = vector.load %arg0[%c0_212, %c1_213, %c1_214, %c0_215] : memref<8x9x9x4xf32, #tpu.memory_space<vmem>>, vector<2x8x8x4xf32>
    %170 = vector.shape_cast %169 : vector<2x8x8x4xf32> to vector<128x4xf32>
    %c7_216 = arith.constant 7 : index
    %c0_217 = arith.constant 0 : index
    %c0_218 = arith.constant 0 : index
    %171 = vector.load %arg1[%c7_216, %c0_217, %c0_218] : memref<9x4x8xf32, #tpu.memory_space<vmem>>, vector<1x4x8xf32>
    %172 = vector.shape_cast %171 : vector<1x4x8xf32> to vector<4x8xf32>
    %cst_219 = arith.constant dense<0.000000e+00> : vector<128x8xf32>
    %173 = tpu.matmul %170, %172, %cst_219 {dimension_numbers = #tpu.dot_dimension_numbers<[1], [0], [0], [1], [0, 0, 1, 1], [], []>} : vector<128x4xf32>, vector<4x8xf32>, vector<128x8xf32> -> vector<128x8xf32>
    %174 = arith.addf %168, %173 : vector<128x8xf32>
    %c2_220 = arith.constant 2 : index
    %c1_221 = arith.constant 1 : index
    %c1_222 = arith.constant 1 : index
    %c0_223 = arith.constant 0 : index
    %175 = vector.load %arg0[%c2_220, %c1_221, %c1_222, %c0_223] : memref<8x9x9x4xf32, #tpu.memory_space<vmem>>, vector<2x8x8x4xf32>
    %176 = vector.shape_cast %175 : vector<2x8x8x4xf32> to vector<128x4xf32>
    %c8_224 = arith.constant 8 : index
    %c0_225 = arith.constant 0 : index
    %c0_226 = arith.constant 0 : index
    %177 = vector.load %arg1[%c8_224, %c0_225, %c0_226] : memref<9x4x8xf32, #tpu.memory_space<vmem>>, vector<1x4x8xf32>
    %178 = vector.shape_cast %177 : vector<1x4x8xf32> to vector<4x8xf32>
    %cst_227 = arith.constant dense<0.000000e+00> : vector<128x8xf32>
    %179 = tpu.matmul %176, %178, %cst_227 {dimension_numbers = #tpu.dot_dimension_numbers<[1], [0], [0], [1], [0, 0, 1, 1], [], []>} : vector<128x4xf32>, vector<4x8xf32>, vector<128x8xf32> -> vector<128x8xf32>
    %180 = arith.addf %174, %179 : vector<128x8xf32>
    %c0_228 = arith.constant 0 : index
    %c0_229 = arith.constant 0 : index
    %181 = vector.load %arg2[%c0_228, %c0_229] : memref<1x8xf32, #tpu.memory_space<vmem>>, vector<1x8xf32>
    %182 = vector.broadcast %181 : vector<1x8xf32> to vector<128x8xf32>
    %183 = arith.addf %180, %182 : vector<128x8xf32>
    %cst_230 = arith.constant 0.000000e+00 : f32
    %184 = vector.broadcast %cst_230 : f32 to vector<128x8xf32>
    %185 = arith.maximumf %183, %184 : vector<128x8xf32>
    %186 = vector.shape_cast %185 : vector<128x8xf32> to vector<2x8x8x8xf32>
    %c4_231 = arith.constant 4 : index
    %c0_232 = arith.constant 0 : index
    %c1_233 = arith.constant 1 : index
    %c0_234 = arith.constant 0 : index
    %187 = vector.load %arg8[%c4_231, %c0_232, %c1_233, %c0_234] : memref<8x9x9x8xf32, #tpu.memory_space<vmem>>, vector<2x8x8x8xf32>
    tpu.vector_store %arg8[%c4_231, %c0_232, %c1_233, %c0_234], %186 {strides = array<i32>} : memref<8x9x9x8xf32, #tpu.memory_space<vmem>>, vector<2x8x8x8xf32>,
    %cst_235 = arith.constant 0.000000e+00 : f32
    %188 = vector.broadcast %cst_235 : f32 to vector<128x8xf32>
    %c0_236 = arith.constant 0 : index
    %c0_237 = arith.constant 0 : index
    %c0_238 = arith.constant 0 : index
    %c0_239 = arith.constant 0 : index
    %189 = vector.load %arg0[%c0_236, %c0_237, %c0_238, %c0_239] : memref<8x9x9x4xf32, #tpu.memory_space<vmem>>, vector<2x8x8x4xf32>
    %190 = vector.shape_cast %189 : vector<2x8x8x4xf32> to vector<128x4xf32>
    %c0_240 = arith.constant 0 : index
    %c0_241 = arith.constant 0 : index
    %c0_242 = arith.constant 0 : index
    %191 = vector.load %arg1[%c0_240, %c0_241, %c0_242] : memref<9x4x8xf32, #tpu.memory_space<vmem>>, vector<1x4x8xf32>
    %192 = vector.shape_cast %191 : vector<1x4x8xf32> to vector<4x8xf32>
    %cst_243 = arith.constant dense<0.000000e+00> : vector<128x8xf32>
    %193 = tpu.matmul %190, %192, %cst_243 {dimension_numbers = #tpu.dot_dimension_numbers<[1], [0], [0], [1], [0, 0, 1, 1], [], []>} : vector<128x4xf32>, vector<4x8xf32>, vector<128x8xf32> -> vector<128x8xf32>
    %194 = arith.addf %188, %193 : vector<128x8xf32>
    %c2_244 = arith.constant 2 : index
    %c0_245 = arith.constant 0 : index
    %c0_246 = arith.constant 0 : index
    %c0_247 = arith.constant 0 : index
    %195 = vector.load %arg0[%c2_244, %c0_245, %c0_246, %c0_247] : memref<8x9x9x4xf32, #tpu.memory_space<vmem>>, vector<2x8x8x4xf32>
    %196 = vector.shape_cast %195 : vector<2x8x8x4xf32> to vector<128x4xf32>
    %c1_248 = arith.constant 1 : index
    %c0_249 = arith.constant 0 : index
    %c0_250 = arith.constant 0 : index
    %197 = vector.load %arg1[%c1_248, %c0_249, %c0_250] : memref<9x4x8xf32, #tpu.memory_space<vmem>>, vector<1x4x8xf32>
    %198 = vector.shape_cast %197 : vector<1x4x8xf32> to vector<4x8xf32>
    %cst_251 = arith.constant dense<0.000000e+00> : vector<128x8xf32>
    %199 = tpu.matmul %196, %198, %cst_251 {dimension_numbers = #tpu.dot_dimension_numbers<[1], [0], [0], [1], [0, 0, 1, 1], [], []>} : vector<128x4xf32>, vector<4x8xf32>, vector<128x8xf32> -> vector<128x8xf32>
    %200 = arith.addf %194, %199 : vector<128x8xf32>
    %c0_252 = arith.constant 0 : index
    %c0_253 = arith.constant 0 : index
    %c1_254 = arith.constant 1 : index
    %c0_255 = arith.constant 0 : index
    %201 = vector.load %arg0[%c0_252, %c0_253, %c1_254, %c0_255] : memref<8x9x9x4xf32, #tpu.memory_space<vmem>>, vector<2x8x8x4xf32>
    %202 = vector.shape_cast %201 : vector<2x8x8x4xf32> to vector<128x4xf32>
    %c2_256 = arith.constant 2 : index
    %c0_257 = arith.constant 0 : index
    %c0_258 = arith.constant 0 : index
    %203 = vector.load %arg1[%c2_256, %c0_257, %c0_258] : memref<9x4x8xf32, #tpu.memory_space<vmem>>, vector<1x4x8xf32>
    %204 = vector.shape_cast %203 : vector<1x4x8xf32> to vector<4x8xf32>
    %cst_259 = arith.constant dense<0.000000e+00> : vector<128x8xf32>
    %205 = tpu.matmul %202, %204, %cst_259 {dimension_numbers = #tpu.dot_dimension_numbers<[1], [0], [0], [1], [0, 0, 1, 1], [], []>} : vector<128x4xf32>, vector<4x8xf32>, vector<128x8xf32> -> vector<128x8xf32>
    %206 = arith.addf %200, %205 : vector<128x8xf32>
    %c4_260 = arith.constant 4 : index
    %c0_261 = arith.constant 0 : index
    %c0_262 = arith.constant 0 : index
    %c0_263 = arith.constant 0 : index
    %207 = vector.load %arg0[%c4_260, %c0_261, %c0_262, %c0_263] : memref<8x9x9x4xf32, #tpu.memory_space<vmem>>, vector<2x8x8x4xf32>
    %208 = vector.shape_cast %207 : vector<2x8x8x4xf32> to vector<128x4xf32>
    %c3_264 = arith.constant 3 : index
    %c0_265 = arith.constant 0 : index
    %c0_266 = arith.constant 0 : index
    %209 = vector.load %arg1[%c3_264, %c0_265, %c0_266] : memref<9x4x8xf32, #tpu.memory_space<vmem>>, vector<1x4x8xf32>
    %210 = vector.shape_cast %209 : vector<1x4x8xf32> to vector<4x8xf32>
    %cst_267 = arith.constant dense<0.000000e+00> : vector<128x8xf32>
    %211 = tpu.matmul %208, %210, %cst_267 {dimension_numbers = #tpu.dot_dimension_numbers<[1], [0], [0], [1], [0, 0, 1, 1], [], []>} : vector<128x4xf32>, vector<4x8xf32>, vector<128x8xf32> -> vector<128x8xf32>
    %212 = arith.addf %206, %211 : vector<128x8xf32>
    %c6_268 = arith.constant 6 : index
    %c0_269 = arith.constant 0 : index
    %c0_270 = arith.constant 0 : index
    %c0_271 = arith.constant 0 : index
    %213 = vector.load %arg0[%c6_268, %c0_269, %c0_270, %c0_271] : memref<8x9x9x4xf32, #tpu.memory_space<vmem>>, vector<2x8x8x4xf32>
    %214 = vector.shape_cast %213 : vector<2x8x8x4xf32> to vector<128x4xf32>
    %c4_272 = arith.constant 4 : index
    %c0_273 = arith.constant 0 : index
    %c0_274 = arith.constant 0 : index
    %215 = vector.load %arg1[%c4_272, %c0_273, %c0_274] : memref<9x4x8xf32, #tpu.memory_space<vmem>>, vector<1x4x8xf32>
    %216 = vector.shape_cast %215 : vector<1x4x8xf32> to vector<4x8xf32>
    %cst_275 = arith.constant dense<0.000000e+00> : vector<128x8xf32>
    %217 = tpu.matmul %214, %216, %cst_275 {dimension_numbers = #tpu.dot_dimension_numbers<[1], [0], [0], [1], [0, 0, 1, 1], [], []>} : vector<128x4xf32>, vector<4x8xf32>, vector<128x8xf32> -> vector<128x8xf32>
    %218 = arith.addf %212, %217 : vector<128x8xf32>
    %c4_276 = arith.constant 4 : index
    %c0_277 = arith.constant 0 : index
    %c1_278 = arith.constant 1 : index
    %c0_279 = arith.constant 0 : index
    %219 = vector.load %arg0[%c4_276, %c0_277, %c1_278, %c0_279] : memref<8x9x9x4xf32, #tpu.memory_space<vmem>>, vector<2x8x8x4xf32>
    %220 = vector.shape_cast %219 : vector<2x8x8x4xf32> to vector<128x4xf32>
    %c5_280 = arith.constant 5 : index
    %c0_281 = arith.constant 0 : index
    %c0_282 = arith.constant 0 : index
    %221 = vector.load %arg1[%c5_280, %c0_281, %c0_282] : memref<9x4x8xf32, #tpu.memory_space<vmem>>, vector<1x4x8xf32>
    %222 = vector.shape_cast %221 : vector<1x4x8xf32> to vector<4x8xf32>
    %cst_283 = arith.constant dense<0.000000e+00> : vector<128x8xf32>
    %223 = tpu.matmul %220, %222, %cst_283 {dimension_numbers = #tpu.dot_dimension_numbers<[1], [0], [0], [1], [0, 0, 1, 1], [], []>} : vector<128x4xf32>, vector<4x8xf32>, vector<128x8xf32> -> vector<128x8xf32>
    %224 = arith.addf %218, %223 : vector<128x8xf32>
    %c0_284 = arith.constant 0 : index
    %c1_285 = arith.constant 1 : index
    %c0_286 = arith.constant 0 : index
    %c0_287 = arith.constant 0 : index
    %225 = vector.load %arg0[%c0_284, %c1_285, %c0_286, %c0_287] : memref<8x9x9x4xf32, #tpu.memory_space<vmem>>, vector<2x8x8x4xf32>
    %226 = vector.shape_cast %225 : vector<2x8x8x4xf32> to vector<128x4xf32>
    %c6_288 = arith.constant 6 : index
    %c0_289 = arith.constant 0 : index
    %c0_290 = arith.constant 0 : index
    %227 = vector.load %arg1[%c6_288, %c0_289, %c0_290] : memref<9x4x8xf32, #tpu.memory_space<vmem>>, vector<1x4x8xf32>
    %228 = vector.shape_cast %227 : vector<1x4x8xf32> to vector<4x8xf32>
    %cst_291 = arith.constant dense<0.000000e+00> : vector<128x8xf32>
    %229 = tpu.matmul %226, %228, %cst_291 {dimension_numbers = #tpu.dot_dimension_numbers<[1], [0], [0], [1], [0, 0, 1, 1], [], []>} : vector<128x4xf32>, vector<4x8xf32>, vector<128x8xf32> -> vector<128x8xf32>
    %230 = arith.addf %224, %229 : vector<128x8xf32>
    %c2_292 = arith.constant 2 : index
    %c1_293 = arith.constant 1 : index
    %c0_294 = arith.constant 0 : index
    %c0_295 = arith.constant 0 : index
    %231 = vector.load %arg0[%c2_292, %c1_293, %c0_294, %c0_295] : memref<8x9x9x4xf32, #tpu.memory_space<vmem>>, vector<2x8x8x4xf32>
    %232 = vector.shape_cast %231 : vector<2x8x8x4xf32> to vector<128x4xf32>
    %c7_296 = arith.constant 7 : index
    %c0_297 = arith.constant 0 : index
    %c0_298 = arith.constant 0 : index
    %233 = vector.load %arg1[%c7_296, %c0_297, %c0_298] : memref<9x4x8xf32, #tpu.memory_space<vmem>>, vector<1x4x8xf32>
    %234 = vector.shape_cast %233 : vector<1x4x8xf32> to vector<4x8xf32>
    %cst_299 = arith.constant dense<0.000000e+00> : vector<128x8xf32>
    %235 = tpu.matmul %232, %234, %cst_299 {dimension_numbers = #tpu.dot_dimension_numbers<[1], [0], [0], [1], [0, 0, 1, 1], [], []>} : vector<128x4xf32>, vector<4x8xf32>, vector<128x8xf32> -> vector<128x8xf32>
    %236 = arith.addf %230, %235 : vector<128x8xf32>
    %c0_300 = arith.constant 0 : index
    %c1_301 = arith.constant 1 : index
    %c1_302 = arith.constant 1 : index
    %c0_303 = arith.constant 0 : index
    %237 = vector.load %arg0[%c0_300, %c1_301, %c1_302, %c0_303] : memref<8x9x9x4xf32, #tpu.memory_space<vmem>>, vector<2x8x8x4xf32>
    %238 = vector.shape_cast %237 : vector<2x8x8x4xf32> to vector<128x4xf32>
    %c8_304 = arith.constant 8 : index
    %c0_305 = arith.constant 0 : index
    %c0_306 = arith.constant 0 : index
    %239 = vector.load %arg1[%c8_304, %c0_305, %c0_306] : memref<9x4x8xf32, #tpu.memory_space<vmem>>, vector<1x4x8xf32>
    %240 = vector.shape_cast %239 : vector<1x4x8xf32> to vector<4x8xf32>
    %cst_307 = arith.constant dense<0.000000e+00> : vector<128x8xf32>
    %241 = tpu.matmul %238, %240, %cst_307 {dimension_numbers = #tpu.dot_dimension_numbers<[1], [0], [0], [1], [0, 0, 1, 1], [], []>} : vector<128x4xf32>, vector<4x8xf32>, vector<128x8xf32> -> vector<128x8xf32>
    %242 = arith.addf %236, %241 : vector<128x8xf32>
    %c0_308 = arith.constant 0 : index
    %c0_309 = arith.constant 0 : index
    %243 = vector.load %arg2[%c0_308, %c0_309] : memref<1x8xf32, #tpu.memory_space<vmem>>, vector<1x8xf32>
    %244 = vector.broadcast %243 : vector<1x8xf32> to vector<128x8xf32>
    %245 = arith.addf %242, %244 : vector<128x8xf32>
    %cst_310 = arith.constant 0.000000e+00 : f32
    %246 = vector.broadcast %cst_310 : f32 to vector<128x8xf32>
    %247 = arith.maximumf %245, %246 : vector<128x8xf32>
    %248 = vector.shape_cast %247 : vector<128x8xf32> to vector<2x8x8x8xf32>
    %c6_311 = arith.constant 6 : index
    %c0_312 = arith.constant 0 : index
    %c0_313 = arith.constant 0 : index
    %c0_314 = arith.constant 0 : index
    %249 = vector.load %arg8[%c6_311, %c0_312, %c0_313, %c0_314] : memref<8x9x9x8xf32, #tpu.memory_space<vmem>>, vector<2x8x8x8xf32>
    tpu.vector_store %arg8[%c6_311, %c0_312, %c0_313, %c0_314], %248 {strides = array<i32>} : memref<8x9x9x8xf32, #tpu.memory_space<vmem>>, vector<2x8x8x8xf32>,
    %cst_315 = arith.constant 0.000000e+00 : f32
    %250 = vector.broadcast %cst_315 : f32 to vector<128x16xf32>
    %c0_316 = arith.constant 0 : index
    %c0_317 = arith.constant 0 : index
    %c0_318 = arith.constant 0 : index
    %c0_319 = arith.constant 0 : index
    %251 = vector.load %arg8[%c0_316, %c0_317, %c0_318, %c0_319] : memref<8x9x9x8xf32, #tpu.memory_space<vmem>>, vector<2x8x8x8xf32>
    %252 = vector.shape_cast %251 : vector<2x8x8x8xf32> to vector<128x8xf32>
    %c0_320 = arith.constant 0 : index
    %c0_321 = arith.constant 0 : index
    %c0_322 = arith.constant 0 : index
    %253 = vector.load %arg3[%c0_320, %c0_321, %c0_322] : memref<9x8x16xf32, #tpu.memory_space<vmem>>, vector<1x8x16xf32>
    %254 = vector.shape_cast %253 : vector<1x8x16xf32> to vector<8x16xf32>
    %cst_323 = arith.constant dense<0.000000e+00> : vector<128x16xf32>
    %255 = tpu.matmul %252, %254, %cst_323 {dimension_numbers = #tpu.dot_dimension_numbers<[1], [0], [0], [1], [0, 0, 1, 1], [], []>} : vector<128x8xf32>, vector<8x16xf32>, vector<128x16xf32> -> vector<128x16xf32>
    %256 = arith.addf %250, %255 : vector<128x16xf32>
    %c2_324 = arith.constant 2 : index
    %c0_325 = arith.constant 0 : index
    %c0_326 = arith.constant 0 : index
    %c0_327 = arith.constant 0 : index
    %257 = vector.load %arg8[%c2_324, %c0_325, %c0_326, %c0_327] : memref<8x9x9x8xf32, #tpu.memory_space<vmem>>, vector<2x8x8x8xf32>
    %258 = vector.shape_cast %257 : vector<2x8x8x8xf32> to vector<128x8xf32>
    %c1_328 = arith.constant 1 : index
    %c0_329 = arith.constant 0 : index
    %c0_330 = arith.constant 0 : index
    %259 = vector.load %arg3[%c1_328, %c0_329, %c0_330] : memref<9x8x16xf32, #tpu.memory_space<vmem>>, vector<1x8x16xf32>
    %260 = vector.shape_cast %259 : vector<1x8x16xf32> to vector<8x16xf32>
    %cst_331 = arith.constant dense<0.000000e+00> : vector<128x16xf32>
    %261 = tpu.matmul %258, %260, %cst_331 {dimension_numbers = #tpu.dot_dimension_numbers<[1], [0], [0], [1], [0, 0, 1, 1], [], []>} : vector<128x8xf32>, vector<8x16xf32>, vector<128x16xf32> -> vector<128x16xf32>
    %262 = arith.addf %256, %261 : vector<128x16xf32>
    %c0_332 = arith.constant 0 : index
    %c0_333 = arith.constant 0 : index
    %c1_334 = arith.constant 1 : index
    %c0_335 = arith.constant 0 : index
    %263 = vector.load %arg8[%c0_332, %c0_333, %c1_334, %c0_335] : memref<8x9x9x8xf32, #tpu.memory_space<vmem>>, vector<2x8x8x8xf32>
    %264 = vector.shape_cast %263 : vector<2x8x8x8xf32> to vector<128x8xf32>
    %c2_336 = arith.constant 2 : index
    %c0_337 = arith.constant 0 : index
    %c0_338 = arith.constant 0 : index
    %265 = vector.load %arg3[%c2_336, %c0_337, %c0_338] : memref<9x8x16xf32, #tpu.memory_space<vmem>>, vector<1x8x16xf32>
    %266 = vector.shape_cast %265 : vector<1x8x16xf32> to vector<8x16xf32>
    %cst_339 = arith.constant dense<0.000000e+00> : vector<128x16xf32>
    %267 = tpu.matmul %264, %266, %cst_339 {dimension_numbers = #tpu.dot_dimension_numbers<[1], [0], [0], [1], [0, 0, 1, 1], [], []>} : vector<128x8xf32>, vector<8x16xf32>, vector<128x16xf32> -> vector<128x16xf32>
    %268 = arith.addf %262, %267 : vector<128x16xf32>
    %c4_340 = arith.constant 4 : index
    %c0_341 = arith.constant 0 : index
    %c0_342 = arith.constant 0 : index
    %c0_343 = arith.constant 0 : index
    %269 = vector.load %arg8[%c4_340, %c0_341, %c0_342, %c0_343] : memref<8x9x9x8xf32, #tpu.memory_space<vmem>>, vector<2x8x8x8xf32>
    %270 = vector.shape_cast %269 : vector<2x8x8x8xf32> to vector<128x8xf32>
    %c3_344 = arith.constant 3 : index
    %c0_345 = arith.constant 0 : index
    %c0_346 = arith.constant 0 : index
    %271 = vector.load %arg3[%c3_344, %c0_345, %c0_346] : memref<9x8x16xf32, #tpu.memory_space<vmem>>, vector<1x8x16xf32>
    %272 = vector.shape_cast %271 : vector<1x8x16xf32> to vector<8x16xf32>
    %cst_347 = arith.constant dense<0.000000e+00> : vector<128x16xf32>
    %273 = tpu.matmul %270, %272, %cst_347 {dimension_numbers = #tpu.dot_dimension_numbers<[1], [0], [0], [1], [0, 0, 1, 1], [], []>} : vector<128x8xf32>, vector<8x16xf32>, vector<128x16xf32> -> vector<128x16xf32>
    %274 = arith.addf %268, %273 : vector<128x16xf32>
    %c6_348 = arith.constant 6 : index
    %c0_349 = arith.constant 0 : index
    %c0_350 = arith.constant 0 : index
    %c0_351 = arith.constant 0 : index
    %275 = vector.load %arg8[%c6_348, %c0_349, %c0_350, %c0_351] : memref<8x9x9x8xf32, #tpu.memory_space<vmem>>, vector<2x8x8x8xf32>
    %276 = vector.shape_cast %275 : vector<2x8x8x8xf32> to vector<128x8xf32>
    %c4_352 = arith.constant 4 : index
    %c0_353 = arith.constant 0 : index
    %c0_354 = arith.constant 0 : index
    %277 = vector.load %arg3[%c4_352, %c0_353, %c0_354] : memref<9x8x16xf32, #tpu.memory_space<vmem>>, vector<1x8x16xf32>
    %278 = vector.shape_cast %277 : vector<1x8x16xf32> to vector<8x16xf32>
    %cst_355 = arith.constant dense<0.000000e+00> : vector<128x16xf32>
    %279 = tpu.matmul %276, %278, %cst_355 {dimension_numbers = #tpu.dot_dimension_numbers<[1], [0], [0], [1], [0, 0, 1, 1], [], []>} : vector<128x8xf32>, vector<8x16xf32>, vector<128x16xf32> -> vector<128x16xf32>
    %280 = arith.addf %274, %279 : vector<128x16xf32>
    %c4_356 = arith.constant 4 : index
    %c0_357 = arith.constant 0 : index
    %c1_358 = arith.constant 1 : index
    %c0_359 = arith.constant 0 : index
    %281 = vector.load %arg8[%c4_356, %c0_357, %c1_358, %c0_359] : memref<8x9x9x8xf32, #tpu.memory_space<vmem>>, vector<2x8x8x8xf32>
    %282 = vector.shape_cast %281 : vector<2x8x8x8xf32> to vector<128x8xf32>
    %c5_360 = arith.constant 5 : index
    %c0_361 = arith.constant 0 : index
    %c0_362 = arith.constant 0 : index
    %283 = vector.load %arg3[%c5_360, %c0_361, %c0_362] : memref<9x8x16xf32, #tpu.memory_space<vmem>>, vector<1x8x16xf32>
    %284 = vector.shape_cast %283 : vector<1x8x16xf32> to vector<8x16xf32>
    %cst_363 = arith.constant dense<0.000000e+00> : vector<128x16xf32>
    %285 = tpu.matmul %282, %284, %cst_363 {dimension_numbers = #tpu.dot_dimension_numbers<[1], [0], [0], [1], [0, 0, 1, 1], [], []>} : vector<128x8xf32>, vector<8x16xf32>, vector<128x16xf32> -> vector<128x16xf32>
    %286 = arith.addf %280, %285 : vector<128x16xf32>
    %c0_364 = arith.constant 0 : index
    %c1_365 = arith.constant 1 : index
    %c0_366 = arith.constant 0 : index
    %c0_367 = arith.constant 0 : index
    %287 = vector.load %arg8[%c0_364, %c1_365, %c0_366, %c0_367] : memref<8x9x9x8xf32, #tpu.memory_space<vmem>>, vector<2x8x8x8xf32>
    %288 = vector.shape_cast %287 : vector<2x8x8x8xf32> to vector<128x8xf32>
    %c6_368 = arith.constant 6 : index
    %c0_369 = arith.constant 0 : index
    %c0_370 = arith.constant 0 : index
    %289 = vector.load %arg3[%c6_368, %c0_369, %c0_370] : memref<9x8x16xf32, #tpu.memory_space<vmem>>, vector<1x8x16xf32>
    %290 = vector.shape_cast %289 : vector<1x8x16xf32> to vector<8x16xf32>
    %cst_371 = arith.constant dense<0.000000e+00> : vector<128x16xf32>
    %291 = tpu.matmul %288, %290, %cst_371 {dimension_numbers = #tpu.dot_dimension_numbers<[1], [0], [0], [1], [0, 0, 1, 1], [], []>} : vector<128x8xf32>, vector<8x16xf32>, vector<128x16xf32> -> vector<128x16xf32>
    %292 = arith.addf %286, %291 : vector<128x16xf32>
    %c2_372 = arith.constant 2 : index
    %c1_373 = arith.constant 1 : index
    %c0_374 = arith.constant 0 : index
    %c0_375 = arith.constant 0 : index
    %293 = vector.load %arg8[%c2_372, %c1_373, %c0_374, %c0_375] : memref<8x9x9x8xf32, #tpu.memory_space<vmem>>, vector<2x8x8x8xf32>
    %294 = vector.shape_cast %293 : vector<2x8x8x8xf32> to vector<128x8xf32>
    %c7_376 = arith.constant 7 : index
    %c0_377 = arith.constant 0 : index
    %c0_378 = arith.constant 0 : index
    %295 = vector.load %arg3[%c7_376, %c0_377, %c0_378] : memref<9x8x16xf32, #tpu.memory_space<vmem>>, vector<1x8x16xf32>
    %296 = vector.shape_cast %295 : vector<1x8x16xf32> to vector<8x16xf32>
    %cst_379 = arith.constant dense<0.000000e+00> : vector<128x16xf32>
    %297 = tpu.matmul %294, %296, %cst_379 {dimension_numbers = #tpu.dot_dimension_numbers<[1], [0], [0], [1], [0, 0, 1, 1], [], []>} : vector<128x8xf32>, vector<8x16xf32>, vector<128x16xf32> -> vector<128x16xf32>
    %298 = arith.addf %292, %297 : vector<128x16xf32>
    %c0_380 = arith.constant 0 : index
    %c1_381 = arith.constant 1 : index
    %c1_382 = arith.constant 1 : index
    %c0_383 = arith.constant 0 : index
    %299 = vector.load %arg8[%c0_380, %c1_381, %c1_382, %c0_383] : memref<8x9x9x8xf32, #tpu.memory_space<vmem>>, vector<2x8x8x8xf32>
    %300 = vector.shape_cast %299 : vector<2x8x8x8xf32> to vector<128x8xf32>
    %c8_384 = arith.constant 8 : index
    %c0_385 = arith.constant 0 : index
    %c0_386 = arith.constant 0 : index
    %301 = vector.load %arg3[%c8_384, %c0_385, %c0_386] : memref<9x8x16xf32, #tpu.memory_space<vmem>>, vector<1x8x16xf32>
    %302 = vector.shape_cast %301 : vector<1x8x16xf32> to vector<8x16xf32>
    %cst_387 = arith.constant dense<0.000000e+00> : vector<128x16xf32>
    %303 = tpu.matmul %300, %302, %cst_387 {dimension_numbers = #tpu.dot_dimension_numbers<[1], [0], [0], [1], [0, 0, 1, 1], [], []>} : vector<128x8xf32>, vector<8x16xf32>, vector<128x16xf32> -> vector<128x16xf32>
    %304 = arith.addf %298, %303 : vector<128x16xf32>
    %c0_388 = arith.constant 0 : index
    %c0_389 = arith.constant 0 : index
    %305 = vector.load %arg4[%c0_388, %c0_389] : memref<1x16xf32, #tpu.memory_space<vmem>>, vector<1x16xf32>
    %306 = vector.broadcast %305 : vector<1x16xf32> to vector<128x16xf32>
    %307 = arith.addf %304, %306 : vector<128x16xf32>
    %cst_390 = arith.constant 0.000000e+00 : f32
    %308 = vector.broadcast %cst_390 : f32 to vector<128x16xf32>
    %309 = arith.maximumf %307, %308 : vector<128x16xf32>
    %310 = vector.shape_cast %309 : vector<128x16xf32> to vector<2x64x16xf32>
    %cst_391 = arith.constant dense<0.000000e+00> : vector<2x16xf32>
    %311 = vector.multi_reduction <add>, %310, %cst_391 [1] : vector<2x64x16xf32> to vector<2x16xf32>
    %cst_392 = arith.constant 6.400000e+01 : f32
    %312 = vector.broadcast %cst_392 : f32 to vector<2x16xf32>
    %313 = arith.divf %311, %312 : vector<2x16xf32>
    %c0_393 = arith.constant 0 : index
    %c0_394 = arith.constant 0 : index
    %314 = vector.load %arg5[%c0_393, %c0_394] : memref<16x32xf32, #tpu.memory_space<vmem>>, vector<16x32xf32>
    %cst_395 = arith.constant dense<0.000000e+00> : vector<2x32xf32>
    %315 = tpu.matmul %313, %314, %cst_395 {dimension_numbers = #tpu.dot_dimension_numbers<[1], [0], [0], [1], [0, 0, 1, 1], [], []>} : vector<2x16xf32>, vector<16x32xf32>, vector<2x32xf32> -> vector<2x32xf32>
    %c0_396 = arith.constant 0 : index
    %c0_397 = arith.constant 0 : index
    %316 = vector.load %arg6[%c0_396, %c0_397] : memref<1x32xf32, #tpu.memory_space<vmem>>, vector<1x32xf32>
    %317 = vector.broadcast %316 : vector<1x32xf32> to vector<2x32xf32>
    %318 = arith.addf %315, %317 : vector<2x32xf32>
    %c0_398 = arith.constant 0 : index
    %c0_399 = arith.constant 0 : index
    %319 = vector.load %arg7[%c0_398, %c0_399] : memref<2x32xf32, #tpu.memory_space<vmem>>, vector<2x32xf32>
    tpu.vector_store %arg7[%c0_398, %c0_399], %318 {strides = array<i32>} : memref<2x32xf32, #tpu.memory_space<vmem>>, vector<2x32xf32>,
    return
  }
}

</mosaic_0001>

<bundles_post_ra>
// kernel: style_encoder_forward.1
= control target key start
LH: loop header
LB: loop body
LE: loop exit
PB: predicated region body
PF: predicated region fallthrough
CT: control target
= control target key end

     0   :  { %vm259_vm0 = vcmask 1043456   ;;  %vm210_vm1 = vcmask 31744   ;;  %s18105_s0 = inlined_call_operand.vmem [shape: f32[8,9,9,4], index: 0, kind: input, shape index: {}]   ;;  %s18106_s1 = inlined_call_operand.vmem [shape: f32[9,4,8], index: 1, kind: input, shape index: {}]   ;;  %s18107_s2 = inlined_call_operand.vmem [shape: f32[1,8], index: 2, kind: input, shape index: {}]   ;;  %s18108_s3 = inlined_call_operand.vmem [shape: f32[9,8,16], index: 3, kind: input, shape index: {}]   ;;  %s18109_s4 = inlined_call_operand.vmem [shape: f32[1,16], index: 4, kind: input, shape index: {}]   ;;  %s18110_s5 = inlined_call_operand.vmem [shape: f32[16,32], index: 5, kind: input, shape index: {}]   ;;  %s18111_s6 = inlined_call_operand.vmem [shape: f32[1,32], index: 6, kind: input, shape index: {}]   ;;  %s18112_s7 = inlined_call_operand.hbm [shape: f32[2,32], index: 7, kind: output, shape index: {}]  }
   0x1   :  { %v10759_v0 = vld [vmem:[%s18106_s1 + $0x4] sm:$0xf]  ;;  %v14731_v1 = vld [vmem:[%s18106_s1 + $0x10] sm:$0xf]  ;;  %v190_v5 = vld [vmem:[%s18106_s1] sm:$0xf] }
   0x2   :  { %v10743_v2 = vld [vmem:[%s18105_s0 + $0x241] sm:$0xff]  ;;  %12826 = vmatprep.subr.msk.mxu1 %vm259_vm0, %v10759_v0  ;;  %12930 = vmatprep.subr.msk.mxu0 %vm259_vm0, %v14731_v1  ;;  %v14742_v3 = vld [vmem:[%s18105_s0 + $0x11] sm:$0xff]  ;;  %v14939_v33 = vld [vmem:[%s18106_s1 + $0x1c] sm:$0xf] }
   0x3   :  { %v14747_v4 = vld [vmem:[%s18105_s0 + $0x251] sm:$0xff]  ;;  %12827 = vmatpush3.msk.msra.mxu1 %vm259_vm0, %v10759_v0  ;;  %12828 = vmatprep.mubr.msk.f32.mxu1 %vm210_vm1, %v10743_v2  ;;  %v14757_v6 = vld [vmem:[%s18105_s0 + $0x21] sm:$0xff]  ;;  %v15020_v45 = vld [vmem:[%s18106_s1 + $0xc] sm:$0xf] }
   0x4   :  { %12931 = vmatpush3.msk.msra.mxu0 %vm259_vm0, %v14731_v1  ;;  %12932 = vmatprep.mubr.msk.f32.mxu0 %vm210_vm1, %v14742_v3  ;;  %v14766_v7 = vld [vmem:[%s18105_s0 + $0x261] sm:$0xff]  ;;  %v14771_v8 = vld [vmem:[%s18105_s0 + $0x31] sm:$0xff] }
   0x5   :  { %12829 = vmatmul.mubr.msk.f32.vlgmr.msra.gmra.mrb[0].mxu1 %vm210_vm1, %v14747_v4  ;;  %12852 = vmatprep.subr.msk.mxu1 %vm259_vm0, %v190_v5  ;;  %v14782_v9 = vld [vmem:[%s18105_s0 + $0x271] sm:$0xff]  ;;  %v14791_v10 = vld [vmem:[%s18105_s0 + $0x41] sm:$0xff] }
   0x6   :  { %12933 = vmatmul.mubr.msk.f32.vlgmr.msra.gmra.mrb[0].mxu0 %vm210_vm1, %v14757_v6  ;;  %12853 = vmatpush3.msk.msra.mxu1 %vm259_vm0, %v190_v5  ;;  %v14796_v11 = vld [vmem:[%s18105_s0 + $0x281] sm:$0xff]  ;;  %v14801_v12 = vld [vmem:[%s18105_s0 + $0x51] sm:$0xff] }
   0x7   :  { %12831 = vmatprep.mubr.msk.f32.mxu1 %vm210_vm1, %v14766_v7  ;;  %12935 = vmatprep.mubr.msk.f32.mxu0 %vm210_vm1, %v14771_v8  ;;  %v10912_v13 = vld [vmem:[%s18106_s1 + $0x14] sm:$0xf]  ;;  %v14823_v15 = vld [vmem:[%s18105_s0 + $0x61] sm:$0xff]  ;;  %v10946_v27 = vld [vmem:[%s18106_s1 + $0x18] sm:$0xf] }
   0x8   :  { %12956 = vmatprep.subr.msk.mxu0 %vm259_vm0, %v10912_v13  ;;  %v14816_v14 = vld [vmem:[%s18105_s0 + $0x291] sm:$0xff]  ;;  %v14828_v16 = vld [vmem:[%s18105_s0 + $0x2a1] sm:$0xff] }
   0x9   :  { %12832 = vmatmul.mubr.msk.f32.gmra.mrb[2].mxu1 %vm210_vm1, %v14782_v9  ;;  %12957 = vmatpush3.msk.msra.mxu0 %vm259_vm0, %v10912_v13  ;;  %v14834_v17 = vld [vmem:[%s18105_s0 + $0x71] sm:$0xff]  ;;  %v10810_v19 = vld [vmem:[%s18106_s1 + $0x8] sm:$0xf]  ;;  %v14982_v39 = vld [vmem:[%s18105_s0 + $0x360] sm:$0xff] }
   0xa   :  { %12936 = vmatmul.mubr.msk.f32.gmra.mrb[2].mxu0 %vm210_vm1, %v14791_v10  ;;  %12834 = vmatprep.mubr.msk.f32.mxu1 %vm210_vm1, %v14796_v11  ;;  %v14845_v18 = vld [vmem:[%s18105_s0 + $0x2b1] sm:$0xff]  ;;  %v10869_v20 = vld [vmem:[%s18105_s0 + $0x81] sm:$0xff] }
   0xb   :  { %12938 = vmatprep.mubr.msk.f32.mxu0 %vm210_vm1, %v14801_v12  ;;  %v14858_v21 = vld [vmem:[%s18105_s0 + $0x2d1] sm:$0xff]  ;;  %12878 = vmatprep.subr.msk.mxu1 %vm259_vm0, %v10810_v19  ;;  %v14864_v22 = vld [vmem:[%s18105_s0 + $0xa1] sm:$0xff] }
   0xc   :  { %v14874_v23 = vld [vmem:[%s18105_s0 + $0x2e1] sm:$0xff]  ;;  %v14881_v24 = vld [vmem:[%s18105_s0 + $0xb1] sm:$0xff]  ;;  %12982 = vmatprep.subr.msk.mxu0 %vm259_vm0, %v10946_v27 }
   0xd   :  { %12835 = vmatmul.mubr.msk.f32.gmra.mrb[4].mxu1 %vm210_vm1, %v14816_v14  ;;  %v14886_v25 = vld [vmem:[%s18105_s0 + $0x2f1] sm:$0xff]  ;;  %v14906_v28 = vld [vmem:[%s18105_s0 + $0x301] sm:$0xff] }
   0xe   :  { %12939 = vmatmul.mubr.msk.f32.gmra.mrb[4].mxu0 %vm210_vm1, %v14823_v15  ;;  %12837 = vmatprep.mubr.msk.f32.mxu1 %vm210_vm1, %v14828_v16  ;;  %18133 = vst [vmem:[#allocation6_spill] sm:$0xff] %v14886_v25  ;;  %v14891_v26 = vld [vmem:[%s18105_s0 + $0x131] sm:$0xff]  ;;  %18134 = vst [vmem:[#allocation7_spill] sm:$0xff] %v14906_v28  ;;  %v14913_v29 = vld [vmem:[%s18105_s0 + $0x141] sm:$0xff] }
   0xf   :  { %12941 = vmatprep.mubr.msk.f32.mxu0 %vm210_vm1, %v14834_v17  ;;  %v14918_v30 = vld [vmem:[%s18105_s0 + $0x311] sm:$0xff]  ;;  %v14934_v32 = vld [vmem:[%s18105_s0 + $0x321] sm:$0xff] }
  0x10   :  { %18135 = vst [vmem:[#allocation8_spill] sm:$0xff] %v14918_v30  ;;  %v14923_v31 = vld [vmem:[%s18105_s0 + $0x151] sm:$0xff]  ;;  %18136 = vst [vmem:[#allocation9_spill] sm:$0xff] %v14934_v32  ;;  %v14946_v34 = vld [vmem:[%s18105_s0 + $0x161] sm:$0xff] }
  0x11   :  { %12838 = vmatmul.mubr.msk.f32.gmra.mrb[6].mxu1 %vm210_vm1, %v14845_v18  ;;  %v14951_v35 = vld [vmem:[%s18105_s0 + $0x331] sm:$0xff]  ;;  %v14970_v37 = vld [vmem:[%s18105_s0 + $0x341] sm:$0xff] }
  0x12   :  { %12942 = vmatmul.mubr.msk.f32.gmra.mrb[6].mxu0 %vm210_vm1, %v10869_v20  ;;  %12840 = vmatprep.mubr.msk.f32.mxu1 %vm210_vm1, %v14858_v21  ;;  %18137 = vst [vmem:[#allocation10_spill] sm:$0xff] %v14951_v35  ;;  %v14957_v36 = vld [vmem:[%s18105_s0 + $0x171] sm:$0xff]  ;;  %18139 = vst [vmem:[#allocation12_spill] sm:$0xff] %v14970_v37  ;;  %v14977_v38 = vld [vmem:[%s18105_s0 + $0x181] sm:$0xff] }
  0x13   :  { %12944 = vmatprep.mubr.msk.f32.mxu0 %vm210_vm1, %v14864_v22  ;;  %18138 = vst [vmem:[#allocation11_spill] sm:$0xff] %v14957_v36  ;;  %18140 = vst [vmem:[#allocation13_spill] sm:$0xff] %v14977_v38  ;;  %v14987_v40 = vld [vmem:[%s18105_s0 + $0x191] sm:$0xff]  ;;  %v10903_v42 = vld [vmem:[%s18105_s0 + $0x1a1] sm:$0xff] }
  0x14   :  { %18141 = vst [vmem:[#allocation14_spill] sm:$0xff] %v14987_v40  ;;  %v14998_v41 = vld [vmem:[%s18105_s0 + $0x370] sm:$0xff]  ;;  %v15008_v43 = vld [vmem:[%s18105_s0 + $0x380] sm:$0xff] }
  0x15   :  { %12841 = vmatmul.mubr.msk.f32.gmra.mrb[8].mxu1 %vm210_vm1, %v14874_v23  ;;  %v15013_v44 = vld [vmem:[%s18105_s0 + $0x1c1] sm:$0xff]  ;;  %v15027_v46 = vld [vmem:[%s18105_s0 + $0x390] sm:$0xff] }
  0x16   :  { %12945 = vmatmul.mubr.msk.f32.gmra.mrb[8].mxu0 %vm210_vm1, %v14881_v24  ;;  %12843 = vmatprep.mubr.msk.f32.mxu1 %vm210_vm1, %v14886_v25  ;;  %18142 = vst [vmem:[#allocation15_spill] sm:$0xff] %v15013_v44  ;;  %v15036_v47 = vld [vmem:[%s18105_s0 + $0x1d1] sm:$0xff]  ;;  %v15041_v48 = vld [vmem:[%s18105_s0 + $0x3a0] sm:$0xff] }
  0x17   :  { %12958 = vmatprep.mubr.msk.f32.mxu0 %vm210_vm1, %v14891_v26  ;;  %18143 = vst [vmem:[#allocation16_spill] sm:$0xff] %v15036_v47 }
  0x19   :  { %12844 = vmatmul.mubr.msk.f32.gmra.mrb[10].mxu1 %vm210_vm1, %v14906_v28 }
  0x1a   :  { %12959 = vmatmul.mubr.msk.f32.vlgmr.msra.gmra.mrb[0].mxu0 %vm210_vm1, %v14913_v29  ;;  %12846 = vmatprep.mubr.msk.f32.mxu1 %vm210_vm1, %v14918_v30 }
  0x1b   :  { %12961 = vmatprep.mubr.msk.f32.mxu0 %vm210_vm1, %v14923_v31  ;;  %12983 = vmatpush3.msk.msra.mxu0 %vm259_vm0, %v10946_v27 }
  0x1c   :  { %13008 = vmatprep.subr.msk.mxu0 %vm259_vm0, %v14939_v33 }
  0x1d   :  { %12847 = vmatmul.mubr.msk.f32.gmra.mrb[12].mxu1 %vm210_vm1, %v14934_v32 }
  0x1e   :  { %12962 = vmatmul.mubr.msk.f32.gmra.mrb[2].mxu0 %vm210_vm1, %v14946_v34  ;;  %12849 = vmatprep.mubr.msk.f32.mxu1 %vm210_vm1, %v14951_v35 }
  0x1f   :  { %12964 = vmatprep.mubr.msk.f32.mxu0 %vm210_vm1, %v14957_v36 }
  0x21   :  { %12850 = vmatmul.mubr.msk.f32.gmra.mrb[14].mxu1 %vm210_vm1, %v14970_v37 }
  0x22   :  { %12965 = vmatmul.mubr.msk.f32.gmra.mrb[4].mxu0 %vm210_vm1, %v14977_v38  ;;  %12854 = vmatprep.mubr.msk.f32.mxu1 %vm210_vm1, %v14982_v39 }
  0x23   :  { %12967 = vmatprep.mubr.msk.f32.mxu0 %vm210_vm1, %v14987_v40 }
  0x25   :  { %12855 = vmatmul.mubr.msk.f32.vlgmr.msra.gmra.mrb[0].mxu1 %vm210_vm1, %v14998_v41 }
  0x26   :  { %12968 = vmatmul.mubr.msk.f32.gmra.mrb[6].mxu0 %vm210_vm1, %v10903_v42  ;;  %12879 = vmatpush3.msk.msra.mxu1 %vm259_vm0, %v10810_v19 }
  0x27   :  { %12857 = vmatprep.mubr.msk.f32.mxu1 %vm210_vm1, %v15008_v43  ;;  %12970 = vmatprep.mubr.msk.f32.mxu0 %vm210_vm1, %v15013_v44 }
  0x28   :  { %12 = vsyncpa [#allocation4], 0  ;;  %v15046_v49 = vld [vmem:[%s18105_s0 + $0x1e1] sm:$0xff]  ;;  %12904 = vmatprep.subr.msk.mxu1 %vm259_vm0, %v15020_v45  ;;  %v15059_v50 = vld [vmem:[%s18105_s0 + $0x3b0] sm:$0xff]  ;;  %vm27_vm2 = vcmask 64512   ;;  %vm29_vm3 = vcmask 57344  }
  0x29   :  { %18144 = vst [vmem:[#allocation17_spill] sm:$0xff] %v15046_v49  ;;  %12858 = vmatmul.mubr.msk.f32.gmra.mrb[2].mxu1 %vm210_vm1, %v15027_v46  ;;  %v15066_v51 = vld [vmem:[%s18105_s0 + $0x1f1] sm:$0xff]  ;;  %v15071_v52 = vld [vmem:[%s18105_s0 + $0x3c0] sm:$0xff]  ;;  %vm14683_vm4 = vmmov 0   ;;  %vm10580_vm5 = vcmask 130048   ;;  %vm10637_vm6 = vcmask 1041409  }
  0x2a   :  { %12971 = vmatmul.mubr.msk.f32.gmra.mrb[8].mxu0 %vm210_vm1, %v15036_v47  ;;  %12860 = vmatprep.mubr.msk.f32.mxu1 %vm210_vm1, %v15041_v48  ;;  %18145 = vst [vmem:[#allocation18_spill] sm:$0xff] %v15066_v51  ;;  %v15076_v53 = vld [vmem:[%s18105_s0 + $0x201] sm:$0xff]  ;;  %v15087_v54 = vld [vmem:[%s18105_s0 + $0x3d0] sm:$0xff]  ;;  %s14684_s22 = smov [#allocation3]   ;;  %vm10711_vm7 = vcmask 254976  }
  0x2b   :  { %12973 = vmatprep.mubr.msk.f32.mxu0 %vm210_vm1, %v15046_v49  ;;  %18146 = vst [vmem:[#allocation19_spill] sm:$0xff] %v15076_v53  ;;  %v15094_v55 = vld [vmem:[%s18105_s0 + $0x211] sm:$0xff]  ;;  %v15104_v57 = vld [vmem:[%s18105_s0 + $0x221] sm:$0xff]  ;;  %s10719_s23 = sshll.u32 %s14684_s22, 4  ;;  %s10720_s23 = int_to_ptr.vmem [resolvable:$true] %s10719_s23 }
  0x2c   :  { %18147 = vst [vmem:[#allocation20_spill] sm:$0xff] %v15094_v55  ;;  %v15099_v56 = vld [vmem:[%s18105_s0 + $0x3f0] sm:$0xff]  ;;  %18148 = vst [vmem:[#allocation21_spill] sm:$0xff] %v15104_v57  ;;  %v15115_v58 = vld [vmem:[%s18105_s0 + $0x400] sm:$0xff]  ;;  %s14657_s24 = scalar_lea.vmem %s10720_s23, 32  ;;  %p14662_p1 = scmp.lt.s32.totalorder %s10720_s23, %s10720_s23 }
  0x2d   :  { %12861 = vmatmul.mubr.msk.f32.gmra.mrb[4].mxu1 %vm210_vm1, %v15059_v50  ;;  %v10911_v59 = vld [vmem:[%s18105_s0 + $0x231] sm:$0xff]  ;;  %v15135_v61 = vld [vmem:[%s18105_s0 + $0x420] sm:$0xff]  ;;  %p14658_p0 = scmp.ne.s32.totalorder %s10720_s23, %s14657_s24  ;;  %p14663_p2 = scmp.lt.s32.totalorder %s14657_s24, %s14657_s24 }
  0x2e   :  { %12974 = vmatmul.mubr.msk.f32.gmra.mrb[10].mxu0 %vm210_vm1, %v15066_v51  ;;  %12863 = vmatprep.mubr.msk.f32.mxu1 %vm210_vm1, %v15071_v52  ;;  %v15125_v60 = vld [vmem:[%s18105_s0 + $0x410] sm:$0xff]  ;;  %v11014_v63 = vld [vmem:[%s18106_s1 + $0x20] sm:$0xf]  ;;  %v11065_v44 = vld [vmem:[%s18106_s1 + $0x4] sm:$0xf] }
  0x2f   :  { %12976 = vmatprep.mubr.msk.f32.mxu0 %vm210_vm1, %v15076_v53  ;;  %v15142_v62 = vld [vmem:[%s18105_s0 + $0x430] sm:$0xff]  ;;  %v15156_v0 = vld [vmem:[%s18105_s0 + $0x440] sm:$0xff]  ;;  %p14664_p3 = por %p14663_p2, %p14662_p1 }
  0x30   :  { %v15163_v2 = vld [vmem:[%s18105_s0 + $0x450] sm:$0xff]  ;;  %v15177_v5 = vld [vmem:[%s18105_s0 + $0x460] sm:$0xff] }
  0x31   :  { %12864 = vmatmul.mubr.msk.f32.gmra.mrb[6].mxu1 %vm210_vm1, %v15087_v54  ;;  %v10794_v13 = vld [vmem:[%s18105_s0 + $0x361] sm:$0xff]  ;;  %v15192_v19 = vld [vmem:[%s18105_s0 + $0x371] sm:$0xff]  ;;  %p14665_p4 = pnand %p14664_p3, %p14658_p0 }
  0x32   :  { %12977 = vmatmul.mubr.msk.f32.gmra.mrb[12].mxu0 %vm210_vm1, %v15094_v55  ;;  %12866 = vmatprep.mubr.msk.f32.mxu1 %vm210_vm1, %v15099_v56  ;;  %v10937_v20 = vld [vmem:[%s18105_s0 + $0x3e0] sm:$0xff]  ;;  %v10945_v55 = vld [vmem:[%s18105_s0 + $0x470] sm:$0xff] }
  0x33   :  { %12979 = vmatprep.mubr.msk.f32.mxu0 %vm210_vm1, %v15104_v57  ;;  %v15202_v27 = vld [vmem:[%s18105_s0 + $0x381] sm:$0xff]  ;;  %v15277_v53 = vld [vmem:[%s18105_s0 + $0x411] sm:$0xff] }
  0x34   :  { %v15221_v42 = vld [vmem:[%s18105_s0 + $0x3a1] sm:$0xff]  ;;  %v15294_v51 = vld [vmem:[%s18105_s0 + $0x431] sm:$0xff] }
  0x35   :  { %12867 = vmatmul.mubr.msk.f32.gmra.mrb[8].mxu1 %vm210_vm1, %v15115_v58  ;;  %v15267_v57 = vld [vmem:[%s18105_s0 + $0x401] sm:$0xff]  ;;  %v15315_v49 = vld [vmem:[%s18105_s0 + $0x451] sm:$0xff] }
  0x36   :  { %12980 = vmatmul.mubr.msk.f32.gmra.mrb[14].mxu0 %vm210_vm1, %v10911_v59  ;;  %12869 = vmatprep.mubr.msk.f32.mxu1 %vm210_vm1, %v15125_v60  ;;  %v15241_v59 = vld [vmem:[%s18105_s0 + $0x3c1] sm:$0xff]  ;;  %v15356_v47 = vld [vmem:[%s18105_s0 + $0x150] sm:$0xff] }
  0x37   :  { %12984 = vmatprep.mubr.msk.f32.mxu0 %vm210_vm1, %v14998_v41  ;;  %v15369_v40 = vld [vmem:[%s18105_s0 + $0x160] sm:$0xff]  ;;  %v15378_v38 = vld [vmem:[%s18105_s0 + $0x170] sm:$0xff] }
  0x38   :  { %v15474_v36 = vld [vmem:[%s18105_s0 + $0x220] sm:$0xff] }
  0x39   :  { %12870 = vmatmul.mubr.msk.f32.gmra.mrb[10].mxu1 %vm210_vm1, %v15135_v61 }
  0x3a   :  { %12985 = vmatmul.mubr.msk.f32.vlgmr.msra.gmra.mrb[0].mxu0 %vm210_vm1, %v15008_v43  ;;  %12872 = vmatprep.mubr.msk.f32.mxu1 %vm210_vm1, %v15142_v62 }
  0x3b   :  { %12987 = vmatprep.mubr.msk.f32.mxu0 %vm210_vm1, %v15027_v46  ;;  %13009 = vmatpush3.msk.msra.mxu0 %vm259_vm0, %v14939_v33  ;;  %v15212_v33 = vld [vmem:[%s18105_s0 + $0x391] sm:$0xff] }
  0x3c   :  { %13034 = vmatprep.subr.msk.mxu0 %vm259_vm0, %v11014_v63 }
  0x3d   :  { %12873 = vmatmul.mubr.msk.f32.gmra.mrb[12].mxu1 %vm210_vm1, %v15156_v0 }
  0x3e   :  { %12988 = vmatmul.mubr.msk.f32.gmra.mrb[2].mxu0 %vm210_vm1, %v15041_v48  ;;  %12875 = vmatprep.mubr.msk.f32.mxu1 %vm210_vm1, %v15163_v2 }
  0x3f   :  { %12990 = vmatprep.mubr.msk.f32.mxu0 %vm210_vm1, %v15059_v50 }
  0x41   :  { %12876 = vmatmul.mubr.msk.f32.gmra.mrb[14].mxu1 %vm210_vm1, %v15177_v5 }
  0x42   :  { %12991 = vmatmul.mubr.msk.f32.gmra.mrb[4].mxu0 %vm210_vm1, %v15071_v52  ;;  %12880 = vmatprep.mubr.msk.f32.mxu1 %vm210_vm1, %v10794_v13  ;;  %v15252_v13 = vld [vmem:[%s18105_s0 + $0x3d1] sm:$0xff] }
  0x43   :  { %12993 = vmatprep.mubr.msk.f32.mxu0 %vm210_vm1, %v15087_v54 }
  0x45   :  { %12881 = vmatmul.mubr.msk.f32.vlgmr.msra.gmra.mrb[0].mxu1 %vm210_vm1, %v15192_v19 }
  0x46   :  { %12994 = vmatmul.mubr.msk.f32.gmra.mrb[6].mxu0 %vm210_vm1, %v10937_v20  ;;  %12905 = vmatpush3.msk.msra.mxu1 %vm259_vm0, %v15020_v45  ;;  %v15234_v45 = vld [vmem:[%s18105_s0 + $0x3b1] sm:$0xff] }
  0x47   :  { %12883 = vmatprep.mubr.msk.f32.mxu1 %vm210_vm1, %v15202_v27  ;;  %12996 = vmatprep.mubr.msk.f32.mxu0 %vm210_vm1, %v15115_v58  ;;  %v10802_v20 = vld [vmem:[%s18105_s0 + $0x3f1] sm:$0xff] }
  0x48   :  { %14006 = vmatprep.subr.msk.mxu1 %vm259_vm0, %v14731_v1 }
  0x49   :  { %12884 = vmatmul.mubr.msk.f32.gmra.mrb[2].mxu1 %vm210_vm1, %v15212_v33 }
  0x4a   :  { %12997 = vmatmul.mubr.msk.f32.gmra.mrb[8].mxu0 %vm210_vm1, %v15125_v60  ;;  %12886 = vmatprep.mubr.msk.f32.mxu1 %vm210_vm1, %v15221_v42 }
  0x4b   :  { %12999 = vmatprep.mubr.msk.f32.mxu0 %vm210_vm1, %v15135_v61 }
  0x4d   :  { %12887 = vmatmul.mubr.msk.f32.gmra.mrb[4].mxu1 %vm210_vm1, %v15234_v45 }
  0x4e   :  { %13000 = vmatmul.mubr.msk.f32.gmra.mrb[10].mxu0 %vm210_vm1, %v15142_v62  ;;  %12889 = vmatprep.mubr.msk.f32.mxu1 %vm210_vm1, %v15241_v59 }
  0x4f   :  { %13002 = vmatprep.mubr.msk.f32.mxu0 %vm210_vm1, %v15156_v0 }
  0x51   :  { %12890 = vmatmul.mubr.msk.f32.gmra.mrb[6].mxu1 %vm210_vm1, %v15252_v13 }
  0x52   :  { %13003 = vmatmul.mubr.msk.f32.gmra.mrb[12].mxu0 %vm210_vm1, %v15163_v2  ;;  %12892 = vmatprep.mubr.msk.f32.mxu1 %vm210_vm1, %v10802_v20  ;;  %v15287_v20 = vld [vmem:[%s18105_s0 + $0x421] sm:$0xff] }
  0x53   :  { %13005 = vmatprep.mubr.msk.f32.mxu0 %vm210_vm1, %v15177_v5 }
  0x55   :  { %12893 = vmatmul.mubr.msk.f32.gmra.mrb[8].mxu1 %vm210_vm1, %v15267_v57 }
  0x56   :  { %13006 = vmatmul.mubr.msk.f32.gmra.mrb[14].mxu0 %vm210_vm1, %v10945_v55  ;;  %12895 = vmatprep.mubr.msk.f32.mxu1 %vm210_vm1, %v15277_v53  ;;  %v11355_v55 = vld [vmem:[%s18106_s1 + $0x4] sm:$0xf] }
  0x57   :  { %13010 = vmatprep.mubr.msk.f32.mxu0 %vm210_vm1, %v14747_v4  ;;  %v15308_v4 = vld [vmem:[%s18105_s0 + $0x441] sm:$0xff] }
  0x59   :  { %12896 = vmatmul.mubr.msk.f32.gmra.mrb[10].mxu1 %vm210_vm1, %v15287_v20 }
  0x5a   :  { %13011 = vmatmul.mubr.msk.f32.vlgmr.msra.gmra.mrb[0].mxu0 %vm210_vm1, %v14766_v7  ;;  %12898 = vmatprep.mubr.msk.f32.mxu1 %vm210_vm1, %v15294_v51  ;;  %v15328_v7 = vld [vmem:[%s18105_s0 + $0x461] sm:$0xff] }
  0x5b   :  { %13013 = vmatprep.mubr.msk.f32.mxu0 %vm210_vm1, %v14782_v9  ;;  %13035 = vmatpush3.msk.msra.mxu0 %vm259_vm0, %v11014_v63  ;;  %v15335_v9 = vld [vmem:[%s18105_s0 + $0x130] sm:$0xff]  ;;  %v10971_v63 = vld [vmem:[%s18105_s0 + $0x2c1] sm:$0xff] }
  0x5c   :  { %13294 = vmatprep.subr.msk.mxu0 %vm259_vm0, %v11355_v55 }
  0x5d   :  { %12899 = vmatmul.mubr.msk.f32.gmra.mrb[12].mxu1 %vm210_vm1, %v15308_v4 }
  0x5e   :  { %13014 = vmatmul.mubr.msk.f32.gmra.mrb[2].mxu0 %vm210_vm1, %v14796_v11  ;;  %12901 = vmatprep.mubr.msk.f32.mxu1 %vm210_vm1, %v15315_v49  ;;  %v15346_v11 = vld [vmem:[%s18105_s0 + $0x140] sm:$0xff] }
  0x5f   :  { %13016 = vmatprep.mubr.msk.f32.mxu0 %vm210_vm1, %v14816_v14 }
  0x61   :  { %12902 = vmatmul.mubr.msk.f32.gmra.mrb[14].mxu1 %vm210_vm1, %v15328_v7 }
  0x62   :  { %13017 = vmatmul.mubr.msk.f32.gmra.mrb[4].mxu0 %vm210_vm1, %v14828_v16  ;;  %12906 = vmatprep.mubr.msk.f32.mxu1 %vm210_vm1, %v15335_v9 }
  0x63   :  { %13019 = vmatprep.mubr.msk.f32.mxu0 %vm210_vm1, %v14845_v18 }
  0x65   :  { %12907 = vmatmul.mubr.msk.f32.vlgmr.msra.gmra.mrb[0].mxu1 %vm210_vm1, %v15346_v11 }
  0x66   :  { %13020 = vmatmul.mubr.msk.f32.gmra.mrb[6].mxu0 %vm210_vm1, %v10971_v63  ;;  %14007 = vmatpush3.msk.msra.mxu1 %vm259_vm0, %v14731_v1  ;;  %v15390_v1 = vld [vmem:[%s18105_s0 + $0x180] sm:$0xff]  ;;  %v15397_v63 = vld [vmem:[%s18105_s0 + $0x190] sm:$0xff] }
  0x67   :  { %12909 = vmatprep.mubr.msk.f32.mxu1 %vm210_vm1, %v15356_v47  ;;  %13022 = vmatprep.mubr.msk.f32.mxu0 %vm210_vm1, %v14874_v23 }
  0x68   :  { %13060 = vmatprep.subr.msk.mxu1 %vm259_vm0, %v11065_v44 }
  0x69   :  { %12910 = vmatmul.mubr.msk.f32.gmra.mrb[2].mxu1 %vm210_vm1, %v15369_v40 }
  0x6a   :  { %13023 = vmatmul.mubr.msk.f32.gmra.mrb[8].mxu0 %vm210_vm1, %v14886_v25  ;;  %12912 = vmatprep.mubr.msk.f32.mxu1 %vm210_vm1, %v15378_v38  ;;  %v15408_v25 = vld [vmem:[%s18105_s0 + $0x1a0] sm:$0xff] }
  0x6b   :  { %13025 = vmatprep.mubr.msk.f32.mxu0 %vm210_vm1, %v14906_v28  ;;  %18149 = vst [vmem:[#allocation22_spill] sm:$0xff] %v15408_v25  ;;  %v15415_v28 = vld [vmem:[%s18105_s0 + $0x1c0] sm:$0xff] }
  0x6d   :  { %12913 = vmatmul.mubr.msk.f32.gmra.mrb[4].mxu1 %vm210_vm1, %v15390_v1 }
  0x6e   :  { %13026 = vmatmul.mubr.msk.f32.gmra.mrb[10].mxu0 %vm210_vm1, %v14918_v30  ;;  %12915 = vmatprep.mubr.msk.f32.mxu1 %vm210_vm1, %v15397_v63  ;;  %v15426_v30 = vld [vmem:[%s18105_s0 + $0x1d0] sm:$0xff] }
  0x6f   :  { %13028 = vmatprep.mubr.msk.f32.mxu0 %vm210_vm1, %v14934_v32  ;;  %v10979_v32 = vld [vmem:[%s18105_s0 + $0x351] sm:$0xff] }
  0x71   :  { %12916 = vmatmul.mubr.msk.f32.gmra.mrb[6].mxu1 %vm210_vm1, %v15408_v25  ;;  %v15436_v25 = vld [vmem:[%s18105_s0 + $0x1e0] sm:$0xff] }
  0x72   :  { %13029 = vmatmul.mubr.msk.f32.gmra.mrb[12].mxu0 %vm210_vm1, %v14951_v35  ;;  %12918 = vmatprep.mubr.msk.f32.mxu1 %vm210_vm1, %v15415_v28  ;;  %v15453_v35 = vld [vmem:[%s18105_s0 + $0x200] sm:$0xff] }
  0x73   :  { %13031 = vmatprep.mubr.msk.f32.mxu0 %vm210_vm1, %v14970_v37  ;;  %v15446_v37 = vld [vmem:[%s18105_s0 + $0x1f0] sm:$0xff] }
  0x75   :  { %12919 = vmatmul.mubr.msk.f32.gmra.mrb[8].mxu1 %vm210_vm1, %v15426_v30 }
  0x76   :  { %13032 = vmatmul.mubr.msk.f32.gmra.mrb[14].mxu0 %vm210_vm1, %v10979_v32  ;;  %12921 = vmatprep.mubr.msk.f32.mxu1 %vm210_vm1, %v15436_v25  ;;  %v4376_v32 = vld [vmem:[%s18106_s1] sm:$0xf] }
  0x77   :  { %13036 = vmatprep.mubr.msk.f32.mxu0 %vm210_vm1, %v15192_v19  ;;  %v15467_v19 = vld [vmem:[%s18105_s0 + $0x210] sm:$0xff] }
  0x79   :  { %12922 = vmatmul.mubr.msk.f32.gmra.mrb[10].mxu1 %vm210_vm1, %v15446_v37 }
  0x7a   :  { %13037 = vmatmul.mubr.msk.f32.vlgmr.msra.gmra.mrb[0].mxu0 %vm210_vm1, %v15202_v27  ;;  %12924 = vmatprep.mubr.msk.f32.mxu1 %vm210_vm1, %v15453_v35  ;;  %v15487_v27 = vld [vmem:[%s18105_s0 + $0x230] sm:$0xff] }
  0x7b   :  { %13039 = vmatprep.mubr.msk.f32.mxu0 %vm210_vm1, %v15212_v33  ;;  %13295 = vmatpush3.msk.msra.mxu0 %vm259_vm0, %v11355_v55  ;;  %18150 = vst [vmem:[#allocation23_spill] sm:$0xff] %v15487_v27  ;;  %v15494_v33 = vld [vmem:[%s18105_s0 + $0xc1] sm:$0xff] }
  0x7c   :  { %13320 = vmatprep.subr.msk.mxu0 %vm259_vm0, %v4376_v32  ;;  %v15515_v55 = vld [vmem:[%s18105_s0 + $0xe1] sm:$0xff] }
  0x7d   :  { %12925 = vmatmul.mubr.msk.f32.gmra.mrb[12].mxu1 %vm210_vm1, %v15467_v19 }
  0x7e   :  { %13040 = vmatmul.mubr.msk.f32.gmra.mrb[2].mxu0 %vm210_vm1, %v15221_v42  ;;  %12927 = vmatprep.mubr.msk.f32.mxu1 %vm210_vm1, %v15474_v36  ;;  %v15505_v42 = vld [vmem:[%s18105_s0 + $0xd1] sm:$0xff] }
  0x7f   :  { %13042 = vmatprep.mubr.msk.f32.mxu0 %vm210_vm1, %v15234_v45  ;;  %v11005_v45 = vld [vmem:[%s18105_s0 + $0x3e1] sm:$0xff] }
  0x81   :  { %12928 = vmatmul.mubr.msk.f32.gmra.mrb[14].mxu1 %vm210_vm1, %v15487_v27  ;;  %v15536_v27 = vld [vmem:[%s18105_s0 + $0x101] sm:$0xff] }
  0x82   :  { %13043 = vmatmul.mubr.msk.f32.gmra.mrb[4].mxu0 %vm210_vm1, %v15241_v59  ;;  %12947 = vmatprep.mubr.msk.f32.mxu1 %vm210_vm1, %v15494_v33  ;;  %v2290_v59 = vld [vmem:[%s18106_s1] sm:$0xf] }
  0x83   :  { %13045 = vmatprep.mubr.msk.f32.mxu0 %vm210_vm1, %v15252_v13  ;;  %v15527_v13 = vld [vmem:[%s18105_s0 + $0xf1] sm:$0xff] }
  0x85   :  { %12948 = vmatmul.mubr.msk.f32.vlgmr.msra.gmra.mrb[10].mxu1 %vm210_vm1, %v15505_v42 }
  0x86   :  { %13046 = vmatmul.mubr.msk.f32.gmra.mrb[6].mxu0 %vm210_vm1, %v11005_v45  ;;  %13061 = vmatpush3.msk.msra.mxu1 %vm259_vm0, %v11065_v44  ;;  %v10877_v44 = vld [vmem:[%s18105_s0 + $0x111] sm:$0xff] }
  0x87   :  { %12950 = vmatprep.mubr.msk.f32.mxu1 %vm210_vm1, %v15515_v55  ;;  %13048 = vmatprep.mubr.msk.f32.mxu0 %vm210_vm1, %v15267_v57  ;;  %v4377_v57 = vld [vmem:[%s18105_s0 + $0x1] sm:$0xff]  ;;  %v11043_v45 = vld [vmem:[%s18105_s0 + $0x2f0] sm:$0xff] }
  0x88   :  { %13086 = vmatprep.subr.msk.mxu1 %vm259_vm0, %v2290_v59 }
  0x89   :  { %12951 = vmatmul.mubr.msk.f32.gmra.mrb[12].mxu1 %vm210_vm1, %v15527_v13 }
  0x8a   :  { %13049 = vmatmul.mubr.msk.f32.gmra.mrb[8].mxu0 %vm210_vm1, %v15277_v53  ;;  %12953 = vmatprep.mubr.msk.f32.mxu1 %vm210_vm1, %v15536_v27  ;;  %v11116_v53 = vld [vmem:[%s18106_s1 + $0x8] sm:$0xf] }
  0x8b   :  { %13051 = vmatprep.mubr.msk.f32.mxu0 %vm210_vm1, %v15287_v20  ;;  %v11039_v20 = vld [vmem:[%s18105_s0 + $0x2a0] sm:$0xff] }
  0x8d   :  { %12954 = vmatmul.mubr.msk.f32.gmra.mrb[14].mxu1 %vm210_vm1, %v10877_v44  ;;  %v11045_v44 = vld [vmem:[%s18105_s0 + $0x310] sm:$0xff] }
  0x8e   :  { %13052 = vmatmul.mubr.msk.f32.gmra.mrb[10].mxu0 %vm210_vm1, %v15294_v51  ;;  %13062 = vmatprep.mubr.msk.f32.mxu1 %vm210_vm1, %v14982_v39  ;;  %v11013_v51 = vld [vmem:[%s18105_s0 + $0x471] sm:$0xff] }
  0x8f   :  { %13054 = vmatprep.mubr.msk.f32.mxu0 %vm210_vm1, %v15308_v4  ;;  %v15683_v4 = vld [vmem:[%s18106_s1 + $0xc] sm:$0xf] }
  0x91   :  { %13063 = vmatmul.mubr.msk.f32.vlgmr.msra.gmra.mrb[16].mxu1 %vm210_vm1, %v14998_v41 }
  0x92   :  { %13055 = vmatmul.mubr.msk.f32.gmra.mrb[12].mxu0 %vm210_vm1, %v15315_v49  ;;  %13087 = vmatpush3.msk.msra.mxu1 %vm259_vm0, %v2290_v59  ;;  %v11406_v49 = vld [vmem:[%s18106_s1 + $0x8] sm:$0xf]  ;;  %v11044_v59 = vld [vmem:[%s18105_s0 + $0x300] sm:$0xff] }
  0x93   :  { %13057 = vmatprep.mubr.msk.f32.mxu0 %vm210_vm1, %v15328_v7  ;;  %13065 = vmatprep.mubr.msk.f32.mxu1 %vm210_vm1, %v15008_v43  ;;  %v11040_v7 = vld [vmem:[%s18105_s0 + $0x2b0] sm:$0xff] }
  0x94   :  { %13112 = vmatprep.subr.msk.mxu1 %vm259_vm0, %v11116_v53 }
  0x95   :  { %13066 = vmatmul.mubr.msk.f32.gmra.mrb[18].mxu1 %vm210_vm1, %v15027_v46 }
  0x96   :  { %13058 = vmatmul.mubr.msk.f32.gmra.mrb[14].mxu0 %vm210_vm1, %v11013_v51  ;;  %13068 = vmatprep.mubr.msk.f32.mxu1 %vm210_vm1, %v15041_v48  ;;  %v11046_v51 = vld [vmem:[%s18105_s0 + $0x320] sm:$0xff] }
  0x97   :  { %13296 = vmatprep.mubr.msk.f32.mxu0 %vm210_vm1, %v4377_v57  ;;  %v11047_v57 = vld [vmem:[%s18105_s0 + $0x330] sm:$0xff] }
  0x99   :  { %13069 = vmatmul.mubr.msk.f32.gmra.mrb[20].mxu1 %vm210_vm1, %v15059_v50 }
  0x9a   :  { %13297 = vmatmul.mubr.msk.f32.vlgmr.msra.gmra.mrb[16].mxu0 %vm210_vm1, %v14742_v3  ;;  %13071 = vmatprep.mubr.msk.f32.mxu1 %vm210_vm1, %v15071_v52  ;;  %v4385_v3 = vld [vmem:[%s18105_s0 + $0x91] sm:$0xff] }
  0x9b   :  { %13299 = vmatprep.mubr.msk.f32.mxu0 %vm210_vm1, %v14757_v6  ;;  %13321 = vmatpush3.msk.msra.mxu0 %vm259_vm0, %v4376_v32  ;;  %v11033_v6 = vld [vmem:[%s18105_s0 + $0x240] sm:$0xff]  ;;  %v11041_v32 = vld [vmem:[%s18105_s0 + $0x2d0] sm:$0xff] }
  0x9c   :  { %13346 = vmatprep.subr.msk.mxu0 %vm259_vm0, %v11406_v49 }
  0x9d   :  { %13072 = vmatmul.mubr.msk.f32.gmra.mrb[22].mxu1 %vm210_vm1, %v15087_v54 }
  0x9e   :  { %13300 = vmatmul.mubr.msk.f32.gmra.mrb[18].mxu0 %vm210_vm1, %v14771_v8  ;;  %13074 = vmatprep.mubr.msk.f32.mxu1 %vm210_vm1, %v15099_v56  ;;  %v11034_v8 = vld [vmem:[%s18105_s0 + $0x250] sm:$0xff] }
  0x9f   :  { %13302 = vmatprep.mubr.msk.f32.mxu0 %vm210_vm1, %v14791_v10  ;;  %v11035_v10 = vld [vmem:[%s18105_s0 + $0x260] sm:$0xff] }
  0xa1   :  { %13075 = vmatmul.mubr.msk.f32.gmra.mrb[24].mxu1 %vm210_vm1, %v15115_v58 }
  0xa2   :  { %13303 = vmatmul.mubr.msk.f32.gmra.mrb[20].mxu0 %vm210_vm1, %v14801_v12  ;;  %13077 = vmatprep.mubr.msk.f32.mxu1 %vm210_vm1, %v15125_v60  ;;  %v15649_v12 = vld [vmem:[%s18106_s1 + $0xc] sm:$0xf] }
  0xa3   :  { %13305 = vmatprep.mubr.msk.f32.mxu0 %vm210_vm1, %v14823_v15  ;;  %v11036_v15 = vld [vmem:[%s18105_s0 + $0x270] sm:$0xff] }
  0xa5   :  { %13078 = vmatmul.mubr.msk.f32.gmra.mrb[26].mxu1 %vm210_vm1, %v15135_v61 }
  0xa6   :  { %13306 = vmatmul.mubr.msk.f32.gmra.mrb[22].mxu0 %vm210_vm1, %v14834_v17  ;;  %13080 = vmatprep.mubr.msk.f32.mxu1 %vm210_vm1, %v15142_v62  ;;  %v11037_v17 = vld [vmem:[%s18105_s0 + $0x280] sm:$0xff] }
  0xa7   :  { %13308 = vmatprep.mubr.msk.f32.mxu0 %vm210_vm1, %v4385_v3  ;;  %v18131_v3 = vmov 0.0  }
  0xa8   :  { %33 = vst.msk [vmem:[#allocation2 + $0x20] sm:$0xff] %vm27_vm2, %v18131_v3  ;;  %28 = vst.msk [vmem:[#allocation2] sm:$0xff] %vm27_vm2, %v18131_v3 }
  0xa9   :  { %13081 = vmatmul.mubr.msk.f32.gmra.mrb[28].mxu1 %vm210_vm1, %v15156_v0  ;;  %34 = vst.msk [vmem:[#allocation2 + $0x28] sm:$0x1] %vm29_vm3, %v18131_v3  ;;  %30 = vst.msk [vmem:[#allocation2 + $0x8] sm:$0x1] %vm29_vm3, %v18131_v3 }
  0xaa   :  { %13309 = vmatmul.mubr.msk.f32.gmra.mrb[24].mxu0 %vm210_vm1, %v14864_v22  ;;  %13083 = vmatprep.mubr.msk.f32.mxu1 %vm210_vm1, %v15163_v2  ;;  %v11339_v22 = vld [vmem:[%s18105_s0 + $0x120] sm:$0xff]  ;;  %31 = vst.msk [vmem:[#allocation2 + $0x10] sm:$0xff] %vm27_vm2, %v18131_v3  ;;  %35 = vst.msk [vmem:[#allocation2 + $0x30] sm:$0xff] %vm27_vm2, %v18131_v3 }
  0xab   :  { %13311 = vmatprep.mubr.msk.f32.mxu0 %vm210_vm1, %v14881_v24  ;;  %v11038_v24 = vld [vmem:[%s18105_s0 + $0x290] sm:$0xff]  ;;  %32 = vst.msk [vmem:[#allocation2 + $0x18] sm:$0x1] %vm29_vm3, %v18131_v3  ;;  %36 = vst.msk [vmem:[#allocation2 + $0x38] sm:$0x1] %vm29_vm3, %v18131_v3 }
  0xac   :  { %37 = vst.msk [vmem:[#allocation2 + $0x40] sm:$0xff] %vm27_vm2, %v18131_v3  ;;  %39 = vst.msk [vmem:[#allocation2 + $0x50] sm:$0xff] %vm27_vm2, %v18131_v3 }
  0xad   :  { %13084 = vmatmul.mubr.msk.f32.gmra.mrb[30].mxu1 %vm210_vm1, %v15177_v5  ;;  %38 = vst.msk [vmem:[#allocation2 + $0x48] sm:$0x1] %vm29_vm3, %v18131_v3  ;;  %40 = vst.msk [vmem:[#allocation2 + $0x58] sm:$0x1] %vm29_vm3, %v18131_v3 }
  0xae   :  { %13312 = vmatmul.mubr.msk.f32.gmra.mrb[26].mxu0 %vm210_vm1, %v15494_v33  ;;  %13088 = vmatprep.mubr.msk.f32.mxu1 %vm210_vm1, %v11033_v6  ;;  %41 = vst.msk [vmem:[#allocation2 + $0x60] sm:$0xff] %vm27_vm2, %v18131_v3  ;;  %43 = vst.msk [vmem:[#allocation2 + $0x70] sm:$0xff] %vm27_vm2, %v18131_v3  ;;  %v14652_v6 = vld [vmem:[%s18105_s0 + $0x241] sm:$0xff] }
  0xaf   :  { %13314 = vmatprep.mubr.msk.f32.mxu0 %vm210_vm1, %v15505_v42  ;;  %42 = vst.msk [vmem:[#allocation2 + $0x68] sm:$0x1] %vm29_vm3, %v18131_v3  ;;  %44 = vst.msk [vmem:[#allocation2 + $0x78] sm:$0x1] %vm29_vm3, %v18131_v3 }
  0xb0   :  { %45 = vst.msk [vmem:[#allocation2 + $0x80] sm:$0xff] %vm27_vm2, %v18131_v3  ;;  %47 = vst.msk [vmem:[#allocation2 + $0x90] sm:$0xff] %vm27_vm2, %v18131_v3 }
  0xb1   :  { %13089 = vmatmul.mubr.msk.f32.vlgmr.msra.gmra.mrb[16].mxu1 %vm210_vm1, %v11034_v8  ;;  %46 = vst.msk [vmem:[#allocation2 + $0x88] sm:$0x1] %vm29_vm3, %v18131_v3  ;;  %48 = vst.msk [vmem:[#allocation2 + $0x98] sm:$0x1] %vm29_vm3, %v18131_v3  ;;  %v14653_v8 = vld [vmem:[%s18105_s0 + $0x251] sm:$0xff] }
  0xb2   :  { %13315 = vmatmul.mubr.msk.f32.gmra.mrb[28].mxu0 %vm210_vm1, %v15515_v55  ;;  %13113 = vmatpush3.msk.msra.mxu1 %vm259_vm0, %v11116_v53  ;;  %v11347_v53 = vld [vmem:[%s18105_s0 + $0x1b0] sm:$0xff]  ;;  %49 = vst.msk [vmem:[#allocation2 + $0xa0] sm:$0xff] %vm27_vm2, %v18131_v3  ;;  %51 = vst.msk [vmem:[#allocation2 + $0xb0] sm:$0xff] %vm27_vm2, %v18131_v3 }
  0xb3   :  { %13091 = vmatprep.mubr.msk.f32.mxu1 %vm210_vm1, %v11035_v10  ;;  %13317 = vmatprep.mubr.msk.f32.mxu0 %vm210_vm1, %v15527_v13  ;;  %50 = vst.msk [vmem:[#allocation2 + $0xa8] sm:$0x1] %vm29_vm3, %v18131_v3  ;;  %52 = vst.msk [vmem:[#allocation2 + $0xb8] sm:$0x1] %vm29_vm3, %v18131_v3  ;;  %v11184_v10 = vld [vmem:[%s18106_s1 + $0x10] sm:$0xf] }
  0xb4   :  { %13138 = vmatprep.subr.msk.mxu1 %vm259_vm0, %v15649_v12  ;;  %53 = vst.msk [vmem:[#allocation2 + $0xc0] sm:$0xff] %vm27_vm2, %v18131_v3  ;;  %55 = vst.msk [vmem:[#allocation2 + $0xd0] sm:$0xff] %vm27_vm2, %v18131_v3 }
  0xb5   :  { %13092 = vmatmul.mubr.msk.f32.gmra.mrb[18].mxu1 %vm210_vm1, %v11036_v15  ;;  %54 = vst.msk [vmem:[#allocation2 + $0xc8] sm:$0x1] %vm29_vm3, %v18131_v3  ;;  %56 = vst.msk [vmem:[#allocation2 + $0xd8] sm:$0x1] %vm29_vm3, %v18131_v3  ;;  %v14654_v15 = vld [vmem:[%s18105_s0 + $0x261] sm:$0xff] }
  0xb6   :  { %13318 = vmatmul.mubr.msk.f32.gmra.mrb[30].mxu0 %vm210_vm1, %v15536_v27  ;;  %13094 = vmatprep.mubr.msk.f32.mxu1 %vm210_vm1, %v11037_v17  ;;  %v11042_v27 = vld [vmem:[%s18105_s0 + $0x2e0] sm:$0xff]  ;;  %57 = vst.msk [vmem:[#allocation2 + $0xe0] sm:$0xff] %vm27_vm2, %v18131_v3  ;;  %59 = vst.msk [vmem:[#allocation2 + $0xf0] sm:$0xff] %vm27_vm2, %v18131_v3 }
  0xb7   :  { %13322 = vmatprep.mubr.msk.f32.mxu0 %vm210_vm1, %v11339_v22  ;;  %58 = vst.msk [vmem:[#allocation2 + $0xe8] sm:$0x1] %vm29_vm3, %v18131_v3  ;;  %60 = vst.msk [vmem:[#allocation2 + $0xf8] sm:$0x1] %vm29_vm3, %v18131_v3  ;;  %v11390_v17 = vld [vmem:[%s18105_s0 + $0x121] sm:$0xff]  ;;  %v14655_v22 = vld [vmem:[%s18105_s0 + $0x271] sm:$0xff] }
  0xb8   :  { %61 = vst.msk [vmem:[#allocation2 + $0x100] sm:$0xff] %vm27_vm2, %v18131_v3  ;;  %63 = vst.msk [vmem:[#allocation2 + $0x110] sm:$0xff] %vm27_vm2, %v18131_v3 }
  0xb9   :  { %13095 = vmatmul.mubr.msk.f32.gmra.mrb[20].mxu1 %vm210_vm1, %v11038_v24  ;;  %62 = vst.msk [vmem:[#allocation2 + $0x108] sm:$0x1] %vm29_vm3, %v18131_v3  ;;  %64 = vst.msk [vmem:[#allocation2 + $0x118] sm:$0x1] %vm29_vm3, %v18131_v3  ;;  %v11474_v24 = vld [vmem:[%s18106_s1 + $0x10] sm:$0xf] }
  0xba   :  { %13323 = vmatmul.mubr.msk.f32.vlgmr.msra.gmra.mrb[16].mxu0 %vm210_vm1, %v15335_v9  ;;  %13097 = vmatprep.mubr.msk.f32.mxu1 %vm210_vm1, %v11039_v20  ;;  %65 = vst.msk [vmem:[#allocation2 + $0x120] sm:$0xff] %vm27_vm2, %v18131_v3  ;;  %67 = vst.msk [vmem:[#allocation2 + $0x130] sm:$0xff] %vm27_vm2, %v18131_v3  ;;  %v18159_v20 = vld [vmem:[#allocation10_spill] sm:$0xff] }
  0xbb   :  { %13325 = vmatprep.mubr.msk.f32.mxu0 %vm210_vm1, %v15346_v11  ;;  %13347 = vmatpush3.msk.msra.mxu0 %vm259_vm0, %v11406_v49  ;;  %v15744_v49 = vld [vmem:[%s18105_s0 + $0x340] sm:$0xff]  ;;  %69 = vst.msk [vmem:[#allocation2 + $0x140] sm:$0xff] %vm27_vm2, %v18131_v3  ;;  %71 = vst.msk [vmem:[#allocation2 + $0x150] sm:$0xff] %vm27_vm2, %v18131_v3 }
  0xbc   :  { %13372 = vmatprep.subr.msk.mxu0 %vm259_vm0, %v15683_v4  ;;  %73 = vst.msk [vmem:[#allocation2 + $0x160] sm:$0xff] %vm27_vm2, %v18131_v3  ;;  %75 = vst.msk [vmem:[#allocation2 + $0x170] sm:$0xff] %vm27_vm2, %v18131_v3 }
  0xbd   :  { %13098 = vmatmul.mubr.msk.f32.gmra.mrb[22].mxu1 %vm210_vm1, %v11040_v7  ;;  %77 = vst.msk [vmem:[#allocation2 + $0x180] sm:$0xff] %vm27_vm2, %v18131_v3  ;;  %79 = vst.msk [vmem:[#allocation2 + $0x190] sm:$0xff] %vm27_vm2, %v18131_v3  ;;  %v11134_v7 = vld [vmem:[%s18105_s0 + $0x10] sm:$0xff] }
  0xbe   :  { %13326 = vmatmul.mubr.msk.f32.gmra.mrb[18].mxu0 %vm210_vm1, %v15356_v47  ;;  %13100 = vmatprep.mubr.msk.f32.mxu1 %vm210_vm1, %v11041_v32  ;;  %81 = vst.msk [vmem:[#allocation2 + $0x1a0] sm:$0xff] %vm27_vm2, %v18131_v3  ;;  %83 = vst.msk [vmem:[#allocation2 + $0x1b0] sm:$0xff] %vm27_vm2, %v18131_v3  ;;  %v18161_v32 = vld [vmem:[#allocation12_spill] sm:$0xff] }
  0xbf   :  { %13328 = vmatprep.mubr.msk.f32.mxu0 %vm210_vm1, %v15369_v40  ;;  %85 = vst.msk [vmem:[#allocation2 + $0x1c0] sm:$0xff] %vm27_vm2, %v18131_v3  ;;  %87 = vst.msk [vmem:[#allocation2 + $0x1d0] sm:$0xff] %vm27_vm2, %v18131_v3 }
  0xc0   :  { %89 = vst.msk [vmem:[#allocation2 + $0x1e0] sm:$0xff] %vm27_vm2, %v18131_v3  ;;  %91 = vst.msk [vmem:[#allocation2 + $0x1f0] sm:$0xff] %vm27_vm2, %v18131_v3 }
  0xc1   :  { %13101 = vmatmul.mubr.msk.f32.gmra.mrb[24].mxu1 %vm210_vm1, %v11042_v27  ;;  %93 = vst.msk [vmem:[#allocation2 + $0x200] sm:$0xff] %vm27_vm2, %v18131_v3  ;;  %95 = vst.msk [vmem:[#allocation2 + $0x210] sm:$0xff] %vm27_vm2, %v18131_v3  ;;  %v18162_v27 = vld [vmem:[#allocation17_spill] sm:$0xff] }
  0xc2   :  { %13329 = vmatmul.mubr.msk.f32.gmra.mrb[20].mxu0 %vm210_vm1, %v15378_v38  ;;  %13103 = vmatprep.mubr.msk.f32.mxu1 %vm210_vm1, %v11043_v45  ;;  %97 = vst.msk [vmem:[#allocation2 + $0x220] sm:$0xff] %vm27_vm2, %v18131_v3  ;;  %99 = vst.msk [vmem:[#allocation2 + $0x230] sm:$0xff] %vm27_vm2, %v18131_v3  ;;  %v11135_v45 = vld [vmem:[%s18105_s0 + $0x20] sm:$0xff] }
  0xc3   :  { %13331 = vmatprep.mubr.msk.f32.mxu0 %vm210_vm1, %v15390_v1  ;;  %101 = vst.msk [vmem:[#allocation2 + $0x240] sm:$0xff] %vm27_vm2, %v18131_v3  ;;  %103 = vst.msk [vmem:[#allocation2 + $0x250] sm:$0xff] %vm27_vm2, %v18131_v3 }
  0xc4   :  { %102 = vst.msk [vmem:[#allocation2 + $0x248] sm:$0x1] %vm29_vm3, %v18131_v3  ;;  %104 = vst.msk [vmem:[#allocation2 + $0x258] sm:$0x1] %vm29_vm3, %v18131_v3 }
  0xc5   :  { %13104 = vmatmul.mubr.msk.f32.gmra.mrb[26].mxu1 %vm210_vm1, %v11044_v59  ;;  %105 = vst.msk [vmem:[#allocation2 + $0x260] sm:$0xff] %vm27_vm2, %v18131_v3  ;;  %107 = vst.msk [vmem:[#allocation2 + $0x270] sm:$0xff] %vm27_vm2, %v18131_v3  ;;  %v18163_v59 = vld [vmem:[#allocation18_spill] sm:$0xff] }
  0xc6   :  { %13332 = vmatmul.mubr.msk.f32.gmra.mrb[22].mxu0 %vm210_vm1, %v15397_v63  ;;  %13106 = vmatprep.mubr.msk.f32.mxu1 %vm210_vm1, %v11045_v44  ;;  %106 = vst.msk [vmem:[#allocation2 + $0x268] sm:$0x1] %vm29_vm3, %v18131_v3  ;;  %108 = vst.msk [vmem:[#allocation2 + $0x278] sm:$0x1] %vm29_vm3, %v18131_v3  ;;  %v11136_v44 = vld [vmem:[%s18105_s0 + $0x30] sm:$0xff] }
  0xc7   :  { %13334 = vmatprep.mubr.msk.f32.mxu0 %vm210_vm1, %v11347_v53  ;;  %109 = vst.msk [vmem:[#allocation2 + $0x280] sm:$0xff] %vm27_vm2, %v18131_v3  ;;  %111 = vst.msk [vmem:[#allocation2 + $0x290] sm:$0xff] %vm27_vm2, %v18131_v3  ;;  %v11218_v53 = vld [vmem:[%s18106_s1 + $0x14] sm:$0xf] }
  0xc8   :  { %110 = vst.msk [vmem:[#allocation2 + $0x288] sm:$0x1] %vm29_vm3, %v18131_v3  ;;  %112 = vst.msk [vmem:[#allocation2 + $0x298] sm:$0x1] %vm29_vm3, %v18131_v3 }
  0xc9   :  { %13107 = vmatmul.mubr.msk.f32.gmra.mrb[28].mxu1 %vm210_vm1, %v11046_v51  ;;  %113 = vst.msk [vmem:[#allocation2 + $0x2a0] sm:$0xff] %vm27_vm2, %v18131_v3  ;;  %115 = vst.msk [vmem:[#allocation2 + $0x2b0] sm:$0xff] %vm27_vm2, %v18131_v3  ;;  %v18164_v51 = vld [vmem:[#allocation19_spill] sm:$0xff] }
  0xca   :  { %13335 = vmatmul.mubr.msk.f32.gmra.mrb[24].mxu0 %vm210_vm1, %v15415_v28  ;;  %13109 = vmatprep.mubr.msk.f32.mxu1 %vm210_vm1, %v11047_v57  ;;  %114 = vst.msk [vmem:[#allocation2 + $0x2a8] sm:$0x1] %vm29_vm3, %v18131_v3  ;;  %116 = vst.msk [vmem:[#allocation2 + $0x2b8] sm:$0x1] %vm29_vm3, %v18131_v3  ;;  %v11137_v57 = vld [vmem:[%s18105_s0 + $0x40] sm:$0xff] }
  0xcb   :  { %13337 = vmatprep.mubr.msk.f32.mxu0 %vm210_vm1, %v15426_v30  ;;  %119 = vst.msk [vmem:[#allocation2 + $0x2d0] sm:$0xff] %vm27_vm2, %v18131_v3  ;;  %121 = vst.msk [vmem:[#allocation2 + $0x2e0] sm:$0xff] %vm27_vm2, %v18131_v3 }
  0xcc   :  { %120 = vst.msk [vmem:[#allocation2 + $0x2d8] sm:$0x1] %vm29_vm3, %v18131_v3  ;;  %122 = vst.msk [vmem:[#allocation2 + $0x2e8] sm:$0x1] %vm29_vm3, %v18131_v3 }
  0xcd   :  { %123 = vst.msk [vmem:[#allocation2 + $0x2f0] sm:$0xff] %vm27_vm2, %v18131_v3  ;;  %125 = vst.msk [vmem:[#allocation2 + $0x300] sm:$0xff] %vm27_vm2, %v18131_v3  ;;  %13110 = vmatmul.mubr.msk.f32.gmra.mrb[30].mxu1 %vm210_vm1, %v15744_v49  ;;  %v18165_v49 = vld [vmem:[#allocation20_spill] sm:$0xff] }
  0xce   :  { %124 = vst.msk [vmem:[#allocation2 + $0x2f8] sm:$0x1] %vm29_vm3, %v18131_v3  ;;  %126 = vst.msk [vmem:[#allocation2 + $0x308] sm:$0x1] %vm29_vm3, %v18131_v3  ;;  %13338 = vmatmul.mubr.msk.f32.gmra.mrb[26].mxu0 %vm210_vm1, %v15436_v25  ;;  %13114 = vmatprep.mubr.msk.f32.mxu1 %vm210_vm1, %v14652_v6  ;;  %v11138_v6 = vld [vmem:[%s18105_s0 + $0x50] sm:$0xff] }
  0xcf   :  { %127 = vst.msk [vmem:[#allocation2 + $0x310] sm:$0xff] %vm27_vm2, %v18131_v3  ;;  %129 = vst.msk [vmem:[#allocation2 + $0x320] sm:$0xff] %vm27_vm2, %v18131_v3  ;;  %13340 = vmatprep.mubr.msk.f32.mxu0 %vm210_vm1, %v15446_v37 }
  0xd0   :  { %128 = vst.msk [vmem:[#allocation2 + $0x318] sm:$0x1] %vm29_vm3, %v18131_v3  ;;  %130 = vst.msk [vmem:[#allocation2 + $0x328] sm:$0x1] %vm29_vm3, %v18131_v3 }
  0xd1   :  { %131 = vst.msk [vmem:[#allocation2 + $0x330] sm:$0xff] %vm27_vm2, %v18131_v3  ;;  %133 = vst.msk [vmem:[#allocation2 + $0x340] sm:$0xff] %vm27_vm2, %v18131_v3  ;;  %13115 = vmatmul.mubr.msk.f32.vlgmr.msra.gmra.mrb[16].mxu1 %vm210_vm1, %v14653_v8  ;;  %v18166_v8 = vld [vmem:[#allocation21_spill] sm:$0xff] }
  0xd2   :  { %132 = vst.msk [vmem:[#allocation2 + $0x338] sm:$0x1] %vm29_vm3, %v18131_v3  ;;  %134 = vst.msk [vmem:[#allocation2 + $0x348] sm:$0x1] %vm29_vm3, %v18131_v3  ;;  %13341 = vmatmul.mubr.msk.f32.gmra.mrb[28].mxu0 %vm210_vm1, %v15453_v35  ;;  %13139 = vmatpush3.msk.msra.mxu1 %vm259_vm0, %v15649_v12  ;;  %v14656_v12 = vld [vmem:[%s18105_s0 + $0x281] sm:$0xff] }
  0xd3   :  { %137 = vst.msk [vmem:[#allocation2 + $0x360] sm:$0xff] %vm27_vm2, %v18131_v3  ;;  %139 = vst.msk [vmem:[#allocation2 + $0x370] sm:$0xff] %vm27_vm2, %v18131_v3  ;;  %13117 = vmatprep.mubr.msk.f32.mxu1 %vm210_vm1, %v14654_v15  ;;  %13343 = vmatprep.mubr.msk.f32.mxu0 %vm210_vm1, %v15467_v19  ;;  %v11140_v15 = vld [vmem:[%s18105_s0 + $0x70] sm:$0xff] }
  0xd4   :  { %141 = vst.msk [vmem:[#allocation2 + $0x380] sm:$0xff] %vm27_vm2, %v18131_v3  ;;  %143 = vst.msk [vmem:[#allocation2 + $0x390] sm:$0xff] %vm27_vm2, %v18131_v3  ;;  %13164 = vmatprep.subr.msk.mxu1 %vm259_vm0, %v11184_v10 }
  0xd5   :  { %145 = vst.msk [vmem:[#allocation2 + $0x3a0] sm:$0xff] %vm27_vm2, %v18131_v3  ;;  %147 = vst.msk [vmem:[#allocation2 + $0x3b0] sm:$0xff] %vm27_vm2, %v18131_v3  ;;  %13118 = vmatmul.mubr.msk.f32.gmra.mrb[18].mxu1 %vm210_vm1, %v14655_v22  ;;  %v11141_v22 = vld [vmem:[%s18105_s0 + $0x80] sm:$0xff] }
  0xd6   :  { %149 = vst.msk [vmem:[#allocation2 + $0x3c0] sm:$0xff] %vm27_vm2, %v18131_v3  ;;  %151 = vst.msk [vmem:[#allocation2 + $0x3d0] sm:$0xff] %vm27_vm2, %v18131_v3  ;;  %13344 = vmatmul.mubr.msk.f32.gmra.mrb[30].mxu0 %vm210_vm1, %v15474_v36  ;;  %13120 = vmatprep.mubr.msk.f32.mxu1 %vm210_vm1, %v14656_v12  ;;  %v16322_v12 = vld [vmem:[%s18106_s1 + $0x1c] sm:$0xf] }
  0xd7   :  { %155 = vst.msk [vmem:[#allocation2 + $0x3f0] sm:$0xff] %vm27_vm2, %v18131_v3  ;;  %157 = vst.msk [vmem:[#allocation2 + $0x400] sm:$0xff] %vm27_vm2, %v18131_v3  ;;  %13348 = vmatprep.mubr.msk.f32.mxu0 %vm210_vm1, %v11390_v17  ;;  %v11508_v17 = vld [vmem:[%s18106_s1 + $0x14] sm:$0xf] }
  0xd8   :  { %159 = vst.msk [vmem:[#allocation2 + $0x410] sm:$0xff] %vm27_vm2, %v18131_v3  ;;  %161 = vst.msk [vmem:[#allocation2 + $0x420] sm:$0xff] %vm27_vm2, %v18131_v3 }
  0xd9   :  { %163 = vst.msk [vmem:[#allocation2 + $0x430] sm:$0xff] %vm27_vm2, %v18131_v3  ;;  %165 = vst.msk [vmem:[#allocation2 + $0x440] sm:$0xff] %vm27_vm2, %v18131_v3  ;;  %13121 = vmatmul.mubr.msk.f32.gmra.mrb[20].mxu1 %vm210_vm1, %v14816_v14  ;;  %v18151_v14 = vld [vmem:[#allocation11_spill] sm:$0xff] }
  0xda   :  { %167 = vst.msk [vmem:[#allocation2 + $0x450] sm:$0xff] %vm27_vm2, %v18131_v3  ;;  %169 = vst.msk [vmem:[#allocation2 + $0x460] sm:$0xff] %vm27_vm2, %v18131_v3  ;;  %13349 = vmatmul.mubr.msk.f32.vlgmr.msra.gmra.mrb[16].mxu0 %vm210_vm1, %v14891_v26  ;;  %13123 = vmatprep.mubr.msk.f32.mxu1 %vm210_vm1, %v14828_v16  ;;  %v18152_v16 = vld [vmem:[#allocation6_spill] sm:$0xff]  ;;  %v18153_v26 = vld [vmem:[#allocation13_spill] sm:$0xff] }
  0xdb   :  { %13351 = vmatprep.mubr.msk.f32.mxu0 %vm210_vm1, %v14913_v29  ;;  %13373 = vmatpush3.msk.msra.mxu0 %vm259_vm0, %v15683_v4  ;;  %v18155_v29 = vld [vmem:[#allocation14_spill] sm:$0xff]  ;;  %v18160_v4 = vld [vmem:[#allocation16_spill] sm:$0xff] }
  0xdc   :  { %13398 = vmatprep.subr.msk.mxu0 %vm259_vm0, %v11474_v24 }
  0xdd   :  { %13124 = vmatmul.mubr.msk.f32.gmra.mrb[22].mxu1 %vm210_vm1, %v14845_v18  ;;  %v11398_v18 = vld [vmem:[%s18105_s0 + $0x1b1] sm:$0xff] }
  0xde   :  { %13352 = vmatmul.mubr.msk.f32.gmra.mrb[18].mxu0 %vm210_vm1, %v14923_v31  ;;  %13126 = vmatprep.mubr.msk.f32.mxu1 %vm210_vm1, %v14858_v21  ;;  %v18154_v21 = vld [vmem:[#allocation7_spill] sm:$0xff]  ;;  %v18157_v31 = vld [vmem:[#allocation9_spill] sm:$0xff] }
  0xdf   :  { %13354 = vmatprep.mubr.msk.f32.mxu0 %vm210_vm1, %v14946_v34  ;;  %v18158_v34 = vld [vmem:[#allocation15_spill] sm:$0xff] }
  0xe1   :  { %13127 = vmatmul.mubr.msk.f32.gmra.mrb[24].mxu1 %vm210_vm1, %v14874_v23  ;;  %v18156_v23 = vld [vmem:[#allocation8_spill] sm:$0xff] }
  0xe2   :  { %13355 = vmatmul.mubr.msk.f32.gmra.mrb[20].mxu0 %vm210_vm1, %v18151_v14  ;;  %13129 = vmatprep.mubr.msk.f32.mxu1 %vm210_vm1, %v18152_v16  ;;  %v16339_v14 = vld [vmem:[%s18105_s0 + $0x341] sm:$0xff]  ;;  %v16344_v16 = vld [vmem:[%s18105_s0 + $0x51] sm:$0xff] }
  0xe3   :  { %13357 = vmatprep.mubr.msk.f32.mxu0 %vm210_vm1, %v18153_v26  ;;  %v11492_v26 = vld [vmem:[%s18105_s0 + $0x361] sm:$0xff] }
  0xe5   :  { %13130 = vmatmul.mubr.msk.f32.gmra.mrb[26].mxu1 %vm210_vm1, %v18154_v21  ;;  %v11493_v21 = vld [vmem:[%s18105_s0 + $0x371] sm:$0xff] }
  0xe6   :  { %13358 = vmatmul.mubr.msk.f32.gmra.mrb[22].mxu0 %vm210_vm1, %v18155_v29  ;;  %13132 = vmatprep.mubr.msk.f32.mxu1 %vm210_vm1, %v18156_v23  ;;  %v16369_v29 = vld [vmem:[%s18105_s0 + $0x71] sm:$0xff] }
  0xe7   :  { %13360 = vmatprep.mubr.msk.f32.mxu0 %vm210_vm1, %v11398_v18  ;;  %v16360_v18 = vld [vmem:[%s18105_s0 + $0x61] sm:$0xff] }
  0xe9   :  { %13133 = vmatmul.mubr.msk.f32.gmra.mrb[28].mxu1 %vm210_vm1, %v18157_v31  ;;  %v11494_v31 = vld [vmem:[%s18105_s0 + $0x381] sm:$0xff] }
  0xea   :  { %13361 = vmatmul.mubr.msk.f32.gmra.mrb[24].mxu0 %vm210_vm1, %v18158_v34  ;;  %13135 = vmatprep.mubr.msk.f32.mxu1 %vm210_vm1, %v18159_v20  ;;  %v16379_v20 = vld [vmem:[%s18106_s1 + $0x1c] sm:$0xf] }
  0xeb   :  { %13363 = vmatprep.mubr.msk.f32.mxu0 %vm210_vm1, %v18160_v4  ;;  %v16387_v4 = vld [vmem:[%s18105_s0 + $0x81] sm:$0xff] }
  0xed   :  { %13136 = vmatmul.mubr.msk.f32.gmra.mrb[30].mxu1 %vm210_vm1, %v18161_v32  ;;  %v16396_v32 = vld [vmem:[%s18105_s0 + $0xa1] sm:$0xff] }
  0xee   :  { %13364 = vmatmul.mubr.msk.f32.gmra.mrb[26].mxu0 %vm210_vm1, %v18162_v27  ;;  %13140 = vmatprep.mubr.msk.f32.mxu1 %vm210_vm1, %v11134_v7  ;;  %v11495_v7 = vld [vmem:[%s18105_s0 + $0x391] sm:$0xff] }
  0xef   :  { %13366 = vmatprep.mubr.msk.f32.mxu0 %vm210_vm1, %v18163_v59 }
  0xf1   :  { %13141 = vmatmul.mubr.msk.f32.vlgmr.msra.gmra.mrb[16].mxu1 %vm210_vm1, %v11135_v45  ;;  %v11496_v45 = vld [vmem:[%s18105_s0 + $0x3a1] sm:$0xff] }
  0xf2   :  { %13367 = vmatmul.mubr.msk.f32.gmra.mrb[28].mxu0 %vm210_vm1, %v18164_v51  ;;  %13165 = vmatpush3.msk.msra.mxu1 %vm259_vm0, %v11184_v10  ;;  %v11139_v10 = vld [vmem:[%s18105_s0 + $0x60] sm:$0xff] }
  0xf3   :  { %13143 = vmatprep.mubr.msk.f32.mxu1 %vm210_vm1, %v11136_v44  ;;  %13369 = vmatprep.mubr.msk.f32.mxu0 %vm210_vm1, %v18165_v49  ;;  %v16413_v44 = vld [vmem:[%s18105_s0 + $0xb1] sm:$0xff] }
  0xf4   :  { %13190 = vmatprep.subr.msk.mxu1 %vm259_vm0, %v11218_v53 }
  0xf5   :  { %13144 = vmatmul.mubr.msk.f32.gmra.mrb[18].mxu1 %vm210_vm1, %v11137_v57  ;;  %v11498_v57 = vld [vmem:[%s18105_s0 + $0x3c1] sm:$0xff] }
  0xf6   :  { %13370 = vmatmul.mubr.msk.f32.gmra.mrb[30].mxu0 %vm210_vm1, %v18166_v8  ;;  %13146 = vmatprep.mubr.msk.f32.mxu1 %vm210_vm1, %v11138_v6  ;;  %v11499_v6 = vld [vmem:[%s18105_s0 + $0x3d1] sm:$0xff] }
  0xf7   :  { %13374 = vmatprep.mubr.msk.f32.mxu0 %vm210_vm1, %v14982_v39  ;;  %v11142_v39 = vld [vmem:[%s18105_s0 + $0xa0] sm:$0xff] }
  0xf9   :  { %13147 = vmatmul.mubr.msk.f32.gmra.mrb[20].mxu1 %vm210_vm1, %v11139_v10  ;;  %v11500_v10 = vld [vmem:[%s18105_s0 + $0x3f1] sm:$0xff] }
  0xfa   :  { %13375 = vmatmul.mubr.msk.f32.vlgmr.msra.gmra.mrb[16].mxu0 %vm210_vm1, %v14998_v41  ;;  %13149 = vmatprep.mubr.msk.f32.mxu1 %vm210_vm1, %v11140_v15  ;;  %v11143_v41 = vld [vmem:[%s18105_s0 + $0xb0] sm:$0xff] }
  0xfb   :  { %13377 = vmatprep.mubr.msk.f32.mxu0 %vm210_vm1, %v15008_v43  ;;  %13399 = vmatpush3.msk.msra.mxu0 %vm259_vm0, %v11474_v24  ;;  %v11144_v43 = vld [vmem:[%s18105_s0 + $0xc0] sm:$0xff] }
  0xfc   :  { %13424 = vmatprep.subr.msk.mxu0 %vm259_vm0, %v11508_v17  ;;  %v16330_v24 = vld [vmem:[%s18105_s0 + $0x41] sm:$0xff] }
  0xfd   :  { %13150 = vmatmul.mubr.msk.f32.gmra.mrb[22].mxu1 %vm210_vm1, %v11141_v22 }
  0xfe   :  { %13378 = vmatmul.mubr.msk.f32.gmra.mrb[18].mxu0 %vm210_vm1, %v15027_v46  ;;  %13152 = vmatprep.mubr.msk.f32.mxu1 %vm210_vm1, %v11142_v39  ;;  %v11145_v46 = vld [vmem:[%s18105_s0 + $0xd0] sm:$0xff] }
  0xff   :  { %13380 = vmatprep.mubr.msk.f32.mxu0 %vm210_vm1, %v15041_v48  ;;  %v11146_v48 = vld [vmem:[%s18105_s0 + $0xe0] sm:$0xff] }
 0x101   :  { %13153 = vmatmul.mubr.msk.f32.gmra.mrb[24].mxu1 %vm210_vm1, %v11143_v41  ;;  %v11503_v41 = vld [vmem:[%s18105_s0 + $0x421] sm:$0xff] }
 0x102   :  { %13381 = vmatmul.mubr.msk.f32.gmra.mrb[20].mxu0 %vm210_vm1, %v15059_v50  ;;  %13155 = vmatprep.mubr.msk.f32.mxu1 %vm210_vm1, %v11144_v43  ;;  %v11147_v50 = vld [vmem:[%s18105_s0 + $0xf0] sm:$0xff] }
 0x103   :  { %13383 = vmatprep.mubr.msk.f32.mxu0 %vm210_vm1, %v15071_v52  ;;  %v11148_v52 = vld [vmem:[%s18105_s0 + $0x100] sm:$0xff]  ;;  %v11504_v43 = vld [vmem:[%s18105_s0 + $0x431] sm:$0xff] }
 0x105   :  { %13156 = vmatmul.mubr.msk.f32.gmra.mrb[26].mxu1 %vm210_vm1, %v11145_v46 }
 0x106   :  { %13384 = vmatmul.mubr.msk.f32.gmra.mrb[22].mxu0 %vm210_vm1, %v15087_v54  ;;  %13158 = vmatprep.mubr.msk.f32.mxu1 %vm210_vm1, %v11146_v48  ;;  %v11149_v54 = vld [vmem:[%s18105_s0 + $0x110] sm:$0xff]  ;;  %v16488_v48 = vld [vmem:[%s18107_s2] ss:$0 sm:$0xff] }
 0x107   :  { %13386 = vmatprep.mubr.msk.f32.mxu0 %vm210_vm1, %v15099_v56  ;;  %v11252_v56 = vld [vmem:[%s18106_s1 + $0x18] sm:$0xf] }
 0x109   :  { %13159 = vmatmul.mubr.msk.f32.gmra.mrb[28].mxu1 %vm210_vm1, %v11147_v50 }
 0x10a   :  { %13387 = vmatmul.mubr.msk.f32.gmra.mrb[24].mxu0 %vm210_vm1, %v15115_v58  ;;  %13161 = vmatprep.mubr.msk.f32.mxu1 %vm210_vm1, %v11148_v52  ;;  %v11458_v58 = vld [vmem:[%s18105_s0 + $0x241] sm:$0xff] }
 0x10b   :  { %13389 = vmatprep.mubr.msk.f32.mxu0 %vm210_vm1, %v15125_v60  ;;  %v16187_v60 = vld [vmem:[%s18105_s0 + $0x261] sm:$0xff] }
 0x10d   :  { %13162 = vmatmul.mubr.msk.f32.gmra.mrb[30].mxu1 %vm210_vm1, %v11149_v54  ;;  %v16498_v54 = vld [vmem:[%s18105_s0 + $0x260] sm:$0xff] }
 0x10e   :  { %13390 = vmatmul.mubr.msk.f32.gmra.mrb[26].mxu0 %vm210_vm1, %v15135_v61  ;;  %13166 = vmatprep.mubr.msk.f32.mxu1 %vm210_vm1, %v15335_v9  ;;  %v16211_v61 = vld [vmem:[%s18105_s0 + $0x281] sm:$0xff]  ;;  %v16287_v9 = vld [vmem:[%s18105_s0 + $0x311] sm:$0xff] }
 0x10f   :  { %13392 = vmatprep.mubr.msk.f32.mxu0 %vm210_vm1, %v15142_v62  ;;  %v18167_v62 = vld [vmem:[#allocation22_spill] sm:$0xff] }
 0x111   :  { %13167 = vmatmul.mubr.msk.f32.vlgmr.msra.gmra.mrb[16].mxu1 %vm210_vm1, %v15346_v11  ;;  %v18168_v11 = vld [vmem:[#allocation23_spill] sm:$0xff] }
 0x112   :  { %13393 = vmatmul.mubr.msk.f32.gmra.mrb[28].mxu0 %vm210_vm1, %v15156_v0  ;;  %13191 = vmatpush3.msk.msra.mxu1 %vm259_vm0, %v11218_v53  ;;  %v16226_v0 = vld [vmem:[%s18105_s0 + $0x291] sm:$0xff] }
 0x113   :  { %13169 = vmatprep.mubr.msk.f32.mxu1 %vm210_vm1, %v15356_v47  ;;  %13395 = vmatprep.mubr.msk.f32.mxu0 %vm210_vm1, %v15163_v2  ;;  %v16182_v47 = vld [vmem:[%s18105_s0 + $0x251] sm:$0xff]  ;;  %v16231_v2 = vld [vmem:[%s18105_s0 + $0x2a1] sm:$0xff] }
 0x114   :  { %13216 = vmatprep.subr.msk.mxu1 %vm259_vm0, %v11252_v56  ;;  %v11497_v53 = vld [vmem:[%s18105_s0 + $0x3b1] sm:$0xff] }
 0x115   :  { %13170 = vmatmul.mubr.msk.f32.gmra.mrb[18].mxu1 %vm210_vm1, %v15369_v40  ;;  %v16194_v40 = vld [vmem:[%s18106_s1 + $0x18] sm:$0xf] }
 0x116   :  { %13396 = vmatmul.mubr.msk.f32.gmra.mrb[30].mxu0 %vm210_vm1, %v15177_v5  ;;  %13172 = vmatprep.mubr.msk.f32.mxu1 %vm210_vm1, %v15378_v38  ;;  %v16205_v38 = vld [vmem:[%s18105_s0 + $0x271] sm:$0xff] }
 0x117   :  { %13400 = vmatprep.mubr.msk.f32.mxu0 %vm210_vm1, %v11458_v58  ;;  %v11466_v5 = vld [vmem:[%s18105_s0 + $0x2d1] sm:$0xff]  ;;  %v11505_v58 = vld [vmem:[%s18105_s0 + $0x441] sm:$0xff] }
 0x119   :  { %13173 = vmatmul.mubr.msk.f32.gmra.mrb[20].mxu1 %vm210_vm1, %v15390_v1  ;;  %v16305_v1 = vld [vmem:[%s18105_s0 + $0x321] sm:$0xff] }
 0x11a   :  { %13401 = vmatmul.mubr.msk.f32.vlgmr.msra.gmra.mrb[16].mxu0 %vm210_vm1, %v16182_v47  ;;  %13175 = vmatprep.mubr.msk.f32.mxu1 %vm210_vm1, %v15397_v63  ;;  %v16310_v63 = vld [vmem:[%s18105_s0 + $0x31] sm:$0xff] }
 0x11b   :  { %13403 = vmatprep.mubr.msk.f32.mxu0 %vm210_vm1, %v16187_v60  ;;  %13425 = vmatpush3.msk.msra.mxu0 %vm259_vm0, %v11508_v17  ;;  %v16454_v17 = vld [vmem:[%s18105_s0 + $0x101] sm:$0xff] }
 0x11c   :  { %13450 = vmatprep.subr.msk.mxu0 %vm259_vm0, %v16194_v40 }
 0x11d   :  { %13176 = vmatmul.mubr.msk.f32.gmra.mrb[22].mxu1 %vm210_vm1, %v18167_v62  ;;  %v16508_v62 = vld [vmem:[%s18105_s0 + $0x270] sm:$0xff] }
 0x11e   :  { %13404 = vmatmul.mubr.msk.f32.gmra.mrb[18].mxu0 %vm210_vm1, %v16205_v38  ;;  %13178 = vmatprep.mubr.msk.f32.mxu1 %vm210_vm1, %v15415_v28  ;;  %v16244_v28 = vld [vmem:[%s18105_s0 + $0x2b1] sm:$0xff] }
 0x11f   :  { %13406 = vmatprep.mubr.msk.f32.mxu0 %vm210_vm1, %v16211_v61 }
 0x121   :  { %13179 = vmatmul.mubr.msk.f32.gmra.mrb[24].mxu1 %vm210_vm1, %v15426_v30  ;;  %v16264_v30 = vld [vmem:[%s18105_s0 + $0x2f1] sm:$0xff] }
 0x122   :  { %13407 = vmatmul.mubr.msk.f32.gmra.mrb[20].mxu0 %vm210_vm1, %v16226_v0  ;;  %13181 = vmatprep.mubr.msk.f32.mxu1 %vm210_vm1, %v15436_v25  ;;  %v16259_v25 = vld [vmem:[%s18105_s0 + $0x2e1] sm:$0xff] }
 0x123   :  { %13409 = vmatprep.mubr.msk.f32.mxu0 %vm210_vm1, %v16231_v2 }
 0x125   :  { %13182 = vmatmul.mubr.msk.f32.gmra.mrb[26].mxu1 %vm210_vm1, %v15446_v37  ;;  %v16282_v37 = vld [vmem:[%s18105_s0 + $0x11] sm:$0xff] }
 0x126   :  { %13410 = vmatmul.mubr.msk.f32.gmra.mrb[22].mxu0 %vm210_vm1, %v16244_v28  ;;  %13184 = vmatprep.mubr.msk.f32.mxu1 %vm210_vm1, %v15453_v35  ;;  %v16277_v35 = vld [vmem:[%s18105_s0 + $0x301] sm:$0xff] }
 0x127   :  { %13412 = vmatprep.mubr.msk.f32.mxu0 %vm210_vm1, %v11466_v5  ;;  %v11506_v5 = vld [vmem:[%s18105_s0 + $0x451] sm:$0xff] }
 0x129   :  { %13185 = vmatmul.mubr.msk.f32.gmra.mrb[28].mxu1 %vm210_vm1, %v15467_v19  ;;  %v16315_v19 = vld [vmem:[%s18105_s0 + $0x331] sm:$0xff] }
 0x12a   :  { %13413 = vmatmul.mubr.msk.f32.gmra.mrb[24].mxu0 %vm210_vm1, %v16259_v25  ;;  %13187 = vmatprep.mubr.msk.f32.mxu1 %vm210_vm1, %v15474_v36  ;;  %v16298_v36 = vld [vmem:[%s18105_s0 + $0x21] sm:$0xff] }
 0x12b   :  { %13415 = vmatprep.mubr.msk.f32.mxu0 %vm210_vm1, %v16264_v30 }
 0x12d   :  { %13188 = vmatmul.mubr.msk.f32.gmra.mrb[30].mxu1 %vm210_vm1, %v18168_v11 }
 0x12e   :  { %13416 = vmatmul.mubr.msk.f32.gmra.mrb[26].mxu0 %vm210_vm1, %v16277_v35  ;;  %13192 = vmatprep.mubr.msk.f32.mxu1 %vm210_vm1, %v16282_v37 }
 0x12f   :  { %13418 = vmatprep.mubr.msk.f32.mxu0 %vm210_vm1, %v16287_v9 }
 0x131   :  { %13193 = vmatmul.mubr.msk.f32.vlgmr.msra.gmra.mrb[16].mxu1 %vm210_vm1, %v16298_v36 }
 0x132   :  { %13419 = vmatmul.mubr.msk.f32.gmra.mrb[28].mxu0 %vm210_vm1, %v16305_v1  ;;  %13217 = vmatpush3.msk.msra.mxu1 %vm259_vm0, %v11252_v56 }
 0x133   :  { %13195 = vmatprep.mubr.msk.f32.mxu1 %vm210_vm1, %v16310_v63  ;;  %13421 = vmatprep.mubr.msk.f32.mxu0 %vm210_vm1, %v16315_v19 }
 0x134   :  { %13242 = vmatprep.subr.msk.mxu1 %vm259_vm0, %v16322_v12 }
 0x135   :  { %13196 = vmatmul.mubr.msk.f32.gmra.mrb[18].mxu1 %vm210_vm1, %v16330_v24 }
 0x136   :  { %13422 = vmatmul.mubr.msk.f32.gmra.mrb[30].mxu0 %vm210_vm1, %v16339_v14  ;;  %13198 = vmatprep.mubr.msk.f32.mxu1 %vm210_vm1, %v16344_v16 }
 0x137   :  { %13426 = vmatprep.mubr.msk.f32.mxu0 %vm210_vm1, %v11492_v26 }
 0x138   :  { %v12908_v23 = vpop.f32.mrb[0].mxu1 }
 0x139   :  { %v970_v34 = vpop.f32.mrb[1].mxu1  ;;  %13199 = vmatmul.mubr.msk.f32.gmra.mrb[20].mxu1 %vm210_vm1, %v16360_v18 }
 0x13a   :  { %13427 = vmatmul.mubr.msk.f32.vlgmr.msra.gmra.mrb[16].mxu0 %vm210_vm1, %v11493_v21  ;;  %13201 = vmatprep.mubr.msk.f32.mxu1 %vm210_vm1, %v16369_v29  ;;  %v16519_v21 = vld [vmem:[%s18106_s1 + $0x20] sm:$0xf] }
 0x13b   :  { %13429 = vmatprep.mubr.msk.f32.mxu0 %vm210_vm1, %v11494_v31  ;;  %13451 = vmatpush3.msk.msra.mxu0 %vm259_vm0, %v16194_v40 }
 0x13c   :  { %v12911_v27 = vpop.f32.mrb[2].mxu1  ;;  %13476 = vmatprep.subr.msk.mxu0 %vm259_vm0, %v16379_v20 }
 0x13d   :  { %v980_v59 = vpop.f32.mrb[3].mxu1  ;;  %13202 = vmatmul.mubr.msk.f32.gmra.mrb[22].mxu1 %vm210_vm1, %v16387_v4 }
 0x13e   :  { %13430 = vmatmul.mubr.msk.f32.gmra.mrb[18].mxu0 %vm210_vm1, %v11495_v7  ;;  %13204 = vmatprep.mubr.msk.f32.mxu1 %vm210_vm1, %v16396_v32  ;;  %v16527_v7 = vld [vmem:[%s18105_s0 + $0x280] sm:$0xff] }
 0x13f   :  { %13432 = vmatprep.mubr.msk.f32.mxu0 %vm210_vm1, %v11496_v45 }
 0x140   :  { %v16419_v51 = vpop.f32.mrb[4].mxu1 }
 0x141   :  { %v16424_v49 = vpop.f32.mrb[5].mxu1  ;;  %13205 = vmatmul.mubr.msk.f32.gmra.mrb[24].mxu1 %vm210_vm1, %v16413_v44 }
 0x142   :  { %13433 = vmatmul.mubr.msk.f32.gmra.mrb[20].mxu0 %vm210_vm1, %v11497_v53  ;;  %13207 = vmatprep.mubr.msk.f32.mxu1 %vm210_vm1, %v15494_v33  ;;  %v11501_v33 = vld [vmem:[%s18105_s0 + $0x401] sm:$0xff] }
 0x143   :  { %13435 = vmatprep.mubr.msk.f32.mxu0 %vm210_vm1, %v11498_v57 }
 0x144   :  { %v16435_v8 = vpop.f32.mrb[6].mxu1 }
 0x145   :  { %v16440_v15 = vpop.f32.mrb[7].mxu1  ;;  %13208 = vmatmul.mubr.msk.f32.gmra.mrb[26].mxu1 %vm210_vm1, %v15505_v42  ;;  %v11502_v42 = vld [vmem:[%s18105_s0 + $0x411] sm:$0xff] }
 0x146   :  { %13436 = vmatmul.mubr.msk.f32.gmra.mrb[22].mxu0 %vm210_vm1, %v11499_v6  ;;  %13210 = vmatprep.mubr.msk.f32.mxu1 %vm210_vm1, %v15515_v55  ;;  %v16471_v55 = vld [vmem:[%s18105_s0 + $0x111] sm:$0xff] }
 0x147   :  { %13438 = vmatprep.mubr.msk.f32.mxu0 %vm210_vm1, %v11500_v10 }
 0x148   :  { %v16456_v22 = vpop.f32.mrb[8].mxu1 }
 0x149   :  { %v16461_v39 = vpop.f32.mrb[9].mxu1  ;;  %13211 = vmatmul.mubr.msk.f32.gmra.mrb[28].mxu1 %vm210_vm1, %v15527_v13  ;;  %v16480_v13 = vld [vmem:[%s18105_s0 + $0x250] sm:$0xff] }
 0x14a   :  { %13439 = vmatmul.mubr.msk.f32.gmra.mrb[24].mxu0 %vm210_vm1, %v11501_v33  ;;  %13213 = vmatprep.mubr.msk.f32.mxu1 %vm210_vm1, %v16454_v17 }
 0x14b   :  { %13441 = vmatprep.mubr.msk.f32.mxu0 %vm210_vm1, %v11502_v42 }
 0x14d   :  { %v13038_v46 = vpop.f32.mrb[0].mxu0  ;;  %13214 = vmatmul.mubr.msk.f32.gmra.mrb[30].mxu1 %vm210_vm1, %v16471_v55 }
 0x14e   :  { %v14008_v50 = vadd.f32 %v13038_v46, %v12908_v23  ;;  %v2123_v52 = vpop.f32.mrb[1].mxu0  ;;  %13442 = vmatmul.mubr.msk.f32.gmra.mrb[26].mxu0 %vm210_vm1, %v11503_v41  ;;  %13218 = vmatprep.mubr.msk.f32.mxu1 %vm210_vm1, %v16480_v13 }
 0x14f   :  { %v14009_v56 = vadd.f32 %v2123_v52, %v970_v34  ;;  %13444 = vmatprep.mubr.msk.f32.mxu0 %vm210_vm1, %v11504_v43  ;;  %v16560_v43 = vld [vmem:[%s18105_s0 + $0x2a0] sm:$0xff]  ;;  %v16573_v52 = vld [vmem:[%s18105_s0 + $0x2b0] sm:$0xff] }
 0x150   :  { %v2226_v40 = vadd.f32 %v14008_v50, %v16488_v48 }
 0x151   :  { %v2225_v11 = vadd.f32 %v14009_v56, %v16488_v48  ;;  %v13041_v26 = vpop.f32.mrb[2].mxu0  ;;  %13219 = vmatmul.mubr.msk.f32.vlgmr.msra.gmra.mrb[16].mxu1 %vm210_vm1, %v16498_v54 }
 0x152   :  { %v2242_v23 = vmax.f32 %v2226_v40, 0.0  ;;  %v14010_v31 = vadd.f32 %v13041_v26, %v12911_v27  ;;  %v2133_v34 = vpop.f32.mrb[3].mxu0  ;;  %13445 = vmatmul.mubr.msk.f32.gmra.mrb[28].mxu0 %vm210_vm1, %v11505_v58  ;;  %13243 = vmatpush3.msk.msra.mxu1 %vm259_vm0, %v16322_v12  ;;  %v11507_v27 = vld [vmem:[%s18105_s0 + $0x461] sm:$0xff]  ;;  %v16538_v12 = vld [vmem:[%s18105_s0 + $0x290] sm:$0xff] }
 0x153   :  { %v2241_v45 = vmax.f32 %v2225_v11, 0.0  ;;  %v14011_v53 = vadd.f32 %v2133_v34, %v980_v59  ;;  %13221 = vmatprep.mubr.msk.f32.mxu1 %vm210_vm1, %v16508_v62  ;;  %13447 = vmatprep.mubr.msk.f32.mxu0 %vm210_vm1, %v11506_v5  ;;  %v16545_v59 = vld [vmem:[%s18105_s0 + $0x130] sm:$0xff]  ;;  %v16589_v26 = vld [vmem:[%s18106_s1 + $0x20] sm:$0xf] }
 0x154   :  { %2259 = vst.msk [vmem:[#allocation2 + $0x21] sm:$0xff] %vm27_vm2, %v2242_v23  ;;  %v2228_v57 = vadd.f32 %v14010_v31, %v16488_v48  ;;  %13268 = vmatprep.subr.msk.mxu1 %vm259_vm0, %v16519_v21 }
 0x155   :  { %2258 = vst.msk [vmem:[#allocation2 + $0x11] sm:$0xff] %vm27_vm2, %v2241_v45  ;;  %v2227_v6 = vadd.f32 %v14011_v53, %v16488_v48  ;;  %v13044_v10 = vpop.f32.mrb[4].mxu0  ;;  %13222 = vmatmul.mubr.msk.f32.gmra.mrb[18].mxu1 %vm210_vm1, %v16527_v7  ;;  %v11243_v45 = vld [vmem:[%s18105_s0 + $0x2c0] sm:$0xff] }
 0x156   :  { %v2244_v33 = vmax.f32 %v2228_v57, 0.0  ;;  %v14012_v42 = vadd.f32 %v13044_v10, %v16419_v51  ;;  %v2143_v41 = vpop.f32.mrb[5].mxu0  ;;  %13448 = vmatmul.mubr.msk.f32.gmra.mrb[30].mxu0 %vm210_vm1, %v11507_v27  ;;  %13224 = vmatprep.mubr.msk.f32.mxu1 %vm210_vm1, %v16538_v12  ;;  %v16568_v51 = vld [vmem:[%s18105_s0 + $0x140] sm:$0xff]  ;;  %v16619_v10 = vld [vmem:[%s18105_s0 + $0x170] sm:$0xff] }
 0x157   :  { %v2243_v46 = vmax.f32 %v2227_v6, 0.0  ;;  %v14013_v50 = vadd.f32 %v2143_v41, %v16424_v49  ;;  %13452 = vmatprep.mubr.msk.f32.mxu0 %vm210_vm1, %v16545_v59  ;;  %v16580_v49 = vld [vmem:[%s18105_s0 + $0x150] sm:$0xff]  ;;  %v16610_v57 = vld [vmem:[%s18105_s0 + $0x2e0] sm:$0xff] }
 0x158   :  { %2261 = vst.msk [vmem:[#allocation2 + $0x41] sm:$0xff] %vm27_vm2, %v2244_v33  ;;  %v2230_v56 = vadd.f32 %v14012_v42, %v16488_v48  ;;  %v12949_v58 = vpop.f32.mrb[10].mxu1 }
 0x159   :  { %2260 = vst.msk [vmem:[#allocation2 + $0x31] sm:$0xff] %vm27_vm2, %v2243_v46  ;;  %v2229_v40 = vadd.f32 %v14013_v50, %v16488_v48  ;;  %v13047_v5 = vpop.f32.mrb[6].mxu0  ;;  %v1251_v11 = vpop.f32.mrb[11].mxu1  ;;  %13225 = vmatmul.mubr.msk.f32.gmra.mrb[20].mxu1 %vm210_vm1, %v16560_v43 }
 0x15a   :  { %v2246_v23 = vmax.f32 %v2230_v56, 0.0  ;;  %v14014_v31 = vadd.f32 %v13047_v5, %v16435_v8  ;;  %v2153_v34 = vpop.f32.mrb[7].mxu0  ;;  %13453 = vmatmul.mubr.msk.f32.vlgmr.msra.gmra.mrb[16].mxu0 %vm210_vm1, %v16568_v51  ;;  %13227 = vmatprep.mubr.msk.f32.mxu1 %vm210_vm1, %v16573_v52  ;;  %v16605_v8 = vld [vmem:[%s18105_s0 + $0x160] sm:$0xff]  ;;  %v16634_v56 = vld [vmem:[%s18105_s0 + $0x2f0] sm:$0xff] }
 0x15b   :  { %v2245_v53 = vmax.f32 %v2229_v40, 0.0  ;;  %v14015_v27 = vadd.f32 %v2153_v34, %v16440_v15  ;;  %13455 = vmatprep.mubr.msk.f32.mxu0 %vm210_vm1, %v16580_v49  ;;  %13477 = vmatpush3.msk.msra.mxu0 %vm259_vm0, %v16379_v20 }
 0x15c   :  { %2263 = vst.msk [vmem:[#allocation2 + $0x61] sm:$0xff] %vm27_vm2, %v2246_v23  ;;  %v2232_v15 = vadd.f32 %v14014_v31, %v16488_v48  ;;  %v12952_v6 = vpop.f32.mrb[12].mxu1  ;;  %13502 = vmatprep.subr.msk.mxu0 %vm259_vm0, %v16589_v26  ;;  %v16647_v23 = vld [vmem:[%s18105_s0 + $0x300] sm:$0xff] }
 0x15d   :  { %2262 = vst.msk [vmem:[#allocation2 + $0x51] sm:$0xff] %vm27_vm2, %v2245_v53  ;;  %v2231_v33 = vadd.f32 %v14015_v27, %v16488_v48  ;;  %v13050_v42 = vpop.f32.mrb[8].mxu0  ;;  %v1261_v41 = vpop.f32.mrb[13].mxu1  ;;  %13228 = vmatmul.mubr.msk.f32.gmra.mrb[22].mxu1 %vm210_vm1, %v11243_v45 }
 0x15e   :  { %v2248_v20 = vmax.f32 %v2232_v15, 0.0  ;;  %v14016_v46 = vadd.f32 %v13050_v42, %v16456_v22  ;;  %v2163_v50 = vpop.f32.mrb[9].mxu0  ;;  %13456 = vmatmul.mubr.msk.f32.gmra.mrb[18].mxu0 %vm210_vm1, %v16605_v8  ;;  %13230 = vmatprep.mubr.msk.f32.mxu1 %vm210_vm1, %v16610_v57  ;;  %v16642_v22 = vld [vmem:[%s18105_s0 + $0x180] sm:$0xff] }
 0x15f   :  { %v2247_v40 = vmax.f32 %v2231_v33, 0.0  ;;  %v14017_v5 = vadd.f32 %v2163_v50, %v16461_v39  ;;  %13458 = vmatprep.mubr.msk.f32.mxu0 %vm210_vm1, %v16619_v10  ;;  %v16654_v39 = vld [vmem:[%s18105_s0 + $0x190] sm:$0xff] }
 0x160   :  { %2265 = vst.msk [vmem:[#allocation2 + $0x81] sm:$0xff] %vm27_vm2, %v2248_v20  ;;  %v2234_v31 = vadd.f32 %v14016_v46, %v16488_v48  ;;  %v12955_v34 = vpop.f32.mrb[14].mxu1  ;;  %v16667_v20 = vld [vmem:[%s18105_s0 + $0x310] sm:$0xff] }
 0x161   :  { %2264 = vst.msk [vmem:[#allocation2 + $0x71] sm:$0xff] %vm27_vm2, %v2247_v40  ;;  %v2233_v45 = vadd.f32 %v14017_v5, %v16488_v48  ;;  %v13053_v53 = vpop.f32.mrb[10].mxu0  ;;  %v1271_v27 = vpop.f32.mrb[15].mxu1  ;;  %13231 = vmatmul.mubr.msk.f32.gmra.mrb[24].mxu1 %vm210_vm1, %v16634_v56  ;;  %v16677_v40 = vld [vmem:[%s18105_s0 + $0x320] sm:$0xff] }
 0x162   :  { %v2250_v15 = vmax.f32 %v2234_v31, 0.0  ;;  %v14018_v33 = vadd.f32 %v13053_v53, %v12949_v58  ;;  %v2173_v42 = vpop.f32.mrb[11].mxu0  ;;  %13459 = vmatmul.mubr.msk.f32.gmra.mrb[20].mxu0 %vm210_vm1, %v16642_v22  ;;  %13233 = vmatprep.mubr.msk.f32.mxu1 %vm210_vm1, %v16647_v23  ;;  %v11533_v58 = vld [vmem:[%s18105_s0 + $0x1a0] sm:$0xff]  ;;  %18169 = vst [vmem:[#allocation11_spill] sm:$0xff] %v16677_v40 }
 0x163   :  { %v2249_v46 = vmax.f32 %v2233_v45, 0.0  ;;  %v14019_v50 = vadd.f32 %v2173_v42, %v1251_v11  ;;  %13461 = vmatprep.mubr.msk.f32.mxu0 %vm210_vm1, %v16654_v39  ;;  %v16684_v11 = vld [vmem:[%s18105_s0 + $0x1c0] sm:$0xff] }
 0x164   :  { %2267 = vst.msk [vmem:[#allocation2 + $0xb1] sm:$0xff] %vm27_vm2, %v2250_v15  ;;  %v2236_v5 = vadd.f32 %v14018_v33, %v16488_v48  ;;  %v16696_v15 = vld [vmem:[%s18105_s0 + $0x330] sm:$0xff] }
 0x165   :  { %2266 = vst.msk [vmem:[#allocation2 + $0xa1] sm:$0xff] %vm27_vm2, %v2249_v46  ;;  %v2235_v31 = vadd.f32 %v14019_v50, %v16488_v48  ;;  %v13056_v45 = vpop.f32.mrb[12].mxu0  ;;  %13234 = vmatmul.mubr.msk.f32.gmra.mrb[26].mxu1 %vm210_vm1, %v16667_v20  ;;  %v16708_v50 = vld [vmem:[%s18105_s0 + $0x340] sm:$0xff] }
 0x166   :  { %v2252_v53 = vmax.f32 %v2236_v5, 0.0  ;;  %v14020_v42 = vadd.f32 %v13056_v45, %v12952_v6  ;;  %v2183_v3 = vpop.f32.mrb[13].mxu0  ;;  %13462 = vmatmul.mubr.msk.f32.gmra.mrb[22].mxu0 %vm210_vm1, %v11533_v58  ;;  %13236 = vmatprep.mubr.msk.f32.mxu1 %vm210_vm1, %v16677_v40  ;;  %v16703_v6 = vld [vmem:[%s18105_s0 + $0x1d0] sm:$0xff] }
 0x167   :  { %v2251_v33 = vmax.f32 %v2235_v31, 0.0  ;;  %v14021_v46 = vadd.f32 %v2183_v3, %v1261_v41  ;;  %13464 = vmatprep.mubr.msk.f32.mxu0 %vm210_vm1, %v16684_v11  ;;  %v16715_v3 = vld [vmem:[%s18105_s0 + $0x1e0] sm:$0xff] }
 0x168   :  { %2269 = vst.msk [vmem:[#allocation2 + $0xd1] sm:$0xff] %vm27_vm2, %v2252_v53  ;;  %v2238_v58 = vadd.f32 %v14020_v42, %v16488_v48  ;;  %v11251_v53 = vld [vmem:[%s18105_s0 + $0x350] sm:$0xff] }
 0x169   :  { %2268 = vst.msk [vmem:[#allocation2 + $0xc1] sm:$0xff] %vm27_vm2, %v2251_v33  ;;  %v2237_v41 = vadd.f32 %v14021_v46, %v16488_v48  ;;  %v13059_v5 = vpop.f32.mrb[14].mxu0  ;;  %13237 = vmatmul.mubr.msk.f32.gmra.mrb[28].mxu1 %vm210_vm1, %v16696_v15  ;;  %v16738_v46 = vld [vmem:[%s18105_s0 + $0x370] sm:$0xff] }
 0x16a   :  { %v2254_v31 = vmax.f32 %v2238_v58, 0.0  ;;  %v14022_v45 = vadd.f32 %v13059_v5, %v12955_v34  ;;  %v2193_v40 = vpop.f32.mrb[15].mxu0  ;;  %13465 = vmatmul.mubr.msk.f32.gmra.mrb[24].mxu0 %vm210_vm1, %v16703_v6  ;;  %13239 = vmatprep.mubr.msk.f32.mxu1 %vm210_vm1, %v16708_v50  ;;  %v16733_v34 = vld [vmem:[%s18105_s0 + $0x1f0] sm:$0xff]  ;;  %v16757_v5 = vld [vmem:[%s18105_s0 + $0x380] sm:$0xff] }
 0x16b   :  { %v2253_v42 = vmax.f32 %v2237_v41, 0.0  ;;  %v14023_v33 = vadd.f32 %v2193_v40, %v1271_v27  ;;  %13467 = vmatprep.mubr.msk.f32.mxu0 %vm210_vm1, %v16715_v3  ;;  %v16745_v27 = vld [vmem:[%s18105_s0 + $0x200] sm:$0xff] }
 0x16c   :  { %2271 = vst.msk [vmem:[#allocation2 + $0xf1] sm:$0xff] %vm27_vm2, %v2254_v31  ;;  %v2240_v58 = vadd.f32 %v14022_v45, %v16488_v48  ;;  %v16770_v45 = vld [vmem:[%s18105_s0 + $0x390] sm:$0xff] }
 0x16d   :  { %2270 = vst.msk [vmem:[#allocation2 + $0xe1] sm:$0xff] %vm27_vm2, %v2253_v42  ;;  %v2239_v40 = vadd.f32 %v14023_v33, %v16488_v48  ;;  %13240 = vmatmul.mubr.msk.f32.gmra.mrb[30].mxu1 %vm210_vm1, %v11251_v53  ;;  %v16764_v48 = vld [vmem:[%s18105_s0 + $0x210] sm:$0xff]  ;;  %v16775_v53 = vld [vmem:[%s18105_s0 + $0x220] sm:$0xff] }
 0x16e   :  { %v2256_v41 = vmax.f32 %v2240_v58, 0.0  ;;  %13468 = vmatmul.mubr.msk.f32.gmra.mrb[26].mxu0 %vm210_vm1, %v16733_v34  ;;  %13244 = vmatprep.mubr.msk.f32.mxu1 %vm210_vm1, %v16738_v46  ;;  %v11645_v42 = vld [vmem:[%s18106_s1 + $0x4] sm:$0xf]  ;;  %v11541_v58 = vld [vmem:[%s18105_s0 + $0x230] sm:$0xff] }
 0x16f   :  { %v2255_v31 = vmax.f32 %v2239_v40, 0.0  ;;  %13470 = vmatprep.mubr.msk.f32.mxu0 %vm210_vm1, %v16745_v27  ;;  %v16790_v33 = vld [vmem:[%s18105_s0 + $0x3a0] sm:$0xff]  ;;  %v16802_v40 = vld [vmem:[%s18105_s0 + $0x3b0] sm:$0xff] }
 0x170   :  { %2273 = vst.msk [vmem:[#allocation2 + $0x111] sm:$0xff] %vm27_vm2, %v2256_v41  ;;  %v16820_v41 = vld [vmem:[%s18105_s0 + $0x3d0] sm:$0xff] }
 0x171   :  { %2272 = vst.msk [vmem:[#allocation2 + $0x101] sm:$0xff] %vm27_vm2, %v2255_v31  ;;  %13245 = vmatmul.mubr.msk.f32.vlgmr.msra.gmra.mrb[16].mxu1 %vm210_vm1, %v16757_v5  ;;  %v11277_v31 = vld [vmem:[%s18105_s0 + $0x3e0] sm:$0xff] }
 0x172   :  { %13471 = vmatmul.mubr.msk.f32.gmra.mrb[28].mxu0 %vm210_vm1, %v16764_v48  ;;  %13269 = vmatpush3.msk.msra.mxu1 %vm259_vm0, %v16519_v21  ;;  %v16813_v21 = vld [vmem:[%s18105_s0 + $0x3c0] sm:$0xff] }
 0x173   :  { %13247 = vmatprep.mubr.msk.f32.mxu1 %vm210_vm1, %v16770_v45  ;;  %13473 = vmatprep.mubr.msk.f32.mxu0 %vm210_vm1, %v16775_v53 }
 0x174   :  { %13528 = vmatprep.subr.msk.mxu1 %vm259_vm0, %v11645_v42 }
 0x175   :  { %13248 = vmatmul.mubr.msk.f32.gmra.mrb[18].mxu1 %vm210_vm1, %v16790_v33 }
 0x176   :  { %13474 = vmatmul.mubr.msk.f32.gmra.mrb[30].mxu0 %vm210_vm1, %v11541_v58  ;;  %13250 = vmatprep.mubr.msk.f32.mxu1 %vm210_vm1, %v16802_v40  ;;  %v16917_v58 = vld [vmem:[%s18105_s0 + $0xe1] sm:$0xff] }
 0x177   :  { %13478 = vmatprep.mubr.msk.f32.mxu0 %vm210_vm1, %v16282_v37  ;;  %v16836_v37 = vld [vmem:[%s18105_s0 + $0x400] sm:$0xff] }
 0x179   :  { %13251 = vmatmul.mubr.msk.f32.gmra.mrb[20].mxu1 %vm210_vm1, %v16813_v21 }
 0x17a   :  { %13479 = vmatmul.mubr.msk.f32.vlgmr.msra.gmra.mrb[16].mxu0 %vm210_vm1, %v16298_v36  ;;  %13253 = vmatprep.mubr.msk.f32.mxu1 %vm210_vm1, %v16820_v41  ;;  %v16848_v36 = vld [vmem:[%s18105_s0 + $0x410] sm:$0xff] }
 0x17b   :  { %13481 = vmatprep.mubr.msk.f32.mxu0 %vm210_vm1, %v16310_v63  ;;  %13503 = vmatpush3.msk.msra.mxu0 %vm259_vm0, %v16589_v26  ;;  %v16855_v63 = vld [vmem:[%s18105_s0 + $0x420] sm:$0xff]  ;;  %v16912_v26 = vld [vmem:[%s18105_s0 + $0xd1] sm:$0xff] }
 0x17d   :  { %13254 = vmatmul.mubr.msk.f32.gmra.mrb[22].mxu1 %vm210_vm1, %v11277_v31  ;;  %v6461_v31 = vld [vmem:[%s18106_s1] sm:$0xf] }
 0x17e   :  { %13482 = vmatmul.mubr.msk.f32.gmra.mrb[18].mxu0 %vm210_vm1, %v16330_v24  ;;  %13256 = vmatprep.mubr.msk.f32.mxu1 %vm210_vm1, %v16836_v37  ;;  %v16866_v24 = vld [vmem:[%s18105_s0 + $0x430] sm:$0xff] }
 0x17f   :  { %13484 = vmatprep.mubr.msk.f32.mxu0 %vm210_vm1, %v16344_v16  ;;  %v16873_v16 = vld [vmem:[%s18105_s0 + $0x440] sm:$0xff] }
 0x181   :  { %13257 = vmatmul.mubr.msk.f32.gmra.mrb[24].mxu1 %vm210_vm1, %v16848_v36 }
 0x182   :  { %13485 = vmatmul.mubr.msk.f32.gmra.mrb[20].mxu0 %vm210_vm1, %v16360_v18  ;;  %13259 = vmatprep.mubr.msk.f32.mxu1 %vm210_vm1, %v16855_v63  ;;  %v16884_v18 = vld [vmem:[%s18105_s0 + $0x450] sm:$0xff] }
 0x183   :  { %13487 = vmatprep.mubr.msk.f32.mxu0 %vm210_vm1, %v16369_v29  ;;  %v16891_v29 = vld [vmem:[%s18105_s0 + $0x460] sm:$0xff] }
 0x185   :  { %13260 = vmatmul.mubr.msk.f32.gmra.mrb[26].mxu1 %vm210_vm1, %v16866_v24 }
 0x186   :  { %13488 = vmatmul.mubr.msk.f32.gmra.mrb[22].mxu0 %vm210_vm1, %v16387_v4  ;;  %13262 = vmatprep.mubr.msk.f32.mxu1 %vm210_vm1, %v16873_v16  ;;  %v16896_v4 = vld [vmem:[%s18105_s0 + $0xc1] sm:$0xff] }
 0x187   :  { %13490 = vmatprep.mubr.msk.f32.mxu0 %vm210_vm1, %v16396_v32  ;;  %v11285_v32 = vld [vmem:[%s18105_s0 + $0x470] sm:$0xff] }
 0x189   :  { %13263 = vmatmul.mubr.msk.f32.gmra.mrb[28].mxu1 %vm210_vm1, %v16884_v18 }
 0x18a   :  { %13491 = vmatmul.mubr.msk.f32.gmra.mrb[24].mxu0 %vm210_vm1, %v16413_v44  ;;  %13265 = vmatprep.mubr.msk.f32.mxu1 %vm210_vm1, %v16891_v29  ;;  %v16929_v44 = vld [vmem:[%s18105_s0 + $0xf1] sm:$0xff] }
 0x18b   :  { %13493 = vmatprep.mubr.msk.f32.mxu0 %vm210_vm1, %v16896_v4 }
 0x18d   :  { %13266 = vmatmul.mubr.msk.f32.gmra.mrb[30].mxu1 %vm210_vm1, %v11285_v32  ;;  %v11629_v32 = vld [vmem:[%s18105_s0 + $0x120] sm:$0xff] }
 0x18e   :  { %13494 = vmatmul.mubr.msk.f32.gmra.mrb[26].mxu0 %vm210_vm1, %v16912_v26  ;;  %13270 = vmatprep.mubr.msk.f32.mxu1 %vm210_vm1, %v16182_v47  ;;  %v11594_v47 = vld [vmem:[%s18105_s0 + $0x131] sm:$0xff] }
 0x18f   :  { %13496 = vmatprep.mubr.msk.f32.mxu0 %vm210_vm1, %v16917_v58 }
 0x191   :  { %13271 = vmatmul.mubr.msk.f32.vlgmr.msra.gmra.mrb[16].mxu1 %vm210_vm1, %v16187_v60  ;;  %v11595_v60 = vld [vmem:[%s18105_s0 + $0x141] sm:$0xff] }
 0x192   :  { %13497 = vmatmul.mubr.msk.f32.gmra.mrb[28].mxu0 %vm210_vm1, %v16929_v44  ;;  %13529 = vmatpush3.msk.msra.mxu1 %vm259_vm0, %v11645_v42  ;;  %v11602_v42 = vld [vmem:[%s18105_s0 + $0x1c1] sm:$0xff] }
 0x193   :  { %13273 = vmatprep.mubr.msk.f32.mxu1 %vm210_vm1, %v16205_v38  ;;  %13499 = vmatprep.mubr.msk.f32.mxu0 %vm210_vm1, %v16454_v17  ;;  %v11596_v38 = vld [vmem:[%s18105_s0 + $0x151] sm:$0xff] }
 0x194   :  { %13554 = vmatprep.subr.msk.mxu1 %vm259_vm0, %v6461_v31 }
 0x195   :  { %13274 = vmatmul.mubr.msk.f32.gmra.mrb[18].mxu1 %vm210_vm1, %v16211_v61  ;;  %v11311_v61 = vld [vmem:[%s18105_s0 + $0x2c1] sm:$0xff] }
 0x196   :  { %13500 = vmatmul.mubr.msk.f32.gmra.mrb[30].mxu0 %vm210_vm1, %v16471_v55  ;;  %13276 = vmatprep.mubr.msk.f32.mxu1 %vm210_vm1, %v16226_v0  ;;  %v11597_v0 = vld [vmem:[%s18105_s0 + $0x161] sm:$0xff]  ;;  %v11598_v55 = vld [vmem:[%s18105_s0 + $0x171] sm:$0xff] }
 0x197   :  { %13504 = vmatprep.mubr.msk.f32.mxu0 %vm210_vm1, %v11594_v47  ;;  %v11608_v47 = vld [vmem:[%s18105_s0 + $0x221] sm:$0xff] }
 0x199   :  { %13277 = vmatmul.mubr.msk.f32.gmra.mrb[20].mxu1 %vm210_vm1, %v16231_v2  ;;  %v11599_v2 = vld [vmem:[%s18105_s0 + $0x181] sm:$0xff] }
 0x19a   :  { %13505 = vmatmul.mubr.msk.f32.vlgmr.msra.gmra.mrb[16].mxu0 %vm210_vm1, %v11595_v60  ;;  %13279 = vmatprep.mubr.msk.f32.mxu1 %vm210_vm1, %v16244_v28  ;;  %v11600_v28 = vld [vmem:[%s18105_s0 + $0x191] sm:$0xff]  ;;  %v11680_v60 = vld [vmem:[%s18106_s1 + $0x8] sm:$0xf] }
 0x19b   :  { %13507 = vmatprep.mubr.msk.f32.mxu0 %vm210_vm1, %v11596_v38  ;;  %v11609_v38 = vld [vmem:[%s18105_s0 + $0x231] sm:$0xff] }
 0x19d   :  { %13280 = vmatmul.mubr.msk.f32.gmra.mrb[22].mxu1 %vm210_vm1, %v11311_v61  ;;  %v17174_v61 = vld [vmem:[%s18105_s0 + $0xe0] sm:$0xff] }
 0x19e   :  { %13508 = vmatmul.mubr.msk.f32.gmra.mrb[18].mxu0 %vm210_vm1, %v11597_v0  ;;  %13282 = vmatprep.mubr.msk.f32.mxu1 %vm210_vm1, %v16259_v25  ;;  %v11601_v25 = vld [vmem:[%s18105_s0 + $0x1a1] sm:$0xff]  ;;  %v17179_v0 = vld [vmem:[%s18105_s0 + $0xf0] sm:$0xff] }
 0x19f   :  { %13510 = vmatprep.mubr.msk.f32.mxu0 %vm210_vm1, %v11598_v55  ;;  %v17188_v55 = vld [vmem:[%s18105_s0 + $0x100] sm:$0xff] }
 0x1a1   :  { %13283 = vmatmul.mubr.msk.f32.gmra.mrb[24].mxu1 %vm210_vm1, %v16264_v30  ;;  %v11603_v30 = vld [vmem:[%s18105_s0 + $0x1d1] sm:$0xff] }
 0x1a2   :  { %13511 = vmatmul.mubr.msk.f32.gmra.mrb[20].mxu0 %vm210_vm1, %v11599_v2  ;;  %13285 = vmatprep.mubr.msk.f32.mxu1 %vm210_vm1, %v16277_v35  ;;  %v11604_v35 = vld [vmem:[%s18105_s0 + $0x1e1] sm:$0xff] }
 0x1a3   :  { %13513 = vmatprep.mubr.msk.f32.mxu0 %vm210_vm1, %v11600_v28  ;;  %v6871_v2 = vld [vmem:[%s18105_s0 + $0x1] sm:$0xff]  ;;  %v17199_v28 = vld [vmem:[%s18105_s0 + $0x11] sm:$0xff] }
 0x1a5   :  { %13286 = vmatmul.mubr.msk.f32.gmra.mrb[26].mxu1 %vm210_vm1, %v16287_v9  ;;  %v11319_v9 = vld [vmem:[%s18105_s0 + $0x351] sm:$0xff] }
 0x1a6   :  { %13514 = vmatmul.mubr.msk.f32.gmra.mrb[22].mxu0 %vm210_vm1, %v11601_v25  ;;  %13288 = vmatprep.mubr.msk.f32.mxu1 %vm210_vm1, %v16305_v1  ;;  %v11605_v1 = vld [vmem:[%s18105_s0 + $0x1f1] sm:$0xff]  ;;  %v17204_v25 = vld [vmem:[%s18105_s0 + $0x21] sm:$0xff] }
 0x1a7   :  { %13516 = vmatprep.mubr.msk.f32.mxu0 %vm210_vm1, %v11602_v42  ;;  %v11748_v42 = vld [vmem:[%s18106_s1 + $0x10] sm:$0xf] }
 0x1a9   :  { %13289 = vmatmul.mubr.msk.f32.gmra.mrb[28].mxu1 %vm210_vm1, %v16315_v19  ;;  %v11606_v19 = vld [vmem:[%s18105_s0 + $0x201] sm:$0xff] }
 0x1aa   :  { %13517 = vmatmul.mubr.msk.f32.gmra.mrb[24].mxu0 %vm210_vm1, %v11603_v30  ;;  %13291 = vmatprep.mubr.msk.f32.mxu1 %vm210_vm1, %v16339_v14  ;;  %v11607_v14 = vld [vmem:[%s18105_s0 + $0x211] sm:$0xff]  ;;  %v11903_v30 = vld [vmem:[%s18108_s3 + $0x8] sm:$0xff] }
 0x1ab   :  { %13519 = vmatprep.mubr.msk.f32.mxu0 %vm210_vm1, %v11604_v35  ;;  %13762 = vmatprep.subr.mxu0 %v11903_v30  ;;  %v8548_v35 = vld [vmem:[#allocation2 + $0x120] sm:$0xff] }
 0x1ac   :  { %13763 = vmatpush3.msra.mxu0 %v11903_v30 }
 0x1ad   :  { %13292 = vmatmul.mubr.msk.f32.gmra.mrb[30].mxu1 %vm210_vm1, %v11319_v9  ;;  %v17220_v9 = vld [vmem:[%s18105_s0 + $0x31] sm:$0xff] }
 0x1ae   :  { %13520 = vmatmul.mubr.msk.f32.gmra.mrb[26].mxu0 %vm210_vm1, %v11605_v1  ;;  %13530 = vmatprep.mubr.msk.f32.mxu1 %vm210_vm1, %v11629_v32  ;;  %v17225_v1 = vld [vmem:[%s18105_s0 + $0x41] sm:$0xff]  ;;  %v17236_v32 = vld [vmem:[%s18105_s0 + $0x51] sm:$0xff] }
 0x1af   :  { %13522 = vmatprep.mubr.msk.f32.mxu0 %vm210_vm1, %v11606_v19  ;;  %v17241_v19 = vld [vmem:[%s18105_s0 + $0x61] sm:$0xff] }
 0x1b1   :  { %13531 = vmatmul.mubr.msk.f32.vlgmr.msra.gmra.mrb[32].mxu1 %vm210_vm1, %v16545_v59  ;;  %v11637_v59 = vld [vmem:[%s18105_s0 + $0x1b0] sm:$0xff] }
 0x1b2   :  { %13523 = vmatmul.mubr.msk.f32.gmra.mrb[28].mxu0 %vm210_vm1, %v11607_v14  ;;  %13555 = vmatpush3.msk.msra.mxu1 %vm259_vm0, %v6461_v31  ;;  %v17165_v31 = vld [vmem:[%s18105_s0 + $0xd0] sm:$0xff] }
 0x1b3   :  { %13525 = vmatprep.mubr.msk.f32.mxu0 %vm210_vm1, %v11608_v47  ;;  %13533 = vmatprep.mubr.msk.f32.mxu1 %vm210_vm1, %v16568_v51  ;;  %v6445_v51 = vld [vmem:[%s18105_s0] sm:$0xff]  ;;  %v17250_v14 = vld [vmem:[%s18105_s0 + $0x71] sm:$0xff] }
 0x1b4   :  { %13580 = vmatprep.subr.msk.mxu1 %vm259_vm0, %v11680_v60  ;;  %v6879_v47 = vld [vmem:[%s18105_s0 + $0x91] sm:$0xff] }
 0x1b5   :  { %13534 = vmatmul.mubr.msk.f32.gmra.mrb[34].mxu1 %vm210_vm1, %v16580_v49  ;;  %v17088_v49 = vld [vmem:[%s18105_s0 + $0x10] sm:$0xff] }
 0x1b6   :  { %13526 = vmatmul.mubr.msk.f32.gmra.mrb[30].mxu0 %vm210_vm1, %v11609_v38  ;;  %13536 = vmatprep.mubr.msk.f32.mxu1 %vm210_vm1, %v16605_v8  ;;  %v17093_v8 = vld [vmem:[%s18105_s0 + $0x20] sm:$0xff]  ;;  %v17266_v38 = vld [vmem:[%s18105_s0 + $0xb1] sm:$0xff] }
 0x1b7   :  { %13764 = vmatprep.mubr.msk.f32.mxu0 %vm27_vm2, %v8548_v35 }
 0x1b9   :  { %13537 = vmatmul.mubr.msk.f32.gmra.mrb[36].mxu1 %vm210_vm1, %v16619_v10  ;;  %v11714_v10 = vld [vmem:[%s18106_s1 + $0xc] sm:$0xf] }
 0x1ba   :  { %13539 = vmatprep.mubr.msk.f32.mxu1 %vm210_vm1, %v16642_v22  ;;  %v17106_v22 = vld [vmem:[%s18105_s0 + $0x30] sm:$0xff] }
 0x1bd   :  { %13540 = vmatmul.mubr.msk.f32.gmra.mrb[38].mxu1 %vm210_vm1, %v16654_v39  ;;  %v17111_v39 = vld [vmem:[%s18105_s0 + $0x40] sm:$0xff] }
 0x1be   :  { %13542 = vmatprep.mubr.msk.f32.mxu1 %vm210_vm1, %v11637_v59  ;;  %v11698_v59 = vld [vmem:[%s18105_s0 + $0x240] sm:$0xff] }
 0x1c1   :  { %13543 = vmatmul.mubr.msk.f32.gmra.mrb[40].mxu1 %vm210_vm1, %v16684_v11  ;;  %v17121_v11 = vld [vmem:[%s18105_s0 + $0x50] sm:$0xff] }
 0x1c2   :  { %13545 = vmatprep.mubr.msk.f32.mxu1 %vm210_vm1, %v16703_v6  ;;  %v17126_v6 = vld [vmem:[%s18105_s0 + $0x60] sm:$0xff] }
 0x1c5   :  { %13546 = vmatmul.mubr.msk.f32.gmra.mrb[42].mxu1 %vm210_vm1, %v16715_v3  ;;  %v17135_v3 = vld [vmem:[%s18105_s0 + $0x70] sm:$0xff] }
 0x1c6   :  { %13548 = vmatprep.mubr.msk.f32.mxu1 %vm210_vm1, %v16733_v34  ;;  %v6453_v34 = vld [vmem:[%s18105_s0 + $0x90] sm:$0xff] }
 0x1c9   :  { %13549 = vmatmul.mubr.msk.f32.gmra.mrb[44].mxu1 %vm210_vm1, %v16745_v27  ;;  %v17146_v27 = vld [vmem:[%s18105_s0 + $0xa0] sm:$0xff] }
 0x1ca   :  { %13551 = vmatprep.mubr.msk.f32.mxu1 %vm210_vm1, %v16764_v48  ;;  %v17151_v48 = vld [vmem:[%s18105_s0 + $0xb0] sm:$0xff] }
 0x1cd   :  { %13552 = vmatmul.mubr.msk.f32.gmra.mrb[46].mxu1 %vm210_vm1, %v16775_v53  ;;  %v17160_v53 = vld [vmem:[%s18105_s0 + $0xc0] sm:$0xff] }
 0x1ce   :  { %13556 = vmatprep.mubr.msk.f32.mxu1 %vm210_vm1, %v6445_v51 }
 0x1d1   :  { %13557 = vmatmul.mubr.msk.f32.vlgmr.msra.gmra.mrb[32].mxu1 %vm210_vm1, %v17088_v49 }
 0x1d2   :  { %13581 = vmatpush3.msk.msra.mxu1 %vm259_vm0, %v11680_v60  ;;  %13559 = vmatprep.mubr.msk.f32.mxu1 %vm210_vm1, %v17093_v8  ;;  %v17261_v60 = vld [vmem:[%s18105_s0 + $0xa1] sm:$0xff] }
 0x1d3   :  { %13606 = vmatprep.subr.msk.mxu1 %vm259_vm0, %v11714_v10 }
 0x1d5   :  { %13560 = vmatmul.mubr.msk.f32.gmra.mrb[34].mxu1 %vm210_vm1, %v17106_v22 }
 0x1d6   :  { %13562 = vmatprep.mubr.msk.f32.mxu1 %vm210_vm1, %v17111_v39 }
 0x1d9   :  { %13563 = vmatmul.mubr.msk.f32.gmra.mrb[36].mxu1 %vm210_vm1, %v17121_v11 }
 0x1da   :  { %13565 = vmatprep.mubr.msk.f32.mxu1 %vm210_vm1, %v17126_v6 }
 0x1dd   :  { %13566 = vmatmul.mubr.msk.f32.gmra.mrb[38].mxu1 %vm210_vm1, %v17135_v3 }
 0x1de   :  { %13568 = vmatprep.mubr.msk.f32.mxu1 %vm210_vm1, %v6453_v34  ;;  %v11781_v34 = vld [vmem:[%s18105_s0 + $0x341] sm:$0xff] }
 0x1e1   :  { %13569 = vmatmul.mubr.msk.f32.gmra.mrb[40].mxu1 %vm210_vm1, %v17146_v27 }
 0x1e2   :  { %13571 = vmatprep.mubr.msk.f32.mxu1 %vm210_vm1, %v17151_v48 }
 0x1e5   :  { %13572 = vmatmul.mubr.msk.f32.gmra.mrb[42].mxu1 %vm210_vm1, %v17160_v53 }
 0x1e6   :  { %13574 = vmatprep.mubr.msk.f32.mxu1 %vm210_vm1, %v17165_v31 }
 0x1e9   :  { %13575 = vmatmul.mubr.msk.f32.gmra.mrb[44].mxu1 %vm210_vm1, %v17174_v61 }
 0x1ea   :  { %13577 = vmatprep.mubr.msk.f32.mxu1 %vm210_vm1, %v17179_v0 }
 0x1ed   :  { %13578 = vmatmul.mubr.msk.f32.gmra.mrb[46].mxu1 %vm210_vm1, %v17188_v55 }
 0x1ee   :  { %13582 = vmatprep.mubr.msk.f32.mxu1 %vm210_vm1, %v6871_v2 }
 0x1f1   :  { %13583 = vmatmul.mubr.msk.f32.vlgmr.msra.gmra.mrb[32].mxu1 %vm210_vm1, %v17199_v28 }
 0x1f2   :  { %13607 = vmatpush3.msk.msra.mxu1 %vm259_vm0, %v11714_v10  ;;  %13585 = vmatprep.mubr.msk.f32.mxu1 %vm210_vm1, %v17204_v25 }
 0x1f3   :  { %13632 = vmatprep.subr.msk.mxu1 %vm259_vm0, %v11748_v42 }
 0x1f5   :  { %13586 = vmatmul.mubr.msk.f32.gmra.mrb[34].mxu1 %vm210_vm1, %v17220_v9 }
 0x1f6   :  { %13588 = vmatprep.mubr.msk.f32.mxu1 %vm210_vm1, %v17225_v1 }
 0x1f9   :  { %13589 = vmatmul.mubr.msk.f32.gmra.mrb[36].mxu1 %vm210_vm1, %v17236_v32 }
 0x1fa   :  { %13591 = vmatprep.mubr.msk.f32.mxu1 %vm210_vm1, %v17241_v19 }
 0x1fd   :  { %13592 = vmatmul.mubr.msk.f32.gmra.mrb[38].mxu1 %vm210_vm1, %v17250_v14 }
 0x1fe   :  { %13594 = vmatprep.mubr.msk.f32.mxu1 %vm210_vm1, %v6879_v47 }
 0x201   :  { %13595 = vmatmul.mubr.msk.f32.gmra.mrb[40].mxu1 %vm210_vm1, %v17261_v60 }
 0x202   :  { %13597 = vmatprep.mubr.msk.f32.mxu1 %vm210_vm1, %v17266_v38 }
 0x205   :  { %13598 = vmatmul.mubr.msk.f32.gmra.mrb[42].mxu1 %vm210_vm1, %v16896_v4  ;;  %v17289_v4 = vld [vmem:[%s18108_s3] sm:$0xff] }
 0x206   :  { %13600 = vmatprep.mubr.msk.f32.mxu1 %vm210_vm1, %v16912_v26  ;;  %v11782_v26 = vld [vmem:[%s18106_s1 + $0x14] sm:$0xf]  ;;  %13788 = vmatprep.subr.mxu0 %v17289_v4 }
 0x209   :  { %13601 = vmatmul.mubr.msk.f32.gmra.mrb[44].mxu1 %vm210_vm1, %v16917_v58 }
 0x20a   :  { %13603 = vmatprep.mubr.msk.f32.mxu1 %vm210_vm1, %v16929_v44 }
 0x20d   :  { %13604 = vmatmul.mubr.msk.f32.gmra.mrb[46].mxu1 %vm210_vm1, %v16454_v17  ;;  %v11706_v17 = vld [vmem:[%s18105_s0 + $0x2d0] sm:$0xff] }
 0x20e   :  { %13608 = vmatprep.mubr.msk.f32.mxu1 %vm210_vm1, %v11698_v59 }
 0x211   :  { %13609 = vmatmul.mubr.msk.f32.vlgmr.msra.gmra.mrb[32].mxu1 %vm210_vm1, %v16480_v13  ;;  %v18170_v13 = vld [vmem:[#allocation11_spill] sm:$0xff] }
 0x212   :  { %13633 = vmatpush3.msk.msra.mxu1 %vm259_vm0, %v11748_v42  ;;  %13611 = vmatprep.mubr.msk.f32.mxu1 %vm210_vm1, %v16498_v54  ;;  %v11732_v54 = vld [vmem:[%s18105_s0 + $0x360] sm:$0xff] }
 0x213   :  { %13658 = vmatprep.subr.msk.mxu1 %vm259_vm0, %v11782_v26 }
 0x215   :  { %13612 = vmatmul.mubr.msk.f32.gmra.mrb[34].mxu1 %vm210_vm1, %v16508_v62  ;;  %v11816_v62 = vld [vmem:[%s18106_s1 + $0x18] sm:$0xf] }
 0x216   :  { %13614 = vmatprep.mubr.msk.f32.mxu1 %vm210_vm1, %v16527_v7  ;;  %v11740_v7 = vld [vmem:[%s18105_s0 + $0x3f0] sm:$0xff] }
 0x219   :  { %13615 = vmatmul.mubr.msk.f32.gmra.mrb[36].mxu1 %vm210_vm1, %v16538_v12  ;;  %v11766_v12 = vld [vmem:[%s18105_s0 + $0x241] sm:$0xff] }
 0x21a   :  { %13617 = vmatprep.mubr.msk.f32.mxu1 %vm210_vm1, %v16560_v43  ;;  %v11767_v43 = vld [vmem:[%s18105_s0 + $0x251] sm:$0xff] }
 0x21d   :  { %13618 = vmatmul.mubr.msk.f32.gmra.mrb[38].mxu1 %vm210_vm1, %v16573_v52  ;;  %v11768_v52 = vld [vmem:[%s18105_s0 + $0x261] sm:$0xff] }
 0x21e   :  { %13620 = vmatprep.mubr.msk.f32.mxu1 %vm210_vm1, %v11706_v17 }
 0x221   :  { %13621 = vmatmul.mubr.msk.f32.gmra.mrb[40].mxu1 %vm210_vm1, %v16610_v57  ;;  %v17383_v57 = vld [vmem:[%s18106_s1 + $0x1c] sm:$0xf] }
 0x222   :  { %13623 = vmatprep.mubr.msk.f32.mxu1 %vm210_vm1, %v16634_v56  ;;  %v11769_v56 = vld [vmem:[%s18105_s0 + $0x271] sm:$0xff] }
 0x225   :  { %13624 = vmatmul.mubr.msk.f32.gmra.mrb[42].mxu1 %vm210_vm1, %v16647_v23  ;;  %v11770_v23 = vld [vmem:[%s18105_s0 + $0x281] sm:$0xff] }
 0x226   :  { %13626 = vmatprep.mubr.msk.f32.mxu1 %vm210_vm1, %v16667_v20  ;;  %v11771_v20 = vld [vmem:[%s18105_s0 + $0x291] sm:$0xff] }
 0x229   :  { %13627 = vmatmul.mubr.msk.f32.gmra.mrb[44].mxu1 %vm210_vm1, %v18170_v13 }
 0x22a   :  { %13629 = vmatprep.mubr.msk.f32.mxu1 %vm210_vm1, %v16696_v15  ;;  %v11772_v15 = vld [vmem:[%s18105_s0 + $0x2a1] sm:$0xff] }
 0x22d   :  { %13630 = vmatmul.mubr.msk.f32.gmra.mrb[46].mxu1 %vm210_vm1, %v16708_v50  ;;  %v11773_v50 = vld [vmem:[%s18105_s0 + $0x2b1] sm:$0xff] }
 0x22e   :  { %13634 = vmatprep.mubr.msk.f32.mxu1 %vm210_vm1, %v11732_v54 }
 0x231   :  { %13635 = vmatmul.mubr.msk.f32.vlgmr.msra.gmra.mrb[32].mxu1 %vm210_vm1, %v16738_v46  ;;  %v11774_v46 = vld [vmem:[%s18105_s0 + $0x2d1] sm:$0xff] }
 0x232   :  { %13659 = vmatpush3.msk.msra.mxu1 %vm259_vm0, %v11782_v26  ;;  %13637 = vmatprep.mubr.msk.f32.mxu1 %vm210_vm1, %v16757_v5  ;;  %v11775_v5 = vld [vmem:[%s18105_s0 + $0x2e1] sm:$0xff] }
 0x233   :  { %13684 = vmatprep.subr.msk.mxu1 %vm259_vm0, %v11816_v62 }
 0x235   :  { %13638 = vmatmul.mubr.msk.f32.gmra.mrb[34].mxu1 %vm210_vm1, %v16770_v45  ;;  %v11776_v45 = vld [vmem:[%s18105_s0 + $0x2f1] sm:$0xff] }
 0x236   :  { %13640 = vmatprep.mubr.msk.f32.mxu1 %vm210_vm1, %v16790_v33  ;;  %v17424_v33 = vld [vmem:[%s18107_s2] ss:$0 sm:$0xff] }
 0x239   :  { %13641 = vmatmul.mubr.msk.f32.gmra.mrb[36].mxu1 %vm210_vm1, %v16802_v40  ;;  %v11777_v40 = vld [vmem:[%s18105_s0 + $0x301] sm:$0xff] }
 0x23a   :  { %13643 = vmatprep.mubr.msk.f32.mxu1 %vm210_vm1, %v16813_v21  ;;  %v11778_v21 = vld [vmem:[%s18105_s0 + $0x311] sm:$0xff] }
 0x23d   :  { %13644 = vmatmul.mubr.msk.f32.gmra.mrb[38].mxu1 %vm210_vm1, %v16820_v41 }
 0x23e   :  { %13646 = vmatprep.mubr.msk.f32.mxu1 %vm210_vm1, %v11740_v7 }
 0x241   :  { %13647 = vmatmul.mubr.msk.f32.gmra.mrb[40].mxu1 %vm210_vm1, %v16836_v37 }
 0x242   :  { %13649 = vmatprep.mubr.msk.f32.mxu1 %vm210_vm1, %v16848_v36 }
 0x245   :  { %13650 = vmatmul.mubr.msk.f32.gmra.mrb[42].mxu1 %vm210_vm1, %v16855_v63 }
 0x246   :  { %13652 = vmatprep.mubr.msk.f32.mxu1 %vm210_vm1, %v16866_v24  ;;  %v11779_v24 = vld [vmem:[%s18105_s0 + $0x321] sm:$0xff] }
 0x249   :  { %13653 = vmatmul.mubr.msk.f32.gmra.mrb[44].mxu1 %vm210_vm1, %v16873_v16 }
 0x24a   :  { %13655 = vmatprep.mubr.msk.f32.mxu1 %vm210_vm1, %v16884_v18  ;;  %v11780_v18 = vld [vmem:[%s18105_s0 + $0x331] sm:$0xff] }
 0x24d   :  { %13656 = vmatmul.mubr.msk.f32.gmra.mrb[46].mxu1 %vm210_vm1, %v16891_v29 }
 0x24e   :  { %13660 = vmatprep.mubr.msk.f32.mxu1 %vm210_vm1, %v11766_v12 }
 0x251   :  { %13661 = vmatmul.mubr.msk.f32.vlgmr.msra.gmra.mrb[32].mxu1 %vm210_vm1, %v11767_v43 }
 0x252   :  { %13685 = vmatpush3.msk.msra.mxu1 %vm259_vm0, %v11816_v62  ;;  %13663 = vmatprep.mubr.msk.f32.mxu1 %vm210_vm1, %v11768_v52 }
 0x253   :  { %13710 = vmatprep.subr.msk.mxu1 %vm259_vm0, %v17383_v57 }
 0x255   :  { %13664 = vmatmul.mubr.msk.f32.gmra.mrb[34].mxu1 %vm210_vm1, %v11769_v56 }
 0x256   :  { %13666 = vmatprep.mubr.msk.f32.mxu1 %vm210_vm1, %v11770_v23 }
 0x259   :  { %13667 = vmatmul.mubr.msk.f32.gmra.mrb[36].mxu1 %vm210_vm1, %v11771_v20 }
 0x25a   :  { %13669 = vmatprep.mubr.msk.f32.mxu1 %vm210_vm1, %v11772_v15 }
 0x25d   :  { %13670 = vmatmul.mubr.msk.f32.gmra.mrb[38].mxu1 %vm210_vm1, %v11773_v50 }
 0x25e   :  { %13672 = vmatprep.mubr.msk.f32.mxu1 %vm210_vm1, %v11774_v46 }
 0x261   :  { %13673 = vmatmul.mubr.msk.f32.gmra.mrb[40].mxu1 %vm210_vm1, %v11775_v5 }
 0x262   :  { %13675 = vmatprep.mubr.msk.f32.mxu1 %vm210_vm1, %v11776_v45  ;;  %v17485_v45 = vld [vmem:[%s18108_s3 + $0x10] sm:$0xff] }
 0x264   :  { %v13272_v41 = vpop.f32.mrb[16].mxu1 }
 0x265   :  { %v4311_v37 = vadd.f32 %v13272_v41, %v17424_v33  ;;  %v4208_v36 = vpop.f32.mrb[17].mxu1  ;;  %13676 = vmatmul.mubr.msk.f32.gmra.mrb[42].mxu1 %vm210_vm1, %v11777_v40 }
 0x266   :  { %v4310_v63 = vadd.f32 %v17424_v33, %v4208_v36  ;;  %13678 = vmatprep.mubr.msk.f32.mxu1 %vm210_vm1, %v11778_v21 }
 0x267   :  { %v4327_v16 = vmax.f32 %v4311_v37, 0.0 }
 0x268   :  { %v4326_v29 = vmax.f32 %v4310_v63, 0.0  ;;  %v13275_v58 = vpop.f32.mrb[18].mxu1 }
 0x269   :  { %4344 = vst.msk [vmem:[#allocation2 + $0x140] sm:$0xff] %vm27_vm2, %v4327_v16  ;;  %v4313_v44 = vadd.f32 %v13275_v58, %v17424_v33  ;;  %v4218_v51 = vpop.f32.mrb[19].mxu1  ;;  %13679 = vmatmul.mubr.msk.f32.gmra.mrb[44].mxu1 %vm210_vm1, %v11779_v24 }
 0x26a   :  { %4343 = vst.msk [vmem:[#allocation2 + $0x130] sm:$0xff] %vm27_vm2, %v4326_v29  ;;  %v4312_v10 = vadd.f32 %v17424_v33, %v4218_v51  ;;  %13681 = vmatprep.mubr.msk.f32.mxu1 %vm210_vm1, %v11780_v18 }
 0x26b   :  { %v4329_v2 = vmax.f32 %v4313_v44, 0.0 }
 0x26c   :  { %v4328_v42 = vmax.f32 %v4312_v10, 0.0  ;;  %v13278_v30 = vpop.f32.mrb[20].mxu1 }
 0x26d   :  { %4346 = vst.msk [vmem:[#allocation2 + $0x160] sm:$0xff] %vm27_vm2, %v4329_v2  ;;  %v4315_v35 = vadd.f32 %v13278_v30, %v17424_v33  ;;  %v13506_v47 = vpop.f32.mrb[16].mxu0  ;;  %v4228_v59 = vpop.f32.mrb[21].mxu1  ;;  %13682 = vmatmul.mubr.msk.f32.gmra.mrb[46].mxu1 %vm210_vm1, %v11781_v34 }
 0x26e   :  { %4345 = vst.msk [vmem:[#allocation2 + $0x150] sm:$0xff] %vm27_vm2, %v4328_v42  ;;  %v6397_v26 = vadd.f32 %v13506_v47, %v17424_v33  ;;  %v4314_v17 = vadd.f32 %v17424_v33, %v4228_v59  ;;  %v6294_v13 = vpop.f32.mrb[17].mxu0  ;;  %13686 = vmatprep.mubr.msk.f32.mxu1 %vm210_vm1, %v17088_v49  ;;  %v17470_v49 = vld [vmem:[%s18106_s1 + $0x20] sm:$0xf] }
 0x26f   :  { %v4331_v54 = vmax.f32 %v4315_v35, 0.0  ;;  %v6396_v62 = vadd.f32 %v17424_v33, %v6294_v13 }
 0x270   :  { %v6413_v7 = vmax.f32 %v6397_v26, 0.0  ;;  %v4330_v12 = vmax.f32 %v4314_v17, 0.0  ;;  %v13281_v43 = vpop.f32.mrb[22].mxu1 }
 0x271   :  { %4348 = vst.msk [vmem:[#allocation2 + $0x180] sm:$0xff] %vm27_vm2, %v4331_v54  ;;  %v6412_v52 = vmax.f32 %v6396_v62, 0.0  ;;  %v4317_v56 = vadd.f32 %v13281_v43, %v17424_v33  ;;  %v13509_v23 = vpop.f32.mrb[18].mxu0  ;;  %v4238_v20 = vpop.f32.mrb[23].mxu1  ;;  %13687 = vmatmul.mubr.msk.f32.vlgmr.msra.gmra.mrb[32].mxu1 %vm210_vm1, %v17093_v8  ;;  %v17465_v15 = vld [vmem:[#allocation2 + $0x130] sm:$0xff]  ;;  %v17480_v8 = vld [vmem:[#allocation2 + $0x140] sm:$0xff] }
 0x272   :  { %6430 = vst.msk [vmem:[#allocation2 + $0x251] sm:$0xff] %vm27_vm2, %v6413_v7  ;;  %4347 = vst.msk [vmem:[#allocation2 + $0x170] sm:$0xff] %vm27_vm2, %v4330_v12  ;;  %v6399_v50 = vadd.f32 %v13509_v23, %v17424_v33  ;;  %v4316_v46 = vadd.f32 %v17424_v33, %v4238_v20  ;;  %v6304_v5 = vpop.f32.mrb[19].mxu0  ;;  %13711 = vmatpush3.msk.msra.mxu1 %vm259_vm0, %v17383_v57  ;;  %13765 = vmatmul.mubr.msk.f32.vlgmr.msra.gmra.mrb[32].mxu0 %vm27_vm2, %v17465_v15  ;;  %v8556_v43 = vld [vmem:[#allocation2 + $0x1b0] sm:$0xff] }
 0x273   :  { %6429 = vst.msk [vmem:[#allocation2 + $0x241] sm:$0xff] %vm27_vm2, %v6412_v52  ;;  %v4333_v40 = vmax.f32 %v4317_v56, 0.0  ;;  %v6398_v21 = vadd.f32 %v17424_v33, %v6304_v5  ;;  %13767 = vmatprep.mubr.msk.f32.mxu0 %vm27_vm2, %v17480_v8  ;;  %13689 = vmatprep.mubr.msk.f32.mxu1 %vm210_vm1, %v17106_v22 }
 0x274   :  { %v6415_v57 = vmax.f32 %v6399_v50, 0.0  ;;  %v4332_v41 = vmax.f32 %v4316_v46, 0.0  ;;  %v13284_v37 = vpop.f32.mrb[24].mxu1  ;;  %13736 = vmatprep.subr.msk.mxu1 %vm259_vm0, %v17470_v49  ;;  %13789 = vmatpush3.msra.mxu0 %v17289_v4  ;;  %v17509_v58 = vld [vmem:[#allocation2 + $0x160] sm:$0xff] }
 0x275   :  { %4350 = vst.msk [vmem:[#allocation2 + $0x1a0] sm:$0xff] %vm27_vm2, %v4333_v40  ;;  %v6414_v36 = vmax.f32 %v6398_v21, 0.0  ;;  %v4319_v63 = vadd.f32 %v13284_v37, %v17424_v33  ;;  %v13512_v24 = vpop.f32.mrb[20].mxu0  ;;  %v4248_v16 = vpop.f32.mrb[25].mxu1  ;;  %13690 = vmatmul.mubr.msk.f32.gmra.mrb[34].mxu1 %vm210_vm1, %v17111_v39  ;;  %v17500_v18 = vld [vmem:[#allocation2 + $0x150] sm:$0xff]  ;;  %13814 = vmatprep.subr.mxu0 %v17485_v45 }
 0x276   :  { %6432 = vst.msk [vmem:[#allocation2 + $0x271] sm:$0xff] %vm27_vm2, %v6415_v57  ;;  %4349 = vst.msk [vmem:[#allocation2 + $0x190] sm:$0xff] %vm27_vm2, %v4332_v41  ;;  %v6401_v22 = vadd.f32 %v13512_v24, %v17424_v33  ;;  %v4318_v4 = vadd.f32 %v17424_v33, %v4248_v16  ;;  %v6314_v29 = vpop.f32.mrb[21].mxu0  ;;  %13768 = vmatmul.mubr.msk.f32.gmra.mrb[34].mxu0 %vm27_vm2, %v17500_v18  ;;  %13692 = vmatprep.mubr.msk.f32.mxu1 %vm210_vm1, %v17121_v11 }
 0x277   :  { %6431 = vst.msk [vmem:[#allocation2 + $0x261] sm:$0xff] %vm27_vm2, %v6414_v36  ;;  %v4335_v39 = vmax.f32 %v4319_v63, 0.0  ;;  %v6400_v44 = vadd.f32 %v17424_v33, %v6314_v29  ;;  %13770 = vmatprep.mubr.msk.f32.mxu0 %vm27_vm2, %v17509_v58 }
 0x278   :  { %v6417_v51 = vmax.f32 %v6401_v22, 0.0  ;;  %v4334_v10 = vmax.f32 %v4318_v4, 0.0  ;;  %v13287_v34 = vpop.f32.mrb[26].mxu1  ;;  %v17529_v17 = vld [vmem:[#allocation2 + $0x180] sm:$0xff] }
 0x279   :  { %4352 = vst.msk [vmem:[#allocation2 + $0x1d0] sm:$0xff] %vm27_vm2, %v4335_v39  ;;  %v6416_v2 = vmax.f32 %v6400_v44, 0.0  ;;  %v4321_v42 = vadd.f32 %v13287_v34, %v17424_v33  ;;  %v13515_v30 = vpop.f32.mrb[22].mxu0  ;;  %v4258_v35 = vpop.f32.mrb[27].mxu1  ;;  %13693 = vmatmul.mubr.msk.f32.gmra.mrb[36].mxu1 %vm210_vm1, %v17126_v6  ;;  %v17521_v11 = vld [vmem:[#allocation2 + $0x170] sm:$0xff]  ;;  %v11807_v6 = vld [vmem:[%s18105_s0 + $0x80] sm:$0xff] }
 0x27a   :  { %6434 = vst.msk [vmem:[#allocation2 + $0x291] sm:$0xff] %vm27_vm2, %v6417_v51  ;;  %4351 = vst.msk [vmem:[#allocation2 + $0x1c0] sm:$0xff] %vm27_vm2, %v4334_v10  ;;  %v6403_v47 = vadd.f32 %v13515_v30, %v17424_v33  ;;  %v4320_v59 = vadd.f32 %v17424_v33, %v4258_v35  ;;  %v6324_v26 = vpop.f32.mrb[23].mxu0  ;;  %13771 = vmatmul.mubr.msk.f32.gmra.mrb[36].mxu0 %vm27_vm2, %v17521_v11  ;;  %13695 = vmatprep.mubr.msk.f32.mxu1 %vm210_vm1, %v17135_v3 }
 0x27b   :  { %6433 = vst.msk [vmem:[#allocation2 + $0x281] sm:$0xff] %vm27_vm2, %v6416_v2  ;;  %v4337_v13 = vmax.f32 %v4321_v42, 0.0  ;;  %v6402_v54 = vadd.f32 %v17424_v33, %v6324_v26  ;;  %13773 = vmatprep.mubr.msk.f32.mxu0 %vm27_vm2, %v17529_v17 }
 0x27c   :  { %v6419_v62 = vmax.f32 %v6403_v47, 0.0  ;;  %v4336_v7 = vmax.f32 %v4320_v59, 0.0  ;;  %v13290_v12 = vpop.f32.mrb[28].mxu1 }
 0x27d   :  { %4354 = vst.msk [vmem:[#allocation2 + $0x1f0] sm:$0xff] %vm27_vm2, %v4337_v13  ;;  %v6418_v52 = vmax.f32 %v6402_v54, 0.0  ;;  %v4323_v3 = vadd.f32 %v13290_v12, %v17424_v33  ;;  %v13518_v56 = vpop.f32.mrb[24].mxu0  ;;  %v4268_v23 = vpop.f32.mrb[29].mxu1  ;;  %13696 = vmatmul.mubr.msk.f32.gmra.mrb[38].mxu1 %vm210_vm1, %v11807_v6  ;;  %v17543_v20 = vld [vmem:[#allocation2 + $0x190] sm:$0xff] }
 0x27e   :  { %6436 = vst.msk [vmem:[#allocation2 + $0x2b1] sm:$0xff] %vm27_vm2, %v6419_v62  ;;  %4353 = vst.msk [vmem:[#allocation2 + $0x1e0] sm:$0xff] %vm27_vm2, %v4336_v7  ;;  %v6405_v50 = vadd.f32 %v13518_v56, %v17424_v33  ;;  %v4322_v46 = vadd.f32 %v17424_v33, %v4268_v23  ;;  %v6334_v5 = vpop.f32.mrb[25].mxu0  ;;  %13774 = vmatmul.mubr.msk.f32.gmra.mrb[38].mxu0 %vm27_vm2, %v17543_v20  ;;  %13698 = vmatprep.mubr.msk.f32.mxu1 %vm210_vm1, %v17146_v27  ;;  %v11815_v62 = vld [vmem:[%s18105_s0 + $0x110] sm:$0xff] }
 0x27f   :  { %6435 = vst.msk [vmem:[#allocation2 + $0x2a1] sm:$0xff] %vm27_vm2, %v6418_v52  ;;  %v4339_v40 = vmax.f32 %v4323_v3, 0.0  ;;  %v6404_v21 = vadd.f32 %v17424_v33, %v6334_v5  ;;  %13776 = vmatprep.mubr.msk.f32.mxu0 %vm27_vm2, %v8556_v43  ;;  %v11834_v7 = vld [vmem:[%s18105_s0 + $0x130] sm:$0xff]  ;;  %v8530_v43 = vld [vmem:[#allocation2] sm:$0xff]  ;;  %v17646_v5 = vld [vmem:[%s18108_s3 + $0x18] sm:$0xff] }
 0x280   :  { %v6421_v57 = vmax.f32 %v6405_v50, 0.0  ;;  %v4338_v41 = vmax.f32 %v4322_v46, 0.0  ;;  %v13293_v37 = vpop.f32.mrb[30].mxu1  ;;  %v17568_v39 = vld [vmem:[#allocation2 + $0x1d0] sm:$0xff]  ;;  %v11835_v3 = vld [vmem:[%s18105_s0 + $0x140] sm:$0xff] }
 0x281   :  { %4356 = vst.msk [vmem:[#allocation2 + $0x210] sm:$0xff] %vm27_vm2, %v4339_v40  ;;  %v6420_v36 = vmax.f32 %v6404_v21, 0.0  ;;  %v4325_v63 = vadd.f32 %v13293_v37, %v17424_v33  ;;  %v13521_v24 = vpop.f32.mrb[26].mxu0  ;;  %v4278_v16 = vpop.f32.mrb[31].mxu1  ;;  %13699 = vmatmul.mubr.msk.f32.gmra.mrb[40].mxu1 %vm210_vm1, %v17151_v48  ;;  %v17560_v27 = vld [vmem:[#allocation2 + $0x1c0] sm:$0xff]  ;;  %v11836_v56 = vld [vmem:[%s18105_s0 + $0x150] sm:$0xff] }
 0x282   :  { %6438 = vst.msk [vmem:[#allocation2 + $0x2e1] sm:$0xff] %vm27_vm2, %v6421_v57  ;;  %4355 = vst.msk [vmem:[#allocation2 + $0x200] sm:$0xff] %vm27_vm2, %v4338_v41  ;;  %v6407_v22 = vadd.f32 %v13521_v24, %v17424_v33  ;;  %v4324_v4 = vadd.f32 %v17424_v33, %v4278_v16  ;;  %v6344_v29 = vpop.f32.mrb[27].mxu0  ;;  %13777 = vmatmul.mubr.msk.f32.gmra.mrb[40].mxu0 %vm27_vm2, %v17560_v27  ;;  %13701 = vmatprep.mubr.msk.f32.mxu1 %vm210_vm1, %v17160_v53  ;;  %v17632_v23 = vld [vmem:[#allocation2 + $0x10] sm:$0xff]  ;;  %v17638_v50 = vld [vmem:[#allocation2 + $0x20] sm:$0xff] }
 0x283   :  { %6437 = vst.msk [vmem:[#allocation2 + $0x2d1] sm:$0xff] %vm27_vm2, %v6420_v36  ;;  %v4341_v48 = vmax.f32 %v4325_v63, 0.0  ;;  %v6406_v44 = vadd.f32 %v17424_v33, %v6344_v29  ;;  %13779 = vmatprep.mubr.msk.f32.mxu0 %vm27_vm2, %v17568_v39  ;;  %v11837_v46 = vld [vmem:[%s18105_s0 + $0x160] sm:$0xff]  ;;  %v17656_v40 = vld [vmem:[#allocation2 + $0x30] sm:$0xff] }
 0x284   :  { %v6423_v51 = vmax.f32 %v6407_v22, 0.0  ;;  %v4340_v10 = vmax.f32 %v4324_v4, 0.0  ;;  %v17586_v35 = vld [vmem:[#allocation2 + $0x1f0] sm:$0xff]  ;;  %v17661_v21 = vld [vmem:[#allocation2 + $0x40] sm:$0xff] }
 0x285   :  { %4358 = vst.msk [vmem:[#allocation2 + $0x230] sm:$0xff] %vm27_vm2, %v4341_v48  ;;  %v6422_v34 = vmax.f32 %v6406_v44, 0.0  ;;  %v13524_v2 = vpop.f32.mrb[28].mxu0  ;;  %13702 = vmatmul.mubr.msk.f32.gmra.mrb[42].mxu1 %vm210_vm1, %v17165_v31  ;;  %v17579_v42 = vld [vmem:[#allocation2 + $0x1e0] sm:$0xff]  ;;  %v17673_v41 = vld [vmem:[#allocation2 + $0x50] sm:$0xff] }
 0x286   :  { %6440 = vst.msk [vmem:[#allocation2 + $0x301] sm:$0xff] %vm27_vm2, %v6423_v51  ;;  %4357 = vst.msk [vmem:[#allocation2 + $0x220] sm:$0xff] %vm27_vm2, %v4340_v10  ;;  %v6409_v53 = vadd.f32 %v13524_v2, %v17424_v33  ;;  %v6354_v30 = vpop.f32.mrb[29].mxu0  ;;  %13780 = vmatmul.mubr.msk.f32.gmra.mrb[42].mxu0 %vm27_vm2, %v17579_v42  ;;  %13704 = vmatprep.mubr.msk.f32.mxu1 %vm210_vm1, %v17174_v61  ;;  %v11839_v57 = vld [vmem:[%s18105_s0 + $0x180] sm:$0xff]  ;;  %v8538_v24 = vld [vmem:[#allocation2 + $0x90] sm:$0xff] }
 0x287   :  { %6439 = vst.msk [vmem:[#allocation2 + $0x2f1] sm:$0xff] %vm27_vm2, %v6422_v34  ;;  %v6408_v31 = vadd.f32 %v17424_v33, %v6354_v30  ;;  %13782 = vmatprep.mubr.msk.f32.mxu0 %vm27_vm2, %v17586_v35  ;;  %v17677_v37 = vld [vmem:[#allocation2 + $0x60] sm:$0xff]  ;;  %v17689_v16 = vld [vmem:[#allocation2 + $0x70] sm:$0xff] }
 0x288   :  { %v6425_v47 = vmax.f32 %v6409_v53, 0.0  ;;  %v17602_v54 = vld [vmem:[#allocation2 + $0x210] sm:$0xff]  ;;  %v11841_v36 = vld [vmem:[%s18105_s0 + $0x1a0] sm:$0xff] }
 0x289   :  { %v6424_v59 = vmax.f32 %v6408_v31, 0.0  ;;  %v13527_v26 = vpop.f32.mrb[30].mxu0  ;;  %13705 = vmatmul.mubr.msk.f32.gmra.mrb[44].mxu1 %vm210_vm1, %v17179_v0  ;;  %v17596_v6 = vld [vmem:[#allocation2 + $0x200] sm:$0xff]  ;;  %v11843_v22 = vld [vmem:[%s18105_s0 + $0x1d0] sm:$0xff] }
 0x28a   :  { %6442 = vst.msk [vmem:[#allocation2 + $0x321] sm:$0xff] %vm27_vm2, %v6425_v47  ;;  %v6411_v13 = vadd.f32 %v13527_v26, %v17424_v33  ;;  %v6364_v61 = vpop.f32.mrb[31].mxu0  ;;  %13783 = vmatmul.mubr.msk.f32.gmra.mrb[44].mxu0 %vm27_vm2, %v17596_v6  ;;  %13707 = vmatprep.mubr.msk.f32.mxu1 %vm210_vm1, %v17188_v55  ;;  %v11842_v63 = vld [vmem:[%s18105_s0 + $0x1c0] sm:$0xff]  ;;  %v17706_v48 = vld [vmem:[#allocation2 + $0xb0] sm:$0xff] }
 0x28b   :  { %6441 = vst.msk [vmem:[#allocation2 + $0x311] sm:$0xff] %vm27_vm2, %v6424_v59  ;;  %v6410_v0 = vadd.f32 %v17424_v33, %v6364_v61  ;;  %13785 = vmatprep.mubr.msk.f32.mxu0 %vm27_vm2, %v17602_v54  ;;  %v11844_v4 = vld [vmem:[%s18105_s0 + $0x1e0] sm:$0xff]  ;;  %v11845_v44 = vld [vmem:[%s18105_s0 + $0x1f0] sm:$0xff] }
 0x28c   :  { %v6427_v12 = vmax.f32 %v6411_v13, 0.0  ;;  %v17702_v29 = vld [vmem:[#allocation2 + $0xa0] sm:$0xff]  ;;  %v17722_v34 = vld [vmem:[#allocation2 + $0xd0] sm:$0xff] }
 0x28d   :  { %v6426_v52 = vmax.f32 %v6410_v0, 0.0  ;;  %13708 = vmatmul.mubr.msk.f32.gmra.mrb[46].mxu1 %vm210_vm1, %v11815_v62  ;;  %v17617_v55 = vld [vmem:[#allocation2 + $0x220] sm:$0xff]  ;;  %v11847_v2 = vld [vmem:[%s18105_s0 + $0x210] sm:$0xff] }
 0x28e   :  { %6444 = vst.msk [vmem:[#allocation2 + $0x341] sm:$0xff] %vm27_vm2, %v6427_v12  ;;  %13786 = vmatmul.mubr.msk.f32.gmra.mrb[46].mxu0 %vm27_vm2, %v17617_v55  ;;  %13712 = vmatprep.mubr.msk.f32.mxu1 %vm210_vm1, %v11834_v7  ;;  %v11846_v51 = vld [vmem:[%s18105_s0 + $0x200] sm:$0xff]  ;;  %v17738_v31 = vld [vmem:[#allocation2 + $0xf0] sm:$0xff] }
 0x28f   :  { %6443 = vst.msk [vmem:[#allocation2 + $0x331] sm:$0xff] %vm27_vm2, %v6426_v52  ;;  %13790 = vmatprep.mubr.msk.f32.mxu0 %vm27_vm2, %v8530_v43  ;;  %v17718_v10 = vld [vmem:[#allocation2 + $0xc0] sm:$0xff]  ;;  %v11849_v47 = vld [vmem:[%s18105_s0 + $0x230] sm:$0xff] }
 0x290   :  { %v11848_v53 = vld [vmem:[%s18105_s0 + $0x220] sm:$0xff]  ;;  %v17756_v13 = vld [vmem:[#allocation2 + $0x11] sm:$0xff] }
 0x291   :  { %13713 = vmatmul.mubr.msk.f32.vlgmr.msra.gmra.mrb[32].mxu1 %vm210_vm1, %v11835_v3  ;;  %v17734_v30 = vld [vmem:[#allocation2 + $0xe0] sm:$0xff]  ;;  %v8960_v0 = vld [vmem:[#allocation2 + $0x91] sm:$0xff] }
 0x292   :  { %13737 = vmatpush3.msk.msra.mxu1 %vm259_vm0, %v17470_v49  ;;  %13791 = vmatmul.mubr.msk.f32.vlgmr.msra.gmra.mrb[32].mxu0 %vm27_vm2, %v17632_v23  ;;  %v11838_v49 = vld [vmem:[%s18105_s0 + $0x170] sm:$0xff]  ;;  %v8952_v59 = vld [vmem:[#allocation2 + $0x1] sm:$0xff] }
 0x293   :  { %13793 = vmatprep.mubr.msk.f32.mxu0 %vm27_vm2, %v17638_v50  ;;  %13715 = vmatprep.mubr.msk.f32.mxu1 %vm210_vm1, %v11836_v56  ;;  %v17747_v26 = vld [vmem:[#allocation2 + $0x100] sm:$0xff]  ;;  %v17814_v12 = vld [vmem:[#allocation2 + $0xb1] sm:$0xff] }
 0x294   :  { %13815 = vmatpush3.msra.mxu0 %v17485_v45  ;;  %v11840_v45 = vld [vmem:[%s18105_s0 + $0x190] sm:$0xff]  ;;  %v11970_v61 = vld [vmem:[%s18108_s3 + $0x20] sm:$0xff] }
 0x295   :  { %13716 = vmatmul.mubr.msk.f32.gmra.mrb[34].mxu1 %vm210_vm1, %v11837_v46  ;;  %13840 = vmatprep.subr.mxu0 %v17646_v5  ;;  %v17763_v62 = vld [vmem:[#allocation2 + $0x21] sm:$0xff]  ;;  %v17830_v52 = vld [vmem:[#allocation2 + $0xd1] sm:$0xff] }
 0x296   :  { %13794 = vmatmul.mubr.msk.f32.gmra.mrb[34].mxu0 %vm27_vm2, %v17656_v40  ;;  %13718 = vmatprep.mubr.msk.f32.mxu1 %vm210_vm1, %v11838_v49  ;;  %v17810_v7 = vld [vmem:[#allocation2 + $0xa1] sm:$0xff]  ;;  %v11881_v3 = vld [vmem:[%s18105_s0 + $0xf1] sm:$0xff] }
 0x297   :  { %13796 = vmatprep.mubr.msk.f32.mxu0 %vm27_vm2, %v17661_v21  ;;  %v17826_v43 = vld [vmem:[#allocation2 + $0xc1] sm:$0xff]  ;;  %v11883_v49 = vld [vmem:[%s18105_s0 + $0x111] sm:$0xff] }
 0x298   :  { %v11882_v56 = vld [vmem:[%s18105_s0 + $0x101] sm:$0xff] }
 0x299   :  { %13719 = vmatmul.mubr.msk.f32.gmra.mrb[36].mxu1 %vm210_vm1, %v11839_v57  ;;  %v17842_v46 = vld [vmem:[#allocation2 + $0xe1] sm:$0xff] }
 0x29a   :  { %13797 = vmatmul.mubr.msk.f32.gmra.mrb[36].mxu0 %vm27_vm2, %v17673_v41  ;;  %13721 = vmatprep.mubr.msk.f32.mxu1 %vm210_vm1, %v11840_v45  ;;  %v17855_v57 = vld [vmem:[#allocation2 + $0x101] sm:$0xff] }
 0x29b   :  { %13799 = vmatprep.mubr.msk.f32.mxu0 %vm27_vm2, %v17677_v37  ;;  %v9179_v45 = vld [vmem:[#allocation2 + $0x240] sm:$0xff] }
 0x29d   :  { %13722 = vmatmul.mubr.msk.f32.gmra.mrb[38].mxu1 %vm210_vm1, %v11841_v36  ;;  %v9180_v36 = vld [vmem:[#allocation2 + $0x250] sm:$0xff] }
 0x29e   :  { %13800 = vmatmul.mubr.msk.f32.gmra.mrb[38].mxu0 %vm27_vm2, %v17689_v16  ;;  %13724 = vmatprep.mubr.msk.f32.mxu1 %vm210_vm1, %v11842_v63  ;;  %v9181_v63 = vld [vmem:[#allocation2 + $0x260] sm:$0xff] }
 0x29f   :  { %13802 = vmatprep.mubr.msk.f32.mxu0 %vm27_vm2, %v8538_v24  ;;  %v9182_v24 = vld [vmem:[#allocation2 + $0x270] sm:$0xff] }
 0x2a1   :  { %13725 = vmatmul.mubr.msk.f32.gmra.mrb[40].mxu1 %vm210_vm1, %v11843_v22  ;;  %v9183_v22 = vld [vmem:[#allocation2 + $0x280] sm:$0xff] }
 0x2a2   :  { %13803 = vmatmul.mubr.msk.f32.gmra.mrb[40].mxu0 %vm27_vm2, %v17702_v29  ;;  %13727 = vmatprep.mubr.msk.f32.mxu1 %vm210_vm1, %v11844_v4  ;;  %v9184_v4 = vld [vmem:[#allocation2 + $0x290] sm:$0xff] }
 0x2a3   :  { %13805 = vmatprep.mubr.msk.f32.mxu0 %vm27_vm2, %v17706_v48 }
 0x2a5   :  { %13728 = vmatmul.mubr.msk.f32.gmra.mrb[42].mxu1 %vm210_vm1, %v11845_v44  ;;  %v9185_v44 = vld [vmem:[#allocation2 + $0x2a0] sm:$0xff] }
 0x2a6   :  { %13806 = vmatmul.mubr.msk.f32.gmra.mrb[42].mxu0 %vm27_vm2, %v17718_v10  ;;  %13730 = vmatprep.mubr.msk.f32.mxu1 %vm210_vm1, %v11846_v51  ;;  %v9186_v51 = vld [vmem:[#allocation2 + $0x2b0] sm:$0xff] }
 0x2a7   :  { %13808 = vmatprep.mubr.msk.f32.mxu0 %vm27_vm2, %v17722_v34 }
 0x2a9   :  { %13731 = vmatmul.mubr.msk.f32.gmra.mrb[44].mxu1 %vm210_vm1, %v11847_v2  ;;  %v9187_v2 = vld [vmem:[#allocation2 + $0x2d0] sm:$0xff] }
 0x2aa   :  { %13809 = vmatmul.mubr.msk.f32.gmra.mrb[44].mxu0 %vm27_vm2, %v17734_v30  ;;  %13733 = vmatprep.mubr.msk.f32.mxu1 %vm210_vm1, %v11848_v53  ;;  %v9188_v53 = vld [vmem:[#allocation2 + $0x2e0] sm:$0xff] }
 0x2ab   :  { %13811 = vmatprep.mubr.msk.f32.mxu0 %vm27_vm2, %v17738_v31 }
 0x2ad   :  { %13734 = vmatmul.mubr.msk.f32.gmra.mrb[46].mxu1 %vm210_vm1, %v11849_v47  ;;  %v9189_v47 = vld [vmem:[#allocation2 + $0x2f0] sm:$0xff] }
 0x2ae   :  { %13812 = vmatmul.mubr.msk.f32.gmra.mrb[46].mxu0 %vm27_vm2, %v17747_v26  ;;  %13738 = vmatprep.mubr.msk.f32.mxu1 %vm210_vm1, %v17199_v28  ;;  %v17772_v28 = vld [vmem:[#allocation2 + $0x31] sm:$0xff] }
 0x2af   :  { %13816 = vmatprep.mubr.msk.f32.mxu0 %vm27_vm2, %v8952_v59  ;;  %v9190_v59 = vld [vmem:[#allocation2 + $0x300] sm:$0xff] }
 0x2b1   :  { %13739 = vmatmul.mubr.msk.f32.vlgmr.msra.gmra.mrb[32].mxu1 %vm210_vm1, %v17204_v25  ;;  %v17776_v25 = vld [vmem:[#allocation2 + $0x41] sm:$0xff] }
 0x2b2   :  { %13817 = vmatmul.mubr.msk.f32.vlgmr.msra.gmra.mrb[32].mxu0 %vm27_vm2, %v17756_v13  ;;  %13741 = vmatprep.mubr.msk.f32.mxu1 %vm210_vm1, %v17220_v9  ;;  %v17784_v9 = vld [vmem:[#allocation2 + $0x51] sm:$0xff] }
 0x2b3   :  { %13819 = vmatprep.mubr.msk.f32.mxu0 %vm27_vm2, %v17763_v62  ;;  %13841 = vmatpush3.msra.mxu0 %v17646_v5  ;;  %v17846_v5 = vld [vmem:[#allocation2 + $0xf1] sm:$0xff] }
 0x2b4   :  { %13866 = vmatprep.subr.mxu0 %v11970_v61 }
 0x2b5   :  { %13742 = vmatmul.mubr.msk.f32.gmra.mrb[34].mxu1 %vm210_vm1, %v17225_v1  ;;  %v17788_v1 = vld [vmem:[#allocation2 + $0x61] sm:$0xff] }
 0x2b6   :  { %13820 = vmatmul.mubr.msk.f32.gmra.mrb[34].mxu0 %vm27_vm2, %v17772_v28  ;;  %13744 = vmatprep.mubr.msk.f32.mxu1 %vm210_vm1, %v17236_v32  ;;  %v11875_v32 = vld [vmem:[%s18105_s0 + $0x81] sm:$0xff] }
 0x2b7   :  { %13822 = vmatprep.mubr.msk.f32.mxu0 %vm27_vm2, %v17776_v25 }
 0x2b9   :  { %13745 = vmatmul.mubr.msk.f32.gmra.mrb[36].mxu1 %vm210_vm1, %v17241_v19  ;;  %v17798_v19 = vld [vmem:[#allocation2 + $0x71] sm:$0xff] }
 0x2ba   :  { %13823 = vmatmul.mubr.msk.f32.gmra.mrb[36].mxu0 %vm27_vm2, %v17784_v9  ;;  %13747 = vmatprep.mubr.msk.f32.mxu1 %vm210_vm1, %v17250_v14  ;;  %v11878_v14 = vld [vmem:[%s18105_s0 + $0xc1] sm:$0xff] }
 0x2bb   :  { %13825 = vmatprep.mubr.msk.f32.mxu0 %vm27_vm2, %v17788_v1 }
 0x2bd   :  { %13748 = vmatmul.mubr.msk.f32.gmra.mrb[38].mxu1 %vm210_vm1, %v11875_v32  ;;  %v9192_v32 = vld [vmem:[#allocation2 + $0x320] sm:$0xff] }
 0x2be   :  { %13826 = vmatmul.mubr.msk.f32.gmra.mrb[38].mxu0 %vm27_vm2, %v17798_v19  ;;  %13750 = vmatprep.mubr.msk.f32.mxu1 %vm210_vm1, %v17261_v60  ;;  %v11879_v60 = vld [vmem:[%s18105_s0 + $0xd1] sm:$0xff] }
 0x2bf   :  { %13828 = vmatprep.mubr.msk.f32.mxu0 %vm27_vm2, %v8960_v0  ;;  %v9193_v0 = vld [vmem:[#allocation2 + $0x330] sm:$0xff] }
 0x2c1   :  { %13751 = vmatmul.mubr.msk.f32.gmra.mrb[40].mxu1 %vm210_vm1, %v17266_v38  ;;  %v11880_v38 = vld [vmem:[%s18105_s0 + $0xe1] sm:$0xff] }
 0x2c2   :  { %13829 = vmatmul.mubr.msk.f32.gmra.mrb[40].mxu0 %vm27_vm2, %v17810_v7  ;;  %13753 = vmatprep.mubr.msk.f32.mxu1 %vm210_vm1, %v11878_v14  ;;  %v9194_v14 = vld [vmem:[#allocation2 + $0x340] sm:$0xff] }
 0x2c3   :  { %13831 = vmatprep.mubr.msk.f32.mxu0 %vm27_vm2, %v17814_v12 }
 0x2c5   :  { %13754 = vmatmul.mubr.msk.f32.gmra.mrb[42].mxu1 %vm210_vm1, %v11879_v60  ;;  %v11987_v60 = vld [vmem:[%s18108_s3 + $0x28] sm:$0xff] }
 0x2c6   :  { %13832 = vmatmul.mubr.msk.f32.gmra.mrb[42].mxu0 %vm27_vm2, %v17826_v43  ;;  %13756 = vmatprep.mubr.msk.f32.mxu1 %vm210_vm1, %v11880_v38 }
 0x2c7   :  { %13834 = vmatprep.mubr.msk.f32.mxu0 %vm27_vm2, %v17830_v52 }
 0x2c9   :  { %13757 = vmatmul.mubr.msk.f32.gmra.mrb[44].mxu1 %vm210_vm1, %v11881_v3 }
 0x2ca   :  { %13835 = vmatmul.mubr.msk.f32.gmra.mrb[44].mxu0 %vm27_vm2, %v17842_v46  ;;  %13759 = vmatprep.mubr.msk.f32.mxu1 %vm210_vm1, %v11882_v56 }
 0x2cb   :  { %13837 = vmatprep.mubr.msk.f32.mxu0 %vm27_vm2, %v17846_v5 }
 0x2cd   :  { %13760 = vmatmul.mubr.msk.f32.gmra.mrb[46].mxu1 %vm210_vm1, %v11883_v49 }
 0x2ce   :  { %13838 = vmatmul.mubr.msk.f32.gmra.mrb[46].mxu0 %vm27_vm2, %v17855_v57 }
 0x2cf   :  { %13842 = vmatprep.mubr.msk.f32.mxu0 %vm27_vm2, %v9179_v45 }
 0x2d2   :  { %13843 = vmatmul.mubr.msk.f32.vlgmr.msra.gmra.mrb[32].mxu0 %vm27_vm2, %v9180_v36 }
 0x2d3   :  { %13845 = vmatprep.mubr.msk.f32.mxu0 %vm27_vm2, %v9181_v63  ;;  %13867 = vmatpush3.msra.mxu0 %v11970_v61  ;;  %v9191_v61 = vld [vmem:[#allocation2 + $0x310] sm:$0xff] }
 0x2d4   :  { %13892 = vmatprep.subr.mxu0 %v11987_v60 }
 0x2d6   :  { %13846 = vmatmul.mubr.msk.f32.gmra.mrb[34].mxu0 %vm27_vm2, %v9182_v24 }
 0x2d7   :  { %13848 = vmatprep.mubr.msk.f32.mxu0 %vm27_vm2, %v9183_v22 }
 0x2da   :  { %13849 = vmatmul.mubr.msk.f32.gmra.mrb[36].mxu0 %vm27_vm2, %v9184_v4 }
 0x2db   :  { %13851 = vmatprep.mubr.msk.f32.mxu0 %vm27_vm2, %v9185_v44 }
 0x2de   :  { %13852 = vmatmul.mubr.msk.f32.gmra.mrb[38].mxu0 %vm27_vm2, %v9186_v51 }
 0x2df   :  { %13854 = vmatprep.mubr.msk.f32.mxu0 %vm27_vm2, %v9187_v2 }
 0x2e2   :  { %13855 = vmatmul.mubr.msk.f32.gmra.mrb[40].mxu0 %vm27_vm2, %v9188_v53 }
 0x2e3   :  { %13857 = vmatprep.mubr.msk.f32.mxu0 %vm27_vm2, %v9189_v47 }
 0x2e6   :  { %13858 = vmatmul.mubr.msk.f32.gmra.mrb[42].mxu0 %vm27_vm2, %v9190_v59 }
 0x2e7   :  { %13860 = vmatprep.mubr.msk.f32.mxu0 %vm27_vm2, %v9191_v61 }
 0x2ea   :  { %13861 = vmatmul.mubr.msk.f32.gmra.mrb[44].mxu0 %vm27_vm2, %v9192_v32 }
 0x2eb   :  { %13863 = vmatprep.mubr.msk.f32.mxu0 %vm27_vm2, %v9193_v0 }
 0x2ee   :  { %13864 = vmatmul.mubr.msk.f32.gmra.mrb[46].mxu0 %vm27_vm2, %v9194_v14 }
 0x384   :  { %v13740_v38 = vpop.f32.mrb[32].mxu1 }
 0x385   :  { %v8482_v3 = vadd.f32 %v13740_v38, %v17424_v33  ;;  %v8379_v56 = vpop.f32.mrb[33].mxu1 }
 0x386   :  { %v8481_v49 = vadd.f32 %v17424_v33, %v8379_v56 }
 0x387   :  { %v8498_v45 = vmax.f32 %v8482_v3, 0.0 }
 0x388   :  { %v8497_v36 = vmax.f32 %v8481_v49, 0.0  ;;  %v13743_v63 = vpop.f32.mrb[34].mxu1 }
 0x389   :  { %8515 = vst.msk [vmem:[#allocation2 + $0x370] sm:$0xff] %vm27_vm2, %v8498_v45  ;;  %v8484_v24 = vadd.f32 %v13743_v63, %v17424_v33  ;;  %v8389_v22 = vpop.f32.mrb[35].mxu1  ;;  %v17896_v45 = vld [vmem:[%s18108_s3 + $0x30] sm:$0xff] }
 0x38a   :  { %8514 = vst.msk [vmem:[#allocation2 + $0x360] sm:$0xff] %vm27_vm2, %v8497_v36  ;;  %v8483_v4 = vadd.f32 %v17424_v33, %v8389_v22 }
 0x38b   :  { %v8500_v44 = vmax.f32 %v8484_v24, 0.0 }
 0x38c   :  { %v8499_v51 = vmax.f32 %v8483_v4, 0.0  ;;  %v13746_v2 = vpop.f32.mrb[36].mxu1 }
 0x38d   :  { %8517 = vst.msk [vmem:[#allocation2 + $0x390] sm:$0xff] %vm27_vm2, %v8500_v44  ;;  %v8486_v53 = vadd.f32 %v13746_v2, %v17424_v33  ;;  %v8399_v47 = vpop.f32.mrb[37].mxu1 }
 0x38e   :  { %8516 = vst.msk [vmem:[#allocation2 + $0x380] sm:$0xff] %vm27_vm2, %v8499_v51  ;;  %v8485_v59 = vadd.f32 %v17424_v33, %v8399_v47 }
 0x38f   :  { %v8502_v61 = vmax.f32 %v8486_v53, 0.0 }
 0x390   :  { %v8501_v32 = vmax.f32 %v8485_v59, 0.0  ;;  %v13749_v0 = vpop.f32.mrb[38].mxu1  ;;  %v9407_v49 = vld [vmem:[#allocation2 + $0x370] sm:$0xff] }
 0x391   :  { %8519 = vst.msk [vmem:[#allocation2 + $0x3b0] sm:$0xff] %vm27_vm2, %v8502_v61  ;;  %v8488_v14 = vadd.f32 %v13749_v0, %v17424_v33  ;;  %v8409_v38 = vpop.f32.mrb[39].mxu1  ;;  %v9406_v3 = vld [vmem:[#allocation2 + $0x360] sm:$0xff] }
 0x392   :  { %8518 = vst.msk [vmem:[#allocation2 + $0x3a0] sm:$0xff] %vm27_vm2, %v8501_v32  ;;  %v8487_v56 = vadd.f32 %v17424_v33, %v8409_v38  ;;  %13868 = vmatprep.mubr.msk.f32.mxu0 %vm27_vm2, %v9406_v3 }
 0x393   :  { %v8504_v36 = vmax.f32 %v8488_v14, 0.0  ;;  %13869 = vmatmul.mubr.msk.f32.vlgmr.msra.gmra.mrb[32].mxu0 %vm27_vm2, %v9407_v49 }
 0x394   :  { %v8503_v63 = vmax.f32 %v8487_v56, 0.0  ;;  %v13752_v24 = vpop.f32.mrb[40].mxu1  ;;  %13893 = vmatpush3.msra.mxu0 %v11987_v60  ;;  %v9409_v2 = vld [vmem:[#allocation2 + $0x390] sm:$0xff] }
 0x395   :  { %8521 = vst.msk [vmem:[#allocation2 + $0x3d0] sm:$0xff] %vm27_vm2, %v8504_v36  ;;  %v8490_v22 = vadd.f32 %v13752_v24, %v17424_v33  ;;  %v8419_v4 = vpop.f32.mrb[41].mxu1  ;;  %v9408_v44 = vld [vmem:[#allocation2 + $0x380] sm:$0xff]  ;;  %13918 = vmatprep.subr.mxu0 %v17896_v45 }
 0x396   :  { %8520 = vst.msk [vmem:[#allocation2 + $0x3c0] sm:$0xff] %vm27_vm2, %v8503_v63  ;;  %v8489_v51 = vadd.f32 %v17424_v33, %v8419_v4  ;;  %13871 = vmatprep.mubr.msk.f32.mxu0 %vm27_vm2, %v9408_v44 }
 0x397   :  { %v8506_v53 = vmax.f32 %v8490_v22, 0.0  ;;  %13872 = vmatmul.mubr.msk.f32.gmra.mrb[34].mxu0 %vm27_vm2, %v9409_v2 }
 0x398   :  { %v8505_v47 = vmax.f32 %v8489_v51, 0.0  ;;  %v13755_v60 = vpop.f32.mrb[42].mxu1  ;;  %v9411_v14 = vld [vmem:[#allocation2 + $0x3b0] sm:$0xff] }
 0x399   :  { %8523 = vst.msk [vmem:[#allocation2 + $0x400] sm:$0xff] %vm27_vm2, %v8506_v53  ;;  %v8492_v59 = vadd.f32 %v13755_v60, %v17424_v33  ;;  %v8429_v61 = vpop.f32.mrb[43].mxu1  ;;  %v9410_v32 = vld [vmem:[#allocation2 + $0x3a0] sm:$0xff] }
 0x39a   :  { %8522 = vst.msk [vmem:[#allocation2 + $0x3f0] sm:$0xff] %vm27_vm2, %v8505_v47  ;;  %v8491_v0 = vadd.f32 %v17424_v33, %v8429_v61  ;;  %13874 = vmatprep.mubr.msk.f32.mxu0 %vm27_vm2, %v9410_v32 }
 0x39b   :  { %v8508_v38 = vmax.f32 %v8492_v59, 0.0  ;;  %13875 = vmatmul.mubr.msk.f32.gmra.mrb[36].mxu0 %vm27_vm2, %v9411_v14 }
 0x39c   :  { %v8507_v3 = vmax.f32 %v8491_v0, 0.0  ;;  %v13758_v56 = vpop.f32.mrb[44].mxu1  ;;  %v9413_v22 = vld [vmem:[#allocation2 + $0x3d0] sm:$0xff] }
 0x39d   :  { %8525 = vst.msk [vmem:[#allocation2 + $0x420] sm:$0xff] %vm27_vm2, %v8508_v38  ;;  %v8494_v49 = vadd.f32 %v13758_v56, %v17424_v33  ;;  %v8439_v36 = vpop.f32.mrb[45].mxu1  ;;  %v9412_v63 = vld [vmem:[#allocation2 + $0x3c0] sm:$0xff] }
 0x39e   :  { %8524 = vst.msk [vmem:[#allocation2 + $0x410] sm:$0xff] %vm27_vm2, %v8507_v3  ;;  %v8493_v24 = vadd.f32 %v17424_v33, %v8439_v36  ;;  %13877 = vmatprep.mubr.msk.f32.mxu0 %vm27_vm2, %v9412_v63  ;;  %v9634_v36 = vld [vmem:[#allocation2 + $0x251] sm:$0xff] }
 0x39f   :  { %v8510_v4 = vmax.f32 %v8494_v49, 0.0  ;;  %13878 = vmatmul.mubr.msk.f32.gmra.mrb[38].mxu0 %vm27_vm2, %v9413_v22  ;;  %v9633_v49 = vld [vmem:[#allocation2 + $0x241] sm:$0xff]  ;;  %v12021_v63 = vld [vmem:[%s18108_s3 + $0x38] sm:$0xff] }
 0x3a0   :  { %v8509_v44 = vmax.f32 %v8493_v24, 0.0  ;;  %v13761_v51 = vpop.f32.mrb[46].mxu1  ;;  %v9415_v59 = vld [vmem:[#allocation2 + $0x400] sm:$0xff]  ;;  %v9636_v22 = vld [vmem:[#allocation2 + $0x271] sm:$0xff] }
 0x3a1   :  { %8527 = vst.msk [vmem:[#allocation2 + $0x440] sm:$0xff] %vm27_vm2, %v8510_v4  ;;  %v8496_v2 = vadd.f32 %v13761_v51, %v17424_v33  ;;  %v8449_v53 = vpop.f32.mrb[47].mxu1  ;;  %v9414_v47 = vld [vmem:[#allocation2 + $0x3f0] sm:$0xff]  ;;  %v9635_v24 = vld [vmem:[#allocation2 + $0x261] sm:$0xff] }
 0x3a2   :  { %8526 = vst.msk [vmem:[#allocation2 + $0x430] sm:$0xff] %vm27_vm2, %v8509_v44  ;;  %v8495_v60 = vadd.f32 %v17424_v33, %v8449_v53  ;;  %13880 = vmatprep.mubr.msk.f32.mxu0 %vm27_vm2, %v9414_v47  ;;  %v9637_v4 = vld [vmem:[#allocation2 + $0x281] sm:$0xff]  ;;  %v9638_v44 = vld [vmem:[#allocation2 + $0x291] sm:$0xff] }
 0x3a3   :  { %v8512_v61 = vmax.f32 %v8496_v2, 0.0  ;;  %13881 = vmatmul.mubr.msk.f32.gmra.mrb[40].mxu0 %vm27_vm2, %v9415_v59  ;;  %v9639_v51 = vld [vmem:[#allocation2 + $0x2a1] sm:$0xff]  ;;  %v9640_v2 = vld [vmem:[#allocation2 + $0x2b1] sm:$0xff] }
 0x3a4   :  { %v8511_v32 = vmax.f32 %v8495_v60, 0.0  ;;  %v9417_v14 = vld [vmem:[#allocation2 + $0x420] sm:$0xff]  ;;  %v9641_v53 = vld [vmem:[#allocation2 + $0x2d1] sm:$0xff] }
 0x3a5   :  { %8529 = vst.msk [vmem:[#allocation2 + $0x460] sm:$0xff] %vm27_vm2, %v8512_v61  ;;  %v9416_v0 = vld [vmem:[#allocation2 + $0x410] sm:$0xff]  ;;  %v9644_v60 = vld [vmem:[#allocation2 + $0x301] sm:$0xff] }
 0x3a6   :  { %8528 = vst.msk [vmem:[#allocation2 + $0x450] sm:$0xff] %vm27_vm2, %v8511_v32  ;;  %13883 = vmatprep.mubr.msk.f32.mxu0 %vm27_vm2, %v9416_v0  ;;  %v9643_v47 = vld [vmem:[#allocation2 + $0x2f1] sm:$0xff]  ;;  %v9646_v61 = vld [vmem:[#allocation2 + $0x321] sm:$0xff] }
 0x3a7   :  { %13884 = vmatmul.mubr.msk.f32.gmra.mrb[42].mxu0 %vm27_vm2, %v9417_v14  ;;  %v9645_v59 = vld [vmem:[#allocation2 + $0x311] sm:$0xff]  ;;  %v9648_v0 = vld [vmem:[#allocation2 + $0x341] sm:$0xff] }
 0x3a8   :  { %v9419_v33 = vld [vmem:[#allocation2 + $0x440] sm:$0xff]  ;;  %v9647_v32 = vld [vmem:[#allocation2 + $0x331] sm:$0xff] }
 0x3a9   :  { %v9418_v38 = vld [vmem:[#allocation2 + $0x430] sm:$0xff]  ;;  %v12038_v14 = vld [vmem:[%s18108_s3 + $0x40] sm:$0xff] }
 0x3aa   :  { %13886 = vmatprep.mubr.msk.f32.mxu0 %vm27_vm2, %v9418_v38 }
 0x3ab   :  { %13887 = vmatmul.mubr.msk.f32.gmra.mrb[44].mxu0 %vm27_vm2, %v9419_v33 }
 0x3ac   :  { %v9421_v56 = vld [vmem:[#allocation2 + $0x460] sm:$0xff] }
 0x3ad   :  { %v9420_v3 = vld [vmem:[#allocation2 + $0x450] sm:$0xff] }
 0x3ae   :  { %13889 = vmatprep.mubr.msk.f32.mxu0 %vm27_vm2, %v9420_v3 }
 0x3af   :  { %13890 = vmatmul.mubr.msk.f32.gmra.mrb[46].mxu0 %vm27_vm2, %v9421_v56 }
 0x3b0   :  { %13894 = vmatprep.mubr.msk.f32.mxu0 %vm27_vm2, %v9633_v49 }
 0x3b3   :  { %13895 = vmatmul.mubr.msk.f32.vlgmr.msra.gmra.mrb[32].mxu0 %vm27_vm2, %v9634_v36 }
 0x3b4   :  { %13897 = vmatprep.mubr.msk.f32.mxu0 %vm27_vm2, %v9635_v24  ;;  %13919 = vmatpush3.msra.mxu0 %v17896_v45  ;;  %v9642_v45 = vld [vmem:[#allocation2 + $0x2e1] sm:$0xff] }
 0x3b5   :  { %13944 = vmatprep.subr.mxu0 %v12021_v63 }
 0x3b7   :  { %13898 = vmatmul.mubr.msk.f32.gmra.mrb[34].mxu0 %vm27_vm2, %v9636_v22 }
 0x3b8   :  { %13900 = vmatprep.mubr.msk.f32.mxu0 %vm27_vm2, %v9637_v4 }
 0x3bb   :  { %13901 = vmatmul.mubr.msk.f32.gmra.mrb[36].mxu0 %vm27_vm2, %v9638_v44 }
 0x3bc   :  { %13903 = vmatprep.mubr.msk.f32.mxu0 %vm27_vm2, %v9639_v51 }
 0x3bf   :  { %13904 = vmatmul.mubr.msk.f32.gmra.mrb[38].mxu0 %vm27_vm2, %v9640_v2 }
 0x3c0   :  { %13906 = vmatprep.mubr.msk.f32.mxu0 %vm27_vm2, %v9641_v53 }
 0x3c3   :  { %13907 = vmatmul.mubr.msk.f32.gmra.mrb[40].mxu0 %vm27_vm2, %v9642_v45 }
 0x3c4   :  { %13909 = vmatprep.mubr.msk.f32.mxu0 %vm27_vm2, %v9643_v47 }
 0x3c7   :  { %13910 = vmatmul.mubr.msk.f32.gmra.mrb[42].mxu0 %vm27_vm2, %v9644_v60 }
 0x3c8   :  { %13912 = vmatprep.mubr.msk.f32.mxu0 %vm27_vm2, %v9645_v59 }
 0x3cb   :  { %13913 = vmatmul.mubr.msk.f32.gmra.mrb[44].mxu0 %vm27_vm2, %v9646_v61 }
 0x3cc   :  { %13915 = vmatprep.mubr.msk.f32.mxu0 %vm27_vm2, %v9647_v32 }
 0x3cf   :  { %13916 = vmatmul.mubr.msk.f32.gmra.mrb[46].mxu0 %vm27_vm2, %v9648_v0 }
 0x3d0   :  { %13920 = vmatprep.mubr.msk.f32.mxu0 %vm27_vm2, %v17632_v23  ;;  %v9867_v23 = vld [vmem:[#allocation2 + $0x80] sm:$0xff] }
 0x3d3   :  { %13921 = vmatmul.mubr.msk.f32.vlgmr.msra.gmra.mrb[32].mxu0 %vm27_vm2, %v17638_v50  ;;  %v9875_v50 = vld [vmem:[#allocation2 + $0x110] sm:$0xff] }
 0x3d4   :  { %13923 = vmatprep.mubr.msk.f32.mxu0 %vm27_vm2, %v17656_v40  ;;  %13945 = vmatpush3.msra.mxu0 %v12021_v63 }
 0x3d5   :  { %13970 = vmatprep.subr.mxu0 %v12038_v14 }
 0x3d7   :  { %13924 = vmatmul.mubr.msk.f32.gmra.mrb[34].mxu0 %vm27_vm2, %v17661_v21 }
 0x3d8   :  { %13926 = vmatprep.mubr.msk.f32.mxu0 %vm27_vm2, %v17673_v41 }
 0x3db   :  { %13927 = vmatmul.mubr.msk.f32.gmra.mrb[36].mxu0 %vm27_vm2, %v17677_v37 }
 0x3dc   :  { %13929 = vmatprep.mubr.msk.f32.mxu0 %vm27_vm2, %v17689_v16 }
 0x3df   :  { %13930 = vmatmul.mubr.msk.f32.gmra.mrb[38].mxu0 %vm27_vm2, %v9867_v23 }
 0x3e0   :  { %13932 = vmatprep.mubr.msk.f32.mxu0 %vm27_vm2, %v17702_v29 }
 0x3e3   :  { %13933 = vmatmul.mubr.msk.f32.gmra.mrb[40].mxu0 %vm27_vm2, %v17706_v48 }
 0x3e4   :  { %13935 = vmatprep.mubr.msk.f32.mxu0 %vm27_vm2, %v17718_v10 }
 0x3e7   :  { %13936 = vmatmul.mubr.msk.f32.gmra.mrb[42].mxu0 %vm27_vm2, %v17722_v34 }
 0x3e8   :  { %13938 = vmatprep.mubr.msk.f32.mxu0 %vm27_vm2, %v17734_v30 }
 0x3eb   :  { %13939 = vmatmul.mubr.msk.f32.gmra.mrb[44].mxu0 %vm27_vm2, %v17738_v31 }
 0x3ec   :  { %13941 = vmatprep.mubr.msk.f32.mxu0 %vm27_vm2, %v17747_v26 }
 0x3ef   :  { %13942 = vmatmul.mubr.msk.f32.gmra.mrb[46].mxu0 %vm27_vm2, %v9875_v50 }
 0x3f0   :  { %13946 = vmatprep.mubr.msk.f32.mxu0 %vm27_vm2, %v17465_v15  ;;  %v10094_v15 = vld [vmem:[#allocation2 + $0x1a0] sm:$0xff] }
 0x3f3   :  { %13947 = vmatmul.mubr.msk.f32.vlgmr.msra.gmra.mrb[32].mxu0 %vm27_vm2, %v17480_v8  ;;  %v10102_v8 = vld [vmem:[#allocation2 + $0x230] sm:$0xff] }
 0x3f4   :  { %13949 = vmatprep.mubr.msk.f32.mxu0 %vm27_vm2, %v17500_v18  ;;  %13971 = vmatpush3.msra.mxu0 %v12038_v14  ;;  %v10321_v18 = vld [vmem:[#allocation2 + $0x81] sm:$0xff] }
 0x3f7   :  { %13950 = vmatmul.mubr.msk.f32.gmra.mrb[34].mxu0 %vm27_vm2, %v17509_v58  ;;  %v10329_v58 = vld [vmem:[#allocation2 + $0x111] sm:$0xff] }
 0x3f8   :  { %13952 = vmatprep.mubr.msk.f32.mxu0 %vm27_vm2, %v17521_v11  ;;  %v10626_v11 = vld [vmem:[%s18110_s5] sm:$0xff] }
 0x3fb   :  { %13953 = vmatmul.mubr.msk.f32.gmra.mrb[36].mxu0 %vm27_vm2, %v17529_v17  ;;  %v10627_v17 = vld [vmem:[%s18110_s5 + $0x8] sm:$0xff] }
 0x3fc   :  { %13955 = vmatprep.mubr.msk.f32.mxu0 %vm27_vm2, %v17543_v20  ;;  %v14682_v20 = vmov 0.0|0.0  }
 0x3fd   :  { %14003 = vmatprep.subr.bf16.mxu1 %v14682_v20 }
 0x3ff   :  { %13956 = vmatmul.mubr.msk.f32.gmra.mrb[38].mxu0 %vm27_vm2, %v10094_v15 }
 0x400   :  { %13958 = vmatprep.mubr.msk.f32.mxu0 %vm27_vm2, %v17560_v27  ;;  %v14004_v27 = vpack.c.bf16 %v10627_v17, %v10626_v11 }
 0x402   :  { %14005 = vmatpush3.bf16.msra.mxu1 %v14004_v27 }
 0x403   :  { %13959 = vmatmul.mubr.msk.f32.gmra.mrb[40].mxu0 %vm27_vm2, %v17568_v39  ;;  %v18171_v39 = vmov 0.0  }
 0x404   :  { %13961 = vmatprep.mubr.msk.f32.mxu0 %vm27_vm2, %v17579_v42  ;;  %14000 = vmatprep.mubr.msk.f32.mxu1 %vm14683_vm4, %v18171_v39  ;;  %v18055_v42 = vld [vmem:[%s18109_s4] ss:$0 sm:$0xff] }
 0x407   :  { %13962 = vmatmul.mubr.msk.f32.gmra.mrb[42].mxu0 %vm27_vm2, %v17586_v35 }
 0x408   :  { %13964 = vmatprep.mubr.msk.f32.mxu0 %vm27_vm2, %v17596_v6 }
 0x40b   :  { %13965 = vmatmul.mubr.msk.f32.gmra.mrb[44].mxu0 %vm27_vm2, %v17602_v54 }
 0x40c   :  { %13967 = vmatprep.mubr.msk.f32.mxu0 %vm27_vm2, %v17617_v55 }
 0x40f   :  { %13968 = vmatmul.mubr.msk.f32.gmra.mrb[46].mxu0 %vm27_vm2, %v10102_v8 }
 0x410   :  { %13972 = vmatprep.mubr.msk.f32.mxu0 %vm27_vm2, %v17756_v13 }
 0x413   :  { %13973 = vmatmul.mubr.msk.f32.vlgmr.msra.gmra.mrb[32].mxu0 %vm27_vm2, %v17763_v62 }
 0x414   :  { %13975 = vmatprep.mubr.msk.f32.mxu0 %vm27_vm2, %v17772_v28 }
 0x417   :  { %13976 = vmatmul.mubr.msk.f32.gmra.mrb[34].mxu0 %vm27_vm2, %v17776_v25 }
 0x418   :  { %13978 = vmatprep.mubr.msk.f32.mxu0 %vm27_vm2, %v17784_v9 }
 0x41b   :  { %13979 = vmatmul.mubr.msk.f32.gmra.mrb[36].mxu0 %vm27_vm2, %v17788_v1 }
 0x41c   :  { %13981 = vmatprep.mubr.msk.f32.mxu0 %vm27_vm2, %v17798_v19 }
 0x41f   :  { %13982 = vmatmul.mubr.msk.f32.gmra.mrb[38].mxu0 %vm27_vm2, %v10321_v18 }
 0x420   :  { %13984 = vmatprep.mubr.msk.f32.mxu0 %vm27_vm2, %v17810_v7 }
 0x423   :  { %13985 = vmatmul.mubr.msk.f32.gmra.mrb[40].mxu0 %vm27_vm2, %v17814_v12 }
 0x424   :  { %13987 = vmatprep.mubr.msk.f32.mxu0 %vm27_vm2, %v17826_v43 }
 0x427   :  { %13988 = vmatmul.mubr.msk.f32.gmra.mrb[42].mxu0 %vm27_vm2, %v17830_v52 }
 0x428   :  { %13990 = vmatprep.mubr.msk.f32.mxu0 %vm27_vm2, %v17842_v46 }
 0x42b   :  { %13991 = vmatmul.mubr.msk.f32.gmra.mrb[44].mxu0 %vm27_vm2, %v17846_v5 }
 0x42c   :  { %13993 = vmatprep.mubr.msk.f32.mxu0 %vm27_vm2, %v17855_v57 }
 0x42f   :  { %13994 = vmatmul.mubr.msk.f32.gmra.mrb[46].mxu0 %vm27_vm2, %v10329_v58 }
 0x4e6   :  { %v13974_v35 = vpop.f32.mrb[32].mxu0 }
 0x4e7   :  { %v10549_v6 = vadd.f32 %v13974_v35, %v18055_v42  ;;  %v10446_v54 = vpop.f32.mrb[33].mxu0 }
 0x4e8   :  { %v10548_v55 = vadd.f32 %v18055_v42, %v10446_v54 }
 0x4e9   :  { %v10565_v40 = vmax.f32 %v10549_v6, 0.0 }
 0x4ea   :  { %v10564_v21 = vmax.f32 %v10548_v55, 0.0  ;;  %v13977_v41 = vpop.f32.mrb[34].mxu0 }
 0x4eb   :  { %v10582_v37 = vsel %vm10580_vm5, %v10565_v40, 0.0  ;;  %v10551_v16 = vadd.f32 %v13977_v41, %v18055_v42  ;;  %v10456_v29 = vpop.f32.mrb[35].mxu0 }
 0x4ec   :  { %v10581_v48 = vsel %vm10580_vm5, %v10564_v21, 0.0  ;;  %v10550_v10 = vadd.f32 %v18055_v42, %v10456_v29 }
 0x4ed   :  { %v10583_v34 = vadd.f32 %v10582_v37, %v10581_v48  ;;  %v10567_v30 = vmax.f32 %v10551_v16, 0.0 }
 0x4ee   :  { %v10566_v31 = vmax.f32 %v10550_v10, 0.0  ;;  %v13980_v26 = vpop.f32.mrb[36].mxu0 }
 0x4ef   :  { %v10553_v13 = vadd.f32 %v13980_v26, %v18055_v42  ;;  %v10466_v62 = vpop.f32.mrb[37].mxu0  ;;  %v10586_v1 = vsel %vm10580_vm5, %v10567_v30, 0.0 }
 0x4f0   :  { %v10584_v28 = vsel %vm10580_vm5, %v10566_v31, 0.0  ;;  %v10552_v25 = vadd.f32 %v18055_v42, %v10466_v62 }
 0x4f1   :  { %v10585_v9 = vadd.f32 %v10584_v28, %v10583_v34  ;;  %v10569_v19 = vmax.f32 %v10553_v13, 0.0 }
 0x4f2   :  { %v10568_v7 = vmax.f32 %v10552_v25, 0.0  ;;  %v13983_v12 = vpop.f32.mrb[38].mxu0 }
 0x4f3   :  { %v10587_v43 = vadd.f32 %v10586_v1, %v10585_v9  ;;  %v10555_v52 = vadd.f32 %v13983_v12, %v18055_v42  ;;  %v10476_v46 = vpop.f32.mrb[39].mxu0  ;;  %v10590_v33 = vsel %vm10580_vm5, %v10569_v19, 0.0 }
 0x4f4   :  { %v10588_v5 = vsel %vm10580_vm5, %v10568_v7, 0.0  ;;  %v10554_v57 = vadd.f32 %v18055_v42, %v10476_v46 }
 0x4f5   :  { %v10589_v38 = vadd.f32 %v10588_v5, %v10587_v43  ;;  %v10571_v3 = vmax.f32 %v10555_v52, 0.0 }
 0x4f6   :  { %v10570_v56 = vmax.f32 %v10554_v57, 0.0  ;;  %v13986_v49 = vpop.f32.mrb[40].mxu0  ;;  %v12056_v57 = vld [vmem:[%s18111_s6] ss:$0 sm:$0xff] }
 0x4f7   :  { %v10591_v36 = vadd.f32 %v10590_v33, %v10589_v38  ;;  %v10557_v63 = vadd.f32 %v13986_v49, %v18055_v42  ;;  %v10486_v24 = vpop.f32.mrb[41].mxu0  ;;  %v10594_v2 = vsel %vm10580_vm5, %v10571_v3, 0.0 }
 0x4f8   :  { %v10592_v22 = vsel %vm10580_vm5, %v10570_v56, 0.0  ;;  %v10556_v4 = vadd.f32 %v18055_v42, %v10486_v24 }
 0x4f9   :  { %v10593_v44 = vadd.f32 %v10592_v22, %v10591_v36  ;;  %v10573_v51 = vmax.f32 %v10557_v63, 0.0 }
 0x4fa   :  { %v10572_v53 = vmax.f32 %v10556_v4, 0.0  ;;  %v13989_v45 = vpop.f32.mrb[42].mxu0 }
 0x4fb   :  { %v10595_v47 = vadd.f32 %v10594_v2, %v10593_v44  ;;  %v10603_v60 = vsel %vm10580_vm5, %v10573_v51, 0.0  ;;  %v10559_v59 = vadd.f32 %v13989_v45, %v18055_v42  ;;  %v10496_v61 = vpop.f32.mrb[43].mxu0 }
 0x4fc   :  { %v10602_v32 = vsel %vm10580_vm5, %v10572_v53, 0.0  ;;  %v10558_v0 = vadd.f32 %v18055_v42, %v10496_v61 }
 0x4fd   :  { %v10604_v14 = vadd.f32 %v10603_v60, %v10602_v32  ;;  %v10575_v23 = vmax.f32 %v10559_v59, 0.0  ;;  %v10596_v17 = vrot.slane %v10595_v47, 4 }
 0x4fe   :  { %v10574_v50 = vmax.f32 %v10558_v0, 0.0  ;;  %v13992_v15 = vpop.f32.mrb[44].mxu0 }
 0x4ff   :  { %v10561_v8 = vadd.f32 %v13992_v15, %v18055_v42  ;;  %v10506_v18 = vpop.f32.mrb[45].mxu0  ;;  %v10607_v27 = vsel %vm10580_vm5, %v10575_v23, 0.0  ;;  %v10597_v37 = vadd.f32 %v10596_v17, %v10595_v47 }
 0x500   :  { %v10605_v58 = vsel %vm10580_vm5, %v10574_v50, 0.0  ;;  %v10560_v11 = vadd.f32 %v18055_v42, %v10506_v18 }
 0x501   :  { %v10606_v20 = vadd.f32 %v10605_v58, %v10604_v14  ;;  %v10577_v39 = vmax.f32 %v10561_v8, 0.0  ;;  %v10598_v31 = vrot.slane %v10597_v37, 2 }
 0x502   :  { %v10576_v35 = vmax.f32 %v10560_v11, 0.0  ;;  %v13995_v6 = vpop.f32.mrb[46].mxu0 }
 0x503   :  { %v10608_v54 = vadd.f32 %v10607_v27, %v10606_v20  ;;  %v10563_v55 = vadd.f32 %v13995_v6, %v18055_v42  ;;  %v10516_v40 = vpop.f32.mrb[47].mxu0  ;;  %v10611_v29 = vsel %vm10580_vm5, %v10577_v39, 0.0  ;;  %v10599_v28 = vadd.f32 %v10598_v31, %v10597_v37 }
 0x504   :  { %v10609_v21 = vsel %vm10580_vm5, %v10576_v35, 0.0  ;;  %v10562_v41 = vadd.f32 %v18055_v42, %v10516_v40 }
 0x505   :  { %v10610_v16 = vadd.f32 %v10609_v21, %v10608_v54  ;;  %v10579_v48 = vmax.f32 %v10563_v55, 0.0  ;;  %v10600_v1 = vrot.slane %v10599_v28, 1 }
 0x506   :  { %v10578_v10 = vmax.f32 %v10562_v41, 0.0 }
 0x507   :  { %v10612_v34 = vadd.f32 %v10611_v29, %v10610_v16  ;;  %v10615_v13 = vsel %vm10580_vm5, %v10579_v48, 0.0  ;;  %v10601_v7 = vadd.f32 %v10600_v1, %v10599_v28 }
 0x508   :  { %v10613_v30 = vsel %vm10580_vm5, %v10578_v10, 0.0 }
 0x509   :  { %v10614_v26 = vadd.f32 %v10613_v30, %v10612_v34  ;;  %v10624_v52 = vmul.f32 0.015625, %v10601_v7 }
 0x50b   :  { %v10616_v62 = vadd.f32 %v10615_v13, %v10614_v26 }
 0x50d   :  { %v10617_v25 = vrot.slane %v10616_v62, 4 }
 0x50f   :  { %v10618_v9 = vadd.f32 %v10617_v25, %v10616_v62 }
 0x511   :  { %v10619_v19 = vrot.slane %v10618_v9, 2 }
 0x513   :  { %v10620_v42 = vadd.f32 %v10619_v19, %v10618_v9 }
 0x515   :  { %v10621_v12 = vrot.slane %v10620_v42, 1 }
 0x517   :  { %v10622_v43 = vadd.f32 %v10621_v12, %v10620_v42 }
 0x519   :  { %v10625_v46 = vmul.f32 0.015625, %v10622_v43 }
 0x51b   :  { %v10638_v5 = vsel %vm10637_vm6, %v10625_v46, %v10624_v52 }
 0x51c   :  { %14001 = vmatmul.mubr.msk.f32.vlgmr.msra.gmra.mrb[48].mxu1 %vm10580_vm5, %v10638_v5 }
 0x5ef   :  { %v10707_v38 = vpop.f32.mrb[48].mxu1 }
 0x5f0   :  { %v10708_v33 = vadd.f32 %v12056_v57, %v10707_v38  ;;  %v14002_v3 = vpop.f32.mrb[49].mxu1 }
 0x5f2   :  { %10712 = vst.msk [vmem:[#allocation3] sm:$0x3] %vm10711_vm7, %v10708_v33 }
 0x5f3   :  { %14668 = shalt.err (!%p14665_p4)
}
 0x5f4   :  { %s14669_s27 = scalar_lea.hbm %s18112_s7, 32 }
 0x5f5   :  { %p14670_p5 = scmp.ne.s32.totalorder %s18112_s7, %s14669_s27  ;;  %p14673_p6 = scmp.lt.u32.totalorder %s14669_s27, %s18112_s7 }
 0x5f7   :  { %p14675_p7 = pnand %p14673_p6, %p14670_p5 }
 0x5f9   :  { %14678 = shalt.err (!%p14675_p7)
}
 0x5fa   :  { %10722 = dma.vmem_to_hbm [thread:$0]  %s10720_s23, 32, %s18112_s7, [#allocation4]  }
 0x5fb   :  { %14679 = dma.done.wait [#allocation4], 32  }
 0x5fc   :  { %14680 = vsyncadd [#allocation4], 4294967264 }
 0x5fd   :  { %10726 = vsyncpa [#allocation4], 1 }

</bundles_post_ra>
